<compile_context>
chip_gen: v7x
topology: tpu7x:2x2x1
jax: 0.10.0
libtpu: 0.0.40
codegen_flags: <defaults>
</compile_context>

<pallas_src>
import jax
import jax.numpy as jnp
import numpy as np
from jax.experimental import pallas as pl
from jax.experimental.pallas import tpu as pltpu

LANE = 128   # lane width: per-gate / hidden / output padding
SUB = 8      # sublane width: batch padding


def _round_up(x, m):
    return (x + m - 1) // m * m


def _make_kernel(n_layers: int, seq: int, bp: int, hp: int, vp: int):
    S, Bp, Hp, VP = seq, bp, hp, vp
    G = 4 * Hp
    SB = S * Bp

    def kernel(tok_ref, emb_ref, wih_ref, whh_ref, b_ref, wfc_ref, bfc_ref,
               out_ref, gx_buf):
        # tok_ref : (S*Bp, 1)     int32 time-major token ids (pad rows -> zero emb row)
        # emb_ref : (VP, Hp)      zero-padded embedding table
        # wih_ref : (L, Hp, 4*Hp) gate-lane-padded W_ih^T per layer
        # whh_ref : (L, Hp, 4*Hp) gate-lane-padded W_hh^T per layer
        # b_ref   : (L, 1, 4*Hp)  gate-lane-padded (b_ih + b_hh)
        # wfc_ref : (Hp, Op)      padded FC weight (transposed)
        # bfc_ref : (1, Op)       padded FC bias
        # out_ref : (Bp, Op)      sigmoid(FC(h_last)), lane-dense
        # gx_buf  : VMEM (S*Bp, 4*Hp) hoisted input-projection gates for current layer

        # ---- fused embedding gather: one-hot @ table on the MXU (off the serial chain)
        tok = tok_ref[...]                                              # (SB, 1) int32
        vocab_ids = jax.lax.broadcasted_iota(jnp.int32, (SB, VP), 1)
        onehot = (tok == vocab_ids).astype(jnp.float32)                 # (SB, VP)
        x_all = jnp.dot(onehot, emb_ref[...],
                        preferred_element_type=jnp.float32)             # (SB, Hp)

        h = jnp.zeros((Bp, Hp), jnp.float32)
        for layer in range(n_layers):                 # static unroll over layers
            whh_t = whh_ref[layer]                    # (Hp, 4*Hp), loop-invariant below

            # hoisted input projection + bias: ONE big MXU matmul for the whole sequence
            gx_buf[...] = (
                jnp.dot(x_all, wih_ref[layer], preferred_element_type=jnp.float32)
                + b_ref[layer]
            )                                                           # (SB, 4*Hp)

            # recurrent chain: fully unrolled, every access (8,128)-aligned
            h = jnp.zeros((Bp, Hp), jnp.float32)
            c = jnp.zeros((Bp, Hp), jnp.float32)
            hs = []
            for t in range(S):
                gates = gx_buf[pl.ds(t * Bp, Bp), :] + jnp.dot(
                    h, whh_t, preferred_element_type=jnp.float32)       # (Bp, 4*Hp)
                # lane-aligned gates: sigmoid only on [i|f] and [o], tanh only on [g]
                if_g = jax.nn.sigmoid(gates[:, :2 * Hp])                # (Bp, 2*Hp)
                g_g = jnp.tanh(gates[:, 2 * Hp:3 * Hp])                 # (Bp, Hp)
                o_g = jax.nn.sigmoid(gates[:, 3 * Hp:])                 # (Bp, Hp)
                c = if_g[:, Hp:] * c + if_g[:, :Hp] * g_g
                h = o_g * jnp.tanh(c)
                if layer < n_layers - 1:
                    hs.append(h)                      # layer output stays in vregs
            if layer < n_layers - 1:
                x_all = jnp.concatenate(hs, axis=0)   # (SB, Hp) -> next layer's LHS

        logits = (jnp.dot(h, wfc_ref[...], preferred_element_type=jnp.float32)
                  + bfc_ref[...])
        out_ref[...] = jax.nn.sigmoid(logits)         # lane-dense (Bp, Op) store

    return kernel


# ----------------------------------------------------------------------------------
# Parameters: raw PyTorch-layout tensors + a one-time packing step (pad/transpose).
# ----------------------------------------------------------------------------------
def init_params(key, input_size, hidden, output_dim, n_layers):
    """Deterministic synthetic parameters in nn.Embedding / nn.LSTM / nn.Linear layout."""
    H = hidden
    keys = jax.random.split(key, 7)
    return {
        "embedding": jax.random.normal(keys[0], (input_size, H), jnp.float32) * 0.1,
        "w_ih": jax.random.normal(keys[1], (n_layers, 4 * H, H), jnp.float32) * 0.1,
        "w_hh": jax.random.normal(keys[2], (n_layers, 4 * H, H), jnp.float32) * 0.1,
        "b_ih": jax.random.normal(keys[3], (n_layers, 4 * H), jnp.float32) * 0.1,
        "b_hh": jax.random.normal(keys[4], (n_layers, 4 * H), jnp.float32) * 0.1,
        "w_fc": jax.random.normal(keys[5], (output_dim, H), jnp.float32) * 0.1,
        "b_fc": jax.random.normal(keys[6], (output_dim,), jnp.float32) * 0.1,
    }


def _pad_gate_cols(w, H, Hp):
    """(..., 4H) -> (..., 4*Hp): gate g's H columns move to columns [g*Hp, g*Hp + H)."""
    pads = [(0, 0)] * (w.ndim - 1) + [(0, Hp - H)]
    parts = [jnp.pad(w[..., g * H:(g + 1) * H], pads) for g in range(4)]
    return jnp.concatenate(parts, axis=-1)


def pack_params(raw, *, hidden, output_dim, n_layers):
    """One-time layout packing: transpose + pad to lane/sublane-aligned kernel layout."""
    H = hidden
    Hp = _round_up(H, LANE)
    Op = _round_up(output_dim, LANE)
    vocab = raw["embedding"].shape[0]
    VP = _round_up(vocab + 1, LANE)          # +1: dedicated all-zero pad-token row

    w_ih_t = jnp.transpose(raw["w_ih"], (0, 2, 1))               # (L, H, 4H)
    w_hh_t = jnp.transpose(raw["w_hh"], (0, 2, 1))               # (L, H, 4H)
    wih = jnp.pad(_pad_gate_cols(w_ih_t, H, Hp), ((0, 0), (0, Hp - H), (0, 0)))
    whh = jnp.pad(_pad_gate_cols(w_hh_t, H, Hp), ((0, 0), (0, Hp - H), (0, 0)))
    b = _pad_gate_cols(raw["b_ih"] + raw["b_hh"], H, Hp).reshape(n_layers, 1, 4 * Hp)
    emb = jnp.pad(raw["embedding"], ((0, VP - vocab), (0, Hp - H)))
    wfc = jnp.pad(raw["w_fc"].T, ((0, Hp - H), (0, Op - output_dim)))
    bfc = jnp.pad(raw["b_fc"], (0, Op - output_dim)).reshape(1, Op)
    return {
        "emb": emb, "wih": wih, "whh": whh, "b": b, "wfc": wfc, "bfc": bfc,
        "dims": dict(H=H, Hp=Hp, Op=Op, VP=VP, vocab=vocab, L=n_layers, O=output_dim),
    }


def model_gender_forward(tokens, packed):
    """tokens: (batch, seq) int32 token ids (the PyTorch forward transposes with .T)."""
    d = packed["dims"]
    Hp, Op, VP, L, O, vocab = d["Hp"], d["Op"], d["VP"], d["L"], d["O"], d["vocab"]
    B, S = tokens.shape
    Bp = _round_up(B, SUB)

    # Glue: time-major tokens, batch padded with the zero-embedding pad token id.
    tok_t = tokens.T.astype(jnp.int32)                                  # (S, B)
    tok_p = jnp.full((S, Bp), vocab, jnp.int32).at[:, :B].set(tok_t)    # (S, Bp)
    tok2d = tok_p.reshape(S * Bp, 1)

    kernel = _make_kernel(L, S, Bp, Hp, VP)
    out = pl.pallas_call(
        kernel,
        out_shape=jax.ShapeDtypeStruct((Bp, Op), jnp.float32),
        grid=(1,),
        in_specs=[
            pl.BlockSpec((S * Bp, 1), lambda i: (0, 0)),
            pl.BlockSpec((VP, Hp), lambda i: (0, 0)),
            pl.BlockSpec((L, Hp, 4 * Hp), lambda i: (0, 0, 0)),
            pl.BlockSpec((L, Hp, 4 * Hp), lambda i: (0, 0, 0)),
            pl.BlockSpec((L, 1, 4 * Hp), lambda i: (0, 0, 0)),
            pl.BlockSpec((Hp, Op), lambda i: (0, 0)),
            pl.BlockSpec((1, Op), lambda i: (0, 0)),
        ],
        out_specs=pl.BlockSpec((Bp, Op), lambda i: (0, 0)),
        scratch_shapes=[
            pltpu.VMEM((S * Bp, 4 * Hp), jnp.float32),   # gx_buf (hoisted input gates)
        ],
        compiler_params=pltpu.CompilerParams(
            dimension_semantics=("arbitrary",),
            vmem_limit_bytes=32 * 1024 * 1024,
        ),
    )(tok2d, packed["emb"], packed["wih"], packed["whh"], packed["b"],
      packed["wfc"], packed["bfc"])

    # fc_output.view(-1); sigmoid already applied inside the kernel.
    return out[:B, :O].reshape(-1)


# ----------------------------------------------------------------------------------
# Pure-JAX reference (PyTorch nn.LSTM inference semantics) for a correctness check.
# ----------------------------------------------------------------------------------
def reference_forward(tokens, raw, *, hidden, n_layers):
    H = hidden
    P = jax.lax.Precision.HIGHEST
    x = jnp.take(raw["embedding"], tokens.T, axis=0)                    # (S, B, H)
    S, B, _ = x.shape
    h = jnp.zeros((B, H), jnp.float32)
    for l in range(n_layers):
        w_ih, w_hh = raw["w_ih"][l], raw["w_hh"][l]
        b = raw["b_ih"][l] + raw["b_hh"][l]
        h = jnp.zeros((B, H), jnp.float32)
        c = jnp.zeros((B, H), jnp.float32)
        outs = []
        for t in range(S):
            gates = (jnp.dot(x[t], w_ih.T, precision=P)
                     + jnp.dot(h, w_hh.T, precision=P) + b)
            i = jax.nn.sigmoid(gates[:, :H])
            f = jax.nn.sigmoid(gates[:, H:2 * H])
            g = jnp.tanh(gates[:, 2 * H:3 * H])
            o = jax.nn.sigmoid(gates[:, 3 * H:])
            c = f * c + i * g
            h = o * jnp.tanh(c)
            outs.append(h)
        x = jnp.stack(outs, axis=0)
    logits = jnp.dot(h, raw["w_fc"].T, precision=P) + raw["b_fc"]
    return jax.nn.sigmoid(logits.reshape(-1))


if __name__ == "__main__":
    # Small shapes consistent with the module's forward pass.
    input_size = 16    # vocab size
    hidden_size = 32
    output_dim = 1
    n_layers = 2
    batch = 2
    seq = 8

    key = jax.random.PRNGKey(0)
    pkey, tkey = jax.random.split(key)
    raw = init_params(pkey, input_size, hidden_size, output_dim, n_layers)
    packed = pack_params(raw, hidden=hidden_size, output_dim=output_dim,
                         n_layers=n_layers)
    tokens = jax.random.randint(tkey, (batch, seq), 0, input_size, dtype=jnp.int32)

    out = model_gender_forward(tokens, packed)
    jax.block_until_ready(out)
    assert out.shape == (batch * output_dim,)

    ref = reference_forward(tokens, raw, hidden=hidden_size, n_layers=n_layers)
    err = float(np.max(np.abs(np.asarray(out) - np.asarray(ref))))
    assert np.allclose(np.asarray(out), np.asarray(ref), atol=1e-3, rtol=1e-3), err

    print("KERNEL_OK")
</pallas_src>

<mosaic_0001>
module attributes {stable_mosaic.version = 11 : i64} {
  func.func @kernel(%arg0: i32, %arg1: memref<64x1xi32, #tpu.memory_space<vmem>>, %arg2: memref<128x128xf32, #tpu.memory_space<vmem>>, %arg3: memref<2x128x512xf32, #tpu.memory_space<vmem>>, %arg4: memref<2x128x512xf32, #tpu.memory_space<vmem>>, %arg5: memref<2x1x512xf32, #tpu.memory_space<vmem>>, %arg6: memref<128x128xf32, #tpu.memory_space<vmem>>, %arg7: memref<1x128xf32, #tpu.memory_space<vmem>>, %arg8: memref<8x128xf32, #tpu.memory_space<vmem>>, %arg9: memref<64x512xf32, #tpu.memory_space<vmem>>) attributes {dimension_semantics = [#tpu.dimension_semantics<arbitrary>], iteration_bounds = array<i64: 1>, scalar_prefetch = 0 : i64, scratch_operands = 1 : i64, tpu.core_type = #tpu.core_type<tc>, window_params = [{pipeline_mode = #tpu.pipeline_mode<synchronous>, transform_indices = @transform_0, window_bounds = array<i64: 64, 1>}, {pipeline_mode = #tpu.pipeline_mode<synchronous>, transform_indices = @transform_1, window_bounds = array<i64: 128, 128>}, {pipeline_mode = #tpu.pipeline_mode<synchronous>, transform_indices = @transform_2, window_bounds = array<i64: 2, 128, 512>}, {pipeline_mode = #tpu.pipeline_mode<synchronous>, transform_indices = @transform_3, window_bounds = array<i64: 2, 128, 512>}, {pipeline_mode = #tpu.pipeline_mode<synchronous>, transform_indices = @transform_4, window_bounds = array<i64: 2, 1, 512>}, {pipeline_mode = #tpu.pipeline_mode<synchronous>, transform_indices = @transform_5, window_bounds = array<i64: 128, 128>}, {pipeline_mode = #tpu.pipeline_mode<synchronous>, transform_indices = @transform_6, window_bounds = array<i64: 1, 128>}, {pipeline_mode = #tpu.pipeline_mode<synchronous>, transform_indices = @transform_7, window_bounds = array<i64: 8, 128>}]} {
    %c0 = arith.constant 0 : index
    %c0_0 = arith.constant 0 : index
    %0 = vector.load %arg1[%c0, %c0_0] : memref<64x1xi32, #tpu.memory_space<vmem>>, vector<64x1xi32>
    %1 = tpu.iota {dimensions = array<i32: 1>} : vector<64x128xi32>
    %2 = vector.broadcast %0 : vector<64x1xi32> to vector<64x128xi32>
    %3 = arith.cmpi eq, %2, %1 : vector<64x128xi32>
    %4 = arith.extui %3 : vector<64x128xi1> to vector<64x128xi32>
    %5 = arith.sitofp %4 : vector<64x128xi32> to vector<64x128xf32>
    %c0_1 = arith.constant 0 : index
    %c0_2 = arith.constant 0 : index
    %6 = vector.load %arg2[%c0_1, %c0_2] : memref<128x128xf32, #tpu.memory_space<vmem>>, vector<128x128xf32>
    %cst = arith.constant dense<0.000000e+00> : vector<64x128xf32>
    %7 = tpu.matmul %5, %6, %cst {dimension_numbers = #tpu.dot_dimension_numbers<[1], [0], [0], [1], [0, 0, 1, 1], [], []>} : vector<64x128xf32>, vector<128x128xf32>, vector<64x128xf32> -> vector<64x128xf32>
    %c0_3 = arith.constant 0 : index
    %c0_4 = arith.constant 0 : index
    %c0_5 = arith.constant 0 : index
    %8 = vector.load %arg4[%c0_3, %c0_4, %c0_5] : memref<2x128x512xf32, #tpu.memory_space<vmem>>, vector<1x128x512xf32>
    %9 = vector.shape_cast %8 : vector<1x128x512xf32> to vector<128x512xf32>
    %c0_6 = arith.constant 0 : index
    %c0_7 = arith.constant 0 : index
    %c0_8 = arith.constant 0 : index
    %10 = vector.load %arg3[%c0_6, %c0_7, %c0_8] : memref<2x128x512xf32, #tpu.memory_space<vmem>>, vector<1x128x512xf32>
    %11 = vector.shape_cast %10 : vector<1x128x512xf32> to vector<128x512xf32>
    %cst_9 = arith.constant dense<0.000000e+00> : vector<64x512xf32>
    %12 = tpu.matmul %7, %11, %cst_9 {dimension_numbers = #tpu.dot_dimension_numbers<[1], [0], [0], [1], [0, 0, 1, 1], [], []>} : vector<64x128xf32>, vector<128x512xf32>, vector<64x512xf32> -> vector<64x512xf32>
    %c0_10 = arith.constant 0 : index
    %c0_11 = arith.constant 0 : index
    %c0_12 = arith.constant 0 : index
    %13 = vector.load %arg5[%c0_10, %c0_11, %c0_12] : memref<2x1x512xf32, #tpu.memory_space<vmem>>, vector<1x1x512xf32>
    %14 = vector.shape_cast %13 : vector<1x1x512xf32> to vector<1x512xf32>
    %15 = vector.broadcast %14 : vector<1x512xf32> to vector<64x512xf32>
    %16 = arith.addf %12, %15 : vector<64x512xf32>
    %c0_13 = arith.constant 0 : index
    %c0_14 = arith.constant 0 : index
    %17 = vector.load %arg9[%c0_13, %c0_14] : memref<64x512xf32, #tpu.memory_space<vmem>>, vector<64x512xf32>
    tpu.vector_store %arg9[%c0_13, %c0_14], %16 {strides = array<i32>} : memref<64x512xf32, #tpu.memory_space<vmem>>, vector<64x512xf32>,
    %cst_15 = arith.constant 0.000000e+00 : f32
    %18 = vector.broadcast %cst_15 : f32 to vector<8x128xf32>
    %cst_16 = arith.constant 0.000000e+00 : f32
    %19 = vector.broadcast %cst_16 : f32 to vector<8x128xf32>
    %c0_17 = arith.constant 0 : index
    %c0_18 = arith.constant 0 : index
    %20 = vector.load %arg9[%c0_17, %c0_18] : memref<64x512xf32, #tpu.memory_space<vmem>>, vector<8x512xf32>
    %cst_19 = arith.constant dense<0.000000e+00> : vector<8x512xf32>
    %21 = tpu.matmul %18, %9, %cst_19 {dimension_numbers = #tpu.dot_dimension_numbers<[1], [0], [0], [1], [0, 0, 1, 1], [], []>} : vector<8x128xf32>, vector<128x512xf32>, vector<8x512xf32> -> vector<8x512xf32>
    %22 = arith.addf %20, %21 : vector<8x512xf32>
    %23 = vector.extract_strided_slice %22 {offsets = [0, 0], sizes = [8, 256], strides = [1, 1]} : vector<8x512xf32> to vector<8x256xf32>
    %24 = arith.negf %23 : vector<8x256xf32>
    %25 = math.exp %24 : vector<8x256xf32>
    %cst_20 = arith.constant 1.000000e+00 : f32
    %26 = vector.broadcast %cst_20 : f32 to vector<8x256xf32>
    %27 = arith.addf %26, %25 : vector<8x256xf32>
    %28 = arith.divf %26, %27 : vector<8x256xf32>
    %29 = vector.extract_strided_slice %22 {offsets = [0, 256], sizes = [8, 128], strides = [1, 1]} : vector<8x512xf32> to vector<8x128xf32>
    %30 = math.tanh %29 : vector<8x128xf32>
    %31 = vector.extract_strided_slice %22 {offsets = [0, 384], sizes = [8, 128], strides = [1, 1]} : vector<8x512xf32> to vector<8x128xf32>
    %32 = arith.negf %31 : vector<8x128xf32>
    %33 = math.exp %32 : vector<8x128xf32>
    %cst_21 = arith.constant 1.000000e+00 : f32
    %34 = vector.broadcast %cst_21 : f32 to vector<8x128xf32>
    %35 = arith.addf %34, %33 : vector<8x128xf32>
    %36 = arith.divf %34, %35 : vector<8x128xf32>
    %37 = vector.extract_strided_slice %28 {offsets = [0, 128], sizes = [8, 128], strides = [1, 1]} : vector<8x256xf32> to vector<8x128xf32>
    %38 = arith.mulf %37, %19 : vector<8x128xf32>
    %39 = vector.extract_strided_slice %28 {offsets = [0, 0], sizes = [8, 128], strides = [1, 1]} : vector<8x256xf32> to vector<8x128xf32>
    %40 = arith.mulf %39, %30 : vector<8x128xf32>
    %41 = arith.addf %38, %40 : vector<8x128xf32>
    %42 = math.tanh %41 : vector<8x128xf32>
    %43 = arith.mulf %36, %42 : vector<8x128xf32>
    %c8 = arith.constant 8 : index
    %c0_22 = arith.constant 0 : index
    %44 = vector.load %arg9[%c8, %c0_22] : memref<64x512xf32, #tpu.memory_space<vmem>>, vector<8x512xf32>
    %cst_23 = arith.constant dense<0.000000e+00> : vector<8x512xf32>
    %45 = tpu.matmul %43, %9, %cst_23 {dimension_numbers = #tpu.dot_dimension_numbers<[1], [0], [0], [1], [0, 0, 1, 1], [], []>} : vector<8x128xf32>, vector<128x512xf32>, vector<8x512xf32> -> vector<8x512xf32>
    %46 = arith.addf %44, %45 : vector<8x512xf32>
    %47 = vector.extract_strided_slice %46 {offsets = [0, 0], sizes = [8, 256], strides = [1, 1]} : vector<8x512xf32> to vector<8x256xf32>
    %48 = arith.negf %47 : vector<8x256xf32>
    %49 = math.exp %48 : vector<8x256xf32>
    %cst_24 = arith.constant 1.000000e+00 : f32
    %50 = vector.broadcast %cst_24 : f32 to vector<8x256xf32>
    %51 = arith.addf %50, %49 : vector<8x256xf32>
    %52 = arith.divf %50, %51 : vector<8x256xf32>
    %53 = vector.extract_strided_slice %46 {offsets = [0, 256], sizes = [8, 128], strides = [1, 1]} : vector<8x512xf32> to vector<8x128xf32>
    %54 = math.tanh %53 : vector<8x128xf32>
    %55 = vector.extract_strided_slice %46 {offsets = [0, 384], sizes = [8, 128], strides = [1, 1]} : vector<8x512xf32> to vector<8x128xf32>
    %56 = arith.negf %55 : vector<8x128xf32>
    %57 = math.exp %56 : vector<8x128xf32>
    %cst_25 = arith.constant 1.000000e+00 : f32
    %58 = vector.broadcast %cst_25 : f32 to vector<8x128xf32>
    %59 = arith.addf %58, %57 : vector<8x128xf32>
    %60 = arith.divf %58, %59 : vector<8x128xf32>
    %61 = vector.extract_strided_slice %52 {offsets = [0, 128], sizes = [8, 128], strides = [1, 1]} : vector<8x256xf32> to vector<8x128xf32>
    %62 = arith.mulf %61, %41 : vector<8x128xf32>
    %63 = vector.extract_strided_slice %52 {offsets = [0, 0], sizes = [8, 128], strides = [1, 1]} : vector<8x256xf32> to vector<8x128xf32>
    %64 = arith.mulf %63, %54 : vector<8x128xf32>
    %65 = arith.addf %62, %64 : vector<8x128xf32>
    %66 = math.tanh %65 : vector<8x128xf32>
    %67 = arith.mulf %60, %66 : vector<8x128xf32>
    %c16 = arith.constant 16 : index
    %c0_26 = arith.constant 0 : index
    %68 = vector.load %arg9[%c16, %c0_26] : memref<64x512xf32, #tpu.memory_space<vmem>>, vector<8x512xf32>
    %cst_27 = arith.constant dense<0.000000e+00> : vector<8x512xf32>
    %69 = tpu.matmul %67, %9, %cst_27 {dimension_numbers = #tpu.dot_dimension_numbers<[1], [0], [0], [1], [0, 0, 1, 1], [], []>} : vector<8x128xf32>, vector<128x512xf32>, vector<8x512xf32> -> vector<8x512xf32>
    %70 = arith.addf %68, %69 : vector<8x512xf32>
    %71 = vector.extract_strided_slice %70 {offsets = [0, 0], sizes = [8, 256], strides = [1, 1]} : vector<8x512xf32> to vector<8x256xf32>
    %72 = arith.negf %71 : vector<8x256xf32>
    %73 = math.exp %72 : vector<8x256xf32>
    %cst_28 = arith.constant 1.000000e+00 : f32
    %74 = vector.broadcast %cst_28 : f32 to vector<8x256xf32>
    %75 = arith.addf %74, %73 : vector<8x256xf32>
    %76 = arith.divf %74, %75 : vector<8x256xf32>
    %77 = vector.extract_strided_slice %70 {offsets = [0, 256], sizes = [8, 128], strides = [1, 1]} : vector<8x512xf32> to vector<8x128xf32>
    %78 = math.tanh %77 : vector<8x128xf32>
    %79 = vector.extract_strided_slice %70 {offsets = [0, 384], sizes = [8, 128], strides = [1, 1]} : vector<8x512xf32> to vector<8x128xf32>
    %80 = arith.negf %79 : vector<8x128xf32>
    %81 = math.exp %80 : vector<8x128xf32>
    %cst_29 = arith.constant 1.000000e+00 : f32
    %82 = vector.broadcast %cst_29 : f32 to vector<8x128xf32>
    %83 = arith.addf %82, %81 : vector<8x128xf32>
    %84 = arith.divf %82, %83 : vector<8x128xf32>
    %85 = vector.extract_strided_slice %76 {offsets = [0, 128], sizes = [8, 128], strides = [1, 1]} : vector<8x256xf32> to vector<8x128xf32>
    %86 = arith.mulf %85, %65 : vector<8x128xf32>
    %87 = vector.extract_strided_slice %76 {offsets = [0, 0], sizes = [8, 128], strides = [1, 1]} : vector<8x256xf32> to vector<8x128xf32>
    %88 = arith.mulf %87, %78 : vector<8x128xf32>
    %89 = arith.addf %86, %88 : vector<8x128xf32>
    %90 = math.tanh %89 : vector<8x128xf32>
    %91 = arith.mulf %84, %90 : vector<8x128xf32>
    %c24 = arith.constant 24 : index
    %c0_30 = arith.constant 0 : index
    %92 = vector.load %arg9[%c24, %c0_30] : memref<64x512xf32, #tpu.memory_space<vmem>>, vector<8x512xf32>
    %cst_31 = arith.constant dense<0.000000e+00> : vector<8x512xf32>
    %93 = tpu.matmul %91, %9, %cst_31 {dimension_numbers = #tpu.dot_dimension_numbers<[1], [0], [0], [1], [0, 0, 1, 1], [], []>} : vector<8x128xf32>, vector<128x512xf32>, vector<8x512xf32> -> vector<8x512xf32>
    %94 = arith.addf %92, %93 : vector<8x512xf32>
    %95 = vector.extract_strided_slice %94 {offsets = [0, 0], sizes = [8, 256], strides = [1, 1]} : vector<8x512xf32> to vector<8x256xf32>
    %96 = arith.negf %95 : vector<8x256xf32>
    %97 = math.exp %96 : vector<8x256xf32>
    %cst_32 = arith.constant 1.000000e+00 : f32
    %98 = vector.broadcast %cst_32 : f32 to vector<8x256xf32>
    %99 = arith.addf %98, %97 : vector<8x256xf32>
    %100 = arith.divf %98, %99 : vector<8x256xf32>
    %101 = vector.extract_strided_slice %94 {offsets = [0, 256], sizes = [8, 128], strides = [1, 1]} : vector<8x512xf32> to vector<8x128xf32>
    %102 = math.tanh %101 : vector<8x128xf32>
    %103 = vector.extract_strided_slice %94 {offsets = [0, 384], sizes = [8, 128], strides = [1, 1]} : vector<8x512xf32> to vector<8x128xf32>
    %104 = arith.negf %103 : vector<8x128xf32>
    %105 = math.exp %104 : vector<8x128xf32>
    %cst_33 = arith.constant 1.000000e+00 : f32
    %106 = vector.broadcast %cst_33 : f32 to vector<8x128xf32>
    %107 = arith.addf %106, %105 : vector<8x128xf32>
    %108 = arith.divf %106, %107 : vector<8x128xf32>
    %109 = vector.extract_strided_slice %100 {offsets = [0, 128], sizes = [8, 128], strides = [1, 1]} : vector<8x256xf32> to vector<8x128xf32>
    %110 = arith.mulf %109, %89 : vector<8x128xf32>
    %111 = vector.extract_strided_slice %100 {offsets = [0, 0], sizes = [8, 128], strides = [1, 1]} : vector<8x256xf32> to vector<8x128xf32>
    %112 = arith.mulf %111, %102 : vector<8x128xf32>
    %113 = arith.addf %110, %112 : vector<8x128xf32>
    %114 = math.tanh %113 : vector<8x128xf32>
    %115 = arith.mulf %108, %114 : vector<8x128xf32>
    %c32 = arith.constant 32 : index
    %c0_34 = arith.constant 0 : index
    %116 = vector.load %arg9[%c32, %c0_34] : memref<64x512xf32, #tpu.memory_space<vmem>>, vector<8x512xf32>
    %cst_35 = arith.constant dense<0.000000e+00> : vector<8x512xf32>
    %117 = tpu.matmul %115, %9, %cst_35 {dimension_numbers = #tpu.dot_dimension_numbers<[1], [0], [0], [1], [0, 0, 1, 1], [], []>} : vector<8x128xf32>, vector<128x512xf32>, vector<8x512xf32> -> vector<8x512xf32>
    %118 = arith.addf %116, %117 : vector<8x512xf32>
    %119 = vector.extract_strided_slice %118 {offsets = [0, 0], sizes = [8, 256], strides = [1, 1]} : vector<8x512xf32> to vector<8x256xf32>
    %120 = arith.negf %119 : vector<8x256xf32>
    %121 = math.exp %120 : vector<8x256xf32>
    %cst_36 = arith.constant 1.000000e+00 : f32
    %122 = vector.broadcast %cst_36 : f32 to vector<8x256xf32>
    %123 = arith.addf %122, %121 : vector<8x256xf32>
    %124 = arith.divf %122, %123 : vector<8x256xf32>
    %125 = vector.extract_strided_slice %118 {offsets = [0, 256], sizes = [8, 128], strides = [1, 1]} : vector<8x512xf32> to vector<8x128xf32>
    %126 = math.tanh %125 : vector<8x128xf32>
    %127 = vector.extract_strided_slice %118 {offsets = [0, 384], sizes = [8, 128], strides = [1, 1]} : vector<8x512xf32> to vector<8x128xf32>
    %128 = arith.negf %127 : vector<8x128xf32>
    %129 = math.exp %128 : vector<8x128xf32>
    %cst_37 = arith.constant 1.000000e+00 : f32
    %130 = vector.broadcast %cst_37 : f32 to vector<8x128xf32>
    %131 = arith.addf %130, %129 : vector<8x128xf32>
    %132 = arith.divf %130, %131 : vector<8x128xf32>
    %133 = vector.extract_strided_slice %124 {offsets = [0, 128], sizes = [8, 128], strides = [1, 1]} : vector<8x256xf32> to vector<8x128xf32>
    %134 = arith.mulf %133, %113 : vector<8x128xf32>
    %135 = vector.extract_strided_slice %124 {offsets = [0, 0], sizes = [8, 128], strides = [1, 1]} : vector<8x256xf32> to vector<8x128xf32>
    %136 = arith.mulf %135, %126 : vector<8x128xf32>
    %137 = arith.addf %134, %136 : vector<8x128xf32>
    %138 = math.tanh %137 : vector<8x128xf32>
    %139 = arith.mulf %132, %138 : vector<8x128xf32>
    %c40 = arith.constant 40 : index
    %c0_38 = arith.constant 0 : index
    %140 = vector.load %arg9[%c40, %c0_38] : memref<64x512xf32, #tpu.memory_space<vmem>>, vector<8x512xf32>
    %cst_39 = arith.constant dense<0.000000e+00> : vector<8x512xf32>
    %141 = tpu.matmul %139, %9, %cst_39 {dimension_numbers = #tpu.dot_dimension_numbers<[1], [0], [0], [1], [0, 0, 1, 1], [], []>} : vector<8x128xf32>, vector<128x512xf32>, vector<8x512xf32> -> vector<8x512xf32>
    %142 = arith.addf %140, %141 : vector<8x512xf32>
    %143 = vector.extract_strided_slice %142 {offsets = [0, 0], sizes = [8, 256], strides = [1, 1]} : vector<8x512xf32> to vector<8x256xf32>
    %144 = arith.negf %143 : vector<8x256xf32>
    %145 = math.exp %144 : vector<8x256xf32>
    %cst_40 = arith.constant 1.000000e+00 : f32
    %146 = vector.broadcast %cst_40 : f32 to vector<8x256xf32>
    %147 = arith.addf %146, %145 : vector<8x256xf32>
    %148 = arith.divf %146, %147 : vector<8x256xf32>
    %149 = vector.extract_strided_slice %142 {offsets = [0, 256], sizes = [8, 128], strides = [1, 1]} : vector<8x512xf32> to vector<8x128xf32>
    %150 = math.tanh %149 : vector<8x128xf32>
    %151 = vector.extract_strided_slice %142 {offsets = [0, 384], sizes = [8, 128], strides = [1, 1]} : vector<8x512xf32> to vector<8x128xf32>
    %152 = arith.negf %151 : vector<8x128xf32>
    %153 = math.exp %152 : vector<8x128xf32>
    %cst_41 = arith.constant 1.000000e+00 : f32
    %154 = vector.broadcast %cst_41 : f32 to vector<8x128xf32>
    %155 = arith.addf %154, %153 : vector<8x128xf32>
    %156 = arith.divf %154, %155 : vector<8x128xf32>
    %157 = vector.extract_strided_slice %148 {offsets = [0, 128], sizes = [8, 128], strides = [1, 1]} : vector<8x256xf32> to vector<8x128xf32>
    %158 = arith.mulf %157, %137 : vector<8x128xf32>
    %159 = vector.extract_strided_slice %148 {offsets = [0, 0], sizes = [8, 128], strides = [1, 1]} : vector<8x256xf32> to vector<8x128xf32>
    %160 = arith.mulf %159, %150 : vector<8x128xf32>
    %161 = arith.addf %158, %160 : vector<8x128xf32>
    %162 = math.tanh %161 : vector<8x128xf32>
    %163 = arith.mulf %156, %162 : vector<8x128xf32>
    %c48 = arith.constant 48 : index
    %c0_42 = arith.constant 0 : index
    %164 = vector.load %arg9[%c48, %c0_42] : memref<64x512xf32, #tpu.memory_space<vmem>>, vector<8x512xf32>
    %cst_43 = arith.constant dense<0.000000e+00> : vector<8x512xf32>
    %165 = tpu.matmul %163, %9, %cst_43 {dimension_numbers = #tpu.dot_dimension_numbers<[1], [0], [0], [1], [0, 0, 1, 1], [], []>} : vector<8x128xf32>, vector<128x512xf32>, vector<8x512xf32> -> vector<8x512xf32>
    %166 = arith.addf %164, %165 : vector<8x512xf32>
    %167 = vector.extract_strided_slice %166 {offsets = [0, 0], sizes = [8, 256], strides = [1, 1]} : vector<8x512xf32> to vector<8x256xf32>
    %168 = arith.negf %167 : vector<8x256xf32>
    %169 = math.exp %168 : vector<8x256xf32>
    %cst_44 = arith.constant 1.000000e+00 : f32
    %170 = vector.broadcast %cst_44 : f32 to vector<8x256xf32>
    %171 = arith.addf %170, %169 : vector<8x256xf32>
    %172 = arith.divf %170, %171 : vector<8x256xf32>
    %173 = vector.extract_strided_slice %166 {offsets = [0, 256], sizes = [8, 128], strides = [1, 1]} : vector<8x512xf32> to vector<8x128xf32>
    %174 = math.tanh %173 : vector<8x128xf32>
    %175 = vector.extract_strided_slice %166 {offsets = [0, 384], sizes = [8, 128], strides = [1, 1]} : vector<8x512xf32> to vector<8x128xf32>
    %176 = arith.negf %175 : vector<8x128xf32>
    %177 = math.exp %176 : vector<8x128xf32>
    %cst_45 = arith.constant 1.000000e+00 : f32
    %178 = vector.broadcast %cst_45 : f32 to vector<8x128xf32>
    %179 = arith.addf %178, %177 : vector<8x128xf32>
    %180 = arith.divf %178, %179 : vector<8x128xf32>
    %181 = vector.extract_strided_slice %172 {offsets = [0, 128], sizes = [8, 128], strides = [1, 1]} : vector<8x256xf32> to vector<8x128xf32>
    %182 = arith.mulf %181, %161 : vector<8x128xf32>
    %183 = vector.extract_strided_slice %172 {offsets = [0, 0], sizes = [8, 128], strides = [1, 1]} : vector<8x256xf32> to vector<8x128xf32>
    %184 = arith.mulf %183, %174 : vector<8x128xf32>
    %185 = arith.addf %182, %184 : vector<8x128xf32>
    %186 = math.tanh %185 : vector<8x128xf32>
    %187 = arith.mulf %180, %186 : vector<8x128xf32>
    %c56 = arith.constant 56 : index
    %c0_46 = arith.constant 0 : index
    %188 = vector.load %arg9[%c56, %c0_46] : memref<64x512xf32, #tpu.memory_space<vmem>>, vector<8x512xf32>
    %cst_47 = arith.constant dense<0.000000e+00> : vector<8x512xf32>
    %189 = tpu.matmul %187, %9, %cst_47 {dimension_numbers = #tpu.dot_dimension_numbers<[1], [0], [0], [1], [0, 0, 1, 1], [], []>} : vector<8x128xf32>, vector<128x512xf32>, vector<8x512xf32> -> vector<8x512xf32>
    %190 = arith.addf %188, %189 : vector<8x512xf32>
    %191 = vector.extract_strided_slice %190 {offsets = [0, 0], sizes = [8, 256], strides = [1, 1]} : vector<8x512xf32> to vector<8x256xf32>
    %192 = arith.negf %191 : vector<8x256xf32>
    %193 = math.exp %192 : vector<8x256xf32>
    %cst_48 = arith.constant 1.000000e+00 : f32
    %194 = vector.broadcast %cst_48 : f32 to vector<8x256xf32>
    %195 = arith.addf %194, %193 : vector<8x256xf32>
    %196 = arith.divf %194, %195 : vector<8x256xf32>
    %197 = vector.extract_strided_slice %190 {offsets = [0, 256], sizes = [8, 128], strides = [1, 1]} : vector<8x512xf32> to vector<8x128xf32>
    %198 = math.tanh %197 : vector<8x128xf32>
    %199 = vector.extract_strided_slice %190 {offsets = [0, 384], sizes = [8, 128], strides = [1, 1]} : vector<8x512xf32> to vector<8x128xf32>
    %200 = arith.negf %199 : vector<8x128xf32>
    %201 = math.exp %200 : vector<8x128xf32>
    %cst_49 = arith.constant 1.000000e+00 : f32
    %202 = vector.broadcast %cst_49 : f32 to vector<8x128xf32>
    %203 = arith.addf %202, %201 : vector<8x128xf32>
    %204 = arith.divf %202, %203 : vector<8x128xf32>
    %205 = vector.extract_strided_slice %196 {offsets = [0, 128], sizes = [8, 128], strides = [1, 1]} : vector<8x256xf32> to vector<8x128xf32>
    %206 = arith.mulf %205, %185 : vector<8x128xf32>
    %207 = vector.extract_strided_slice %196 {offsets = [0, 0], sizes = [8, 128], strides = [1, 1]} : vector<8x256xf32> to vector<8x128xf32>
    %208 = arith.mulf %207, %198 : vector<8x128xf32>
    %209 = arith.addf %206, %208 : vector<8x128xf32>
    %210 = math.tanh %209 : vector<8x128xf32>
    %211 = arith.mulf %204, %210 : vector<8x128xf32>
    %212 = tpu.concatenate %43, %67, %91, %115, %139, %163, %187, %211 in 0 : vector<8x128xf32>, vector<8x128xf32>, vector<8x128xf32>, vector<8x128xf32>, vector<8x128xf32>, vector<8x128xf32>, vector<8x128xf32>, vector<8x128xf32> -> vector<64x128xf32>
    %c1 = arith.constant 1 : index
    %c0_50 = arith.constant 0 : index
    %c0_51 = arith.constant 0 : index
    %213 = vector.load %arg4[%c1, %c0_50, %c0_51] : memref<2x128x512xf32, #tpu.memory_space<vmem>>, vector<1x128x512xf32>
    %214 = vector.shape_cast %213 : vector<1x128x512xf32> to vector<128x512xf32>
    %c1_52 = arith.constant 1 : index
    %c0_53 = arith.constant 0 : index
    %c0_54 = arith.constant 0 : index
    %215 = vector.load %arg3[%c1_52, %c0_53, %c0_54] : memref<2x128x512xf32, #tpu.memory_space<vmem>>, vector<1x128x512xf32>
    %216 = vector.shape_cast %215 : vector<1x128x512xf32> to vector<128x512xf32>
    %cst_55 = arith.constant dense<0.000000e+00> : vector<64x512xf32>
    %217 = tpu.matmul %212, %216, %cst_55 {dimension_numbers = #tpu.dot_dimension_numbers<[1], [0], [0], [1], [0, 0, 1, 1], [], []>} : vector<64x128xf32>, vector<128x512xf32>, vector<64x512xf32> -> vector<64x512xf32>
    %c1_56 = arith.constant 1 : index
    %c0_57 = arith.constant 0 : index
    %c0_58 = arith.constant 0 : index
    %218 = vector.load %arg5[%c1_56, %c0_57, %c0_58] : memref<2x1x512xf32, #tpu.memory_space<vmem>>, vector<1x1x512xf32>
    %219 = vector.shape_cast %218 : vector<1x1x512xf32> to vector<1x512xf32>
    %220 = vector.broadcast %219 : vector<1x512xf32> to vector<64x512xf32>
    %221 = arith.addf %217, %220 : vector<64x512xf32>
    %c0_59 = arith.constant 0 : index
    %c0_60 = arith.constant 0 : index
    %222 = vector.load %arg9[%c0_59, %c0_60] : memref<64x512xf32, #tpu.memory_space<vmem>>, vector<64x512xf32>
    tpu.vector_store %arg9[%c0_59, %c0_60], %221 {strides = array<i32>} : memref<64x512xf32, #tpu.memory_space<vmem>>, vector<64x512xf32>,
    %cst_61 = arith.constant 0.000000e+00 : f32
    %223 = vector.broadcast %cst_61 : f32 to vector<8x128xf32>
    %cst_62 = arith.constant 0.000000e+00 : f32
    %224 = vector.broadcast %cst_62 : f32 to vector<8x128xf32>
    %c0_63 = arith.constant 0 : index
    %c0_64 = arith.constant 0 : index
    %225 = vector.load %arg9[%c0_63, %c0_64] : memref<64x512xf32, #tpu.memory_space<vmem>>, vector<8x512xf32>
    %cst_65 = arith.constant dense<0.000000e+00> : vector<8x512xf32>
    %226 = tpu.matmul %223, %214, %cst_65 {dimension_numbers = #tpu.dot_dimension_numbers<[1], [0], [0], [1], [0, 0, 1, 1], [], []>} : vector<8x128xf32>, vector<128x512xf32>, vector<8x512xf32> -> vector<8x512xf32>
    %227 = arith.addf %225, %226 : vector<8x512xf32>
    %228 = vector.extract_strided_slice %227 {offsets = [0, 0], sizes = [8, 256], strides = [1, 1]} : vector<8x512xf32> to vector<8x256xf32>
    %229 = arith.negf %228 : vector<8x256xf32>
    %230 = math.exp %229 : vector<8x256xf32>
    %cst_66 = arith.constant 1.000000e+00 : f32
    %231 = vector.broadcast %cst_66 : f32 to vector<8x256xf32>
    %232 = arith.addf %231, %230 : vector<8x256xf32>
    %233 = arith.divf %231, %232 : vector<8x256xf32>
    %234 = vector.extract_strided_slice %227 {offsets = [0, 256], sizes = [8, 128], strides = [1, 1]} : vector<8x512xf32> to vector<8x128xf32>
    %235 = math.tanh %234 : vector<8x128xf32>
    %236 = vector.extract_strided_slice %227 {offsets = [0, 384], sizes = [8, 128], strides = [1, 1]} : vector<8x512xf32> to vector<8x128xf32>
    %237 = arith.negf %236 : vector<8x128xf32>
    %238 = math.exp %237 : vector<8x128xf32>
    %cst_67 = arith.constant 1.000000e+00 : f32
    %239 = vector.broadcast %cst_67 : f32 to vector<8x128xf32>
    %240 = arith.addf %239, %238 : vector<8x128xf32>
    %241 = arith.divf %239, %240 : vector<8x128xf32>
    %242 = vector.extract_strided_slice %233 {offsets = [0, 128], sizes = [8, 128], strides = [1, 1]} : vector<8x256xf32> to vector<8x128xf32>
    %243 = arith.mulf %242, %224 : vector<8x128xf32>
    %244 = vector.extract_strided_slice %233 {offsets = [0, 0], sizes = [8, 128], strides = [1, 1]} : vector<8x256xf32> to vector<8x128xf32>
    %245 = arith.mulf %244, %235 : vector<8x128xf32>
    %246 = arith.addf %243, %245 : vector<8x128xf32>
    %247 = math.tanh %246 : vector<8x128xf32>
    %248 = arith.mulf %241, %247 : vector<8x128xf32>
    %c8_68 = arith.constant 8 : index
    %c0_69 = arith.constant 0 : index
    %249 = vector.load %arg9[%c8_68, %c0_69] : memref<64x512xf32, #tpu.memory_space<vmem>>, vector<8x512xf32>
    %cst_70 = arith.constant dense<0.000000e+00> : vector<8x512xf32>
    %250 = tpu.matmul %248, %214, %cst_70 {dimension_numbers = #tpu.dot_dimension_numbers<[1], [0], [0], [1], [0, 0, 1, 1], [], []>} : vector<8x128xf32>, vector<128x512xf32>, vector<8x512xf32> -> vector<8x512xf32>
    %251 = arith.addf %249, %250 : vector<8x512xf32>
    %252 = vector.extract_strided_slice %251 {offsets = [0, 0], sizes = [8, 256], strides = [1, 1]} : vector<8x512xf32> to vector<8x256xf32>
    %253 = arith.negf %252 : vector<8x256xf32>
    %254 = math.exp %253 : vector<8x256xf32>
    %cst_71 = arith.constant 1.000000e+00 : f32
    %255 = vector.broadcast %cst_71 : f32 to vector<8x256xf32>
    %256 = arith.addf %255, %254 : vector<8x256xf32>
    %257 = arith.divf %255, %256 : vector<8x256xf32>
    %258 = vector.extract_strided_slice %251 {offsets = [0, 256], sizes = [8, 128], strides = [1, 1]} : vector<8x512xf32> to vector<8x128xf32>
    %259 = math.tanh %258 : vector<8x128xf32>
    %260 = vector.extract_strided_slice %251 {offsets = [0, 384], sizes = [8, 128], strides = [1, 1]} : vector<8x512xf32> to vector<8x128xf32>
    %261 = arith.negf %260 : vector<8x128xf32>
    %262 = math.exp %261 : vector<8x128xf32>
    %cst_72 = arith.constant 1.000000e+00 : f32
    %263 = vector.broadcast %cst_72 : f32 to vector<8x128xf32>
    %264 = arith.addf %263, %262 : vector<8x128xf32>
    %265 = arith.divf %263, %264 : vector<8x128xf32>
    %266 = vector.extract_strided_slice %257 {offsets = [0, 128], sizes = [8, 128], strides = [1, 1]} : vector<8x256xf32> to vector<8x128xf32>
    %267 = arith.mulf %266, %246 : vector<8x128xf32>
    %268 = vector.extract_strided_slice %257 {offsets = [0, 0], sizes = [8, 128], strides = [1, 1]} : vector<8x256xf32> to vector<8x128xf32>
    %269 = arith.mulf %268, %259 : vector<8x128xf32>
    %270 = arith.addf %267, %269 : vector<8x128xf32>
    %271 = math.tanh %270 : vector<8x128xf32>
    %272 = arith.mulf %265, %271 : vector<8x128xf32>
    %c16_73 = arith.constant 16 : index
    %c0_74 = arith.constant 0 : index
    %273 = vector.load %arg9[%c16_73, %c0_74] : memref<64x512xf32, #tpu.memory_space<vmem>>, vector<8x512xf32>
    %cst_75 = arith.constant dense<0.000000e+00> : vector<8x512xf32>
    %274 = tpu.matmul %272, %214, %cst_75 {dimension_numbers = #tpu.dot_dimension_numbers<[1], [0], [0], [1], [0, 0, 1, 1], [], []>} : vector<8x128xf32>, vector<128x512xf32>, vector<8x512xf32> -> vector<8x512xf32>
    %275 = arith.addf %273, %274 : vector<8x512xf32>
    %276 = vector.extract_strided_slice %275 {offsets = [0, 0], sizes = [8, 256], strides = [1, 1]} : vector<8x512xf32> to vector<8x256xf32>
    %277 = arith.negf %276 : vector<8x256xf32>
    %278 = math.exp %277 : vector<8x256xf32>
    %cst_76 = arith.constant 1.000000e+00 : f32
    %279 = vector.broadcast %cst_76 : f32 to vector<8x256xf32>
    %280 = arith.addf %279, %278 : vector<8x256xf32>
    %281 = arith.divf %279, %280 : vector<8x256xf32>
    %282 = vector.extract_strided_slice %275 {offsets = [0, 256], sizes = [8, 128], strides = [1, 1]} : vector<8x512xf32> to vector<8x128xf32>
    %283 = math.tanh %282 : vector<8x128xf32>
    %284 = vector.extract_strided_slice %275 {offsets = [0, 384], sizes = [8, 128], strides = [1, 1]} : vector<8x512xf32> to vector<8x128xf32>
    %285 = arith.negf %284 : vector<8x128xf32>
    %286 = math.exp %285 : vector<8x128xf32>
    %cst_77 = arith.constant 1.000000e+00 : f32
    %287 = vector.broadcast %cst_77 : f32 to vector<8x128xf32>
    %288 = arith.addf %287, %286 : vector<8x128xf32>
    %289 = arith.divf %287, %288 : vector<8x128xf32>
    %290 = vector.extract_strided_slice %281 {offsets = [0, 128], sizes = [8, 128], strides = [1, 1]} : vector<8x256xf32> to vector<8x128xf32>
    %291 = arith.mulf %290, %270 : vector<8x128xf32>
    %292 = vector.extract_strided_slice %281 {offsets = [0, 0], sizes = [8, 128], strides = [1, 1]} : vector<8x256xf32> to vector<8x128xf32>
    %293 = arith.mulf %292, %283 : vector<8x128xf32>
    %294 = arith.addf %291, %293 : vector<8x128xf32>
    %295 = math.tanh %294 : vector<8x128xf32>
    %296 = arith.mulf %289, %295 : vector<8x128xf32>
    %c24_78 = arith.constant 24 : index
    %c0_79 = arith.constant 0 : index
    %297 = vector.load %arg9[%c24_78, %c0_79] : memref<64x512xf32, #tpu.memory_space<vmem>>, vector<8x512xf32>
    %cst_80 = arith.constant dense<0.000000e+00> : vector<8x512xf32>
    %298 = tpu.matmul %296, %214, %cst_80 {dimension_numbers = #tpu.dot_dimension_numbers<[1], [0], [0], [1], [0, 0, 1, 1], [], []>} : vector<8x128xf32>, vector<128x512xf32>, vector<8x512xf32> -> vector<8x512xf32>
    %299 = arith.addf %297, %298 : vector<8x512xf32>
    %300 = vector.extract_strided_slice %299 {offsets = [0, 0], sizes = [8, 256], strides = [1, 1]} : vector<8x512xf32> to vector<8x256xf32>
    %301 = arith.negf %300 : vector<8x256xf32>
    %302 = math.exp %301 : vector<8x256xf32>
    %cst_81 = arith.constant 1.000000e+00 : f32
    %303 = vector.broadcast %cst_81 : f32 to vector<8x256xf32>
    %304 = arith.addf %303, %302 : vector<8x256xf32>
    %305 = arith.divf %303, %304 : vector<8x256xf32>
    %306 = vector.extract_strided_slice %299 {offsets = [0, 256], sizes = [8, 128], strides = [1, 1]} : vector<8x512xf32> to vector<8x128xf32>
    %307 = math.tanh %306 : vector<8x128xf32>
    %308 = vector.extract_strided_slice %299 {offsets = [0, 384], sizes = [8, 128], strides = [1, 1]} : vector<8x512xf32> to vector<8x128xf32>
    %309 = arith.negf %308 : vector<8x128xf32>
    %310 = math.exp %309 : vector<8x128xf32>
    %cst_82 = arith.constant 1.000000e+00 : f32
    %311 = vector.broadcast %cst_82 : f32 to vector<8x128xf32>
    %312 = arith.addf %311, %310 : vector<8x128xf32>
    %313 = arith.divf %311, %312 : vector<8x128xf32>
    %314 = vector.extract_strided_slice %305 {offsets = [0, 128], sizes = [8, 128], strides = [1, 1]} : vector<8x256xf32> to vector<8x128xf32>
    %315 = arith.mulf %314, %294 : vector<8x128xf32>
    %316 = vector.extract_strided_slice %305 {offsets = [0, 0], sizes = [8, 128], strides = [1, 1]} : vector<8x256xf32> to vector<8x128xf32>
    %317 = arith.mulf %316, %307 : vector<8x128xf32>
    %318 = arith.addf %315, %317 : vector<8x128xf32>
    %319 = math.tanh %318 : vector<8x128xf32>
    %320 = arith.mulf %313, %319 : vector<8x128xf32>
    %c32_83 = arith.constant 32 : index
    %c0_84 = arith.constant 0 : index
    %321 = vector.load %arg9[%c32_83, %c0_84] : memref<64x512xf32, #tpu.memory_space<vmem>>, vector<8x512xf32>
    %cst_85 = arith.constant dense<0.000000e+00> : vector<8x512xf32>
    %322 = tpu.matmul %320, %214, %cst_85 {dimension_numbers = #tpu.dot_dimension_numbers<[1], [0], [0], [1], [0, 0, 1, 1], [], []>} : vector<8x128xf32>, vector<128x512xf32>, vector<8x512xf32> -> vector<8x512xf32>
    %323 = arith.addf %321, %322 : vector<8x512xf32>
    %324 = vector.extract_strided_slice %323 {offsets = [0, 0], sizes = [8, 256], strides = [1, 1]} : vector<8x512xf32> to vector<8x256xf32>
    %325 = arith.negf %324 : vector<8x256xf32>
    %326 = math.exp %325 : vector<8x256xf32>
    %cst_86 = arith.constant 1.000000e+00 : f32
    %327 = vector.broadcast %cst_86 : f32 to vector<8x256xf32>
    %328 = arith.addf %327, %326 : vector<8x256xf32>
    %329 = arith.divf %327, %328 : vector<8x256xf32>
    %330 = vector.extract_strided_slice %323 {offsets = [0, 256], sizes = [8, 128], strides = [1, 1]} : vector<8x512xf32> to vector<8x128xf32>
    %331 = math.tanh %330 : vector<8x128xf32>
    %332 = vector.extract_strided_slice %323 {offsets = [0, 384], sizes = [8, 128], strides = [1, 1]} : vector<8x512xf32> to vector<8x128xf32>
    %333 = arith.negf %332 : vector<8x128xf32>
    %334 = math.exp %333 : vector<8x128xf32>
    %cst_87 = arith.constant 1.000000e+00 : f32
    %335 = vector.broadcast %cst_87 : f32 to vector<8x128xf32>
    %336 = arith.addf %335, %334 : vector<8x128xf32>
    %337 = arith.divf %335, %336 : vector<8x128xf32>
    %338 = vector.extract_strided_slice %329 {offsets = [0, 128], sizes = [8, 128], strides = [1, 1]} : vector<8x256xf32> to vector<8x128xf32>
    %339 = arith.mulf %338, %318 : vector<8x128xf32>
    %340 = vector.extract_strided_slice %329 {offsets = [0, 0], sizes = [8, 128], strides = [1, 1]} : vector<8x256xf32> to vector<8x128xf32>
    %341 = arith.mulf %340, %331 : vector<8x128xf32>
    %342 = arith.addf %339, %341 : vector<8x128xf32>
    %343 = math.tanh %342 : vector<8x128xf32>
    %344 = arith.mulf %337, %343 : vector<8x128xf32>
    %c40_88 = arith.constant 40 : index
    %c0_89 = arith.constant 0 : index
    %345 = vector.load %arg9[%c40_88, %c0_89] : memref<64x512xf32, #tpu.memory_space<vmem>>, vector<8x512xf32>
    %cst_90 = arith.constant dense<0.000000e+00> : vector<8x512xf32>
    %346 = tpu.matmul %344, %214, %cst_90 {dimension_numbers = #tpu.dot_dimension_numbers<[1], [0], [0], [1], [0, 0, 1, 1], [], []>} : vector<8x128xf32>, vector<128x512xf32>, vector<8x512xf32> -> vector<8x512xf32>
    %347 = arith.addf %345, %346 : vector<8x512xf32>
    %348 = vector.extract_strided_slice %347 {offsets = [0, 0], sizes = [8, 256], strides = [1, 1]} : vector<8x512xf32> to vector<8x256xf32>
    %349 = arith.negf %348 : vector<8x256xf32>
    %350 = math.exp %349 : vector<8x256xf32>
    %cst_91 = arith.constant 1.000000e+00 : f32
    %351 = vector.broadcast %cst_91 : f32 to vector<8x256xf32>
    %352 = arith.addf %351, %350 : vector<8x256xf32>
    %353 = arith.divf %351, %352 : vector<8x256xf32>
    %354 = vector.extract_strided_slice %347 {offsets = [0, 256], sizes = [8, 128], strides = [1, 1]} : vector<8x512xf32> to vector<8x128xf32>
    %355 = math.tanh %354 : vector<8x128xf32>
    %356 = vector.extract_strided_slice %347 {offsets = [0, 384], sizes = [8, 128], strides = [1, 1]} : vector<8x512xf32> to vector<8x128xf32>
    %357 = arith.negf %356 : vector<8x128xf32>
    %358 = math.exp %357 : vector<8x128xf32>
    %cst_92 = arith.constant 1.000000e+00 : f32
    %359 = vector.broadcast %cst_92 : f32 to vector<8x128xf32>
    %360 = arith.addf %359, %358 : vector<8x128xf32>
    %361 = arith.divf %359, %360 : vector<8x128xf32>
    %362 = vector.extract_strided_slice %353 {offsets = [0, 128], sizes = [8, 128], strides = [1, 1]} : vector<8x256xf32> to vector<8x128xf32>
    %363 = arith.mulf %362, %342 : vector<8x128xf32>
    %364 = vector.extract_strided_slice %353 {offsets = [0, 0], sizes = [8, 128], strides = [1, 1]} : vector<8x256xf32> to vector<8x128xf32>
    %365 = arith.mulf %364, %355 : vector<8x128xf32>
    %366 = arith.addf %363, %365 : vector<8x128xf32>
    %367 = math.tanh %366 : vector<8x128xf32>
    %368 = arith.mulf %361, %367 : vector<8x128xf32>
    %c48_93 = arith.constant 48 : index
    %c0_94 = arith.constant 0 : index
    %369 = vector.load %arg9[%c48_93, %c0_94] : memref<64x512xf32, #tpu.memory_space<vmem>>, vector<8x512xf32>
    %cst_95 = arith.constant dense<0.000000e+00> : vector<8x512xf32>
    %370 = tpu.matmul %368, %214, %cst_95 {dimension_numbers = #tpu.dot_dimension_numbers<[1], [0], [0], [1], [0, 0, 1, 1], [], []>} : vector<8x128xf32>, vector<128x512xf32>, vector<8x512xf32> -> vector<8x512xf32>
    %371 = arith.addf %369, %370 : vector<8x512xf32>
    %372 = vector.extract_strided_slice %371 {offsets = [0, 0], sizes = [8, 256], strides = [1, 1]} : vector<8x512xf32> to vector<8x256xf32>
    %373 = arith.negf %372 : vector<8x256xf32>
    %374 = math.exp %373 : vector<8x256xf32>
    %cst_96 = arith.constant 1.000000e+00 : f32
    %375 = vector.broadcast %cst_96 : f32 to vector<8x256xf32>
    %376 = arith.addf %375, %374 : vector<8x256xf32>
    %377 = arith.divf %375, %376 : vector<8x256xf32>
    %378 = vector.extract_strided_slice %371 {offsets = [0, 256], sizes = [8, 128], strides = [1, 1]} : vector<8x512xf32> to vector<8x128xf32>
    %379 = math.tanh %378 : vector<8x128xf32>
    %380 = vector.extract_strided_slice %371 {offsets = [0, 384], sizes = [8, 128], strides = [1, 1]} : vector<8x512xf32> to vector<8x128xf32>
    %381 = arith.negf %380 : vector<8x128xf32>
    %382 = math.exp %381 : vector<8x128xf32>
    %cst_97 = arith.constant 1.000000e+00 : f32
    %383 = vector.broadcast %cst_97 : f32 to vector<8x128xf32>
    %384 = arith.addf %383, %382 : vector<8x128xf32>
    %385 = arith.divf %383, %384 : vector<8x128xf32>
    %386 = vector.extract_strided_slice %377 {offsets = [0, 128], sizes = [8, 128], strides = [1, 1]} : vector<8x256xf32> to vector<8x128xf32>
    %387 = arith.mulf %386, %366 : vector<8x128xf32>
    %388 = vector.extract_strided_slice %377 {offsets = [0, 0], sizes = [8, 128], strides = [1, 1]} : vector<8x256xf32> to vector<8x128xf32>
    %389 = arith.mulf %388, %379 : vector<8x128xf32>
    %390 = arith.addf %387, %389 : vector<8x128xf32>
    %391 = math.tanh %390 : vector<8x128xf32>
    %392 = arith.mulf %385, %391 : vector<8x128xf32>
    %c56_98 = arith.constant 56 : index
    %c0_99 = arith.constant 0 : index
    %393 = vector.load %arg9[%c56_98, %c0_99] : memref<64x512xf32, #tpu.memory_space<vmem>>, vector<8x512xf32>
    %cst_100 = arith.constant dense<0.000000e+00> : vector<8x512xf32>
    %394 = tpu.matmul %392, %214, %cst_100 {dimension_numbers = #tpu.dot_dimension_numbers<[1], [0], [0], [1], [0, 0, 1, 1], [], []>} : vector<8x128xf32>, vector<128x512xf32>, vector<8x512xf32> -> vector<8x512xf32>
    %395 = arith.addf %393, %394 : vector<8x512xf32>
    %396 = vector.extract_strided_slice %395 {offsets = [0, 0], sizes = [8, 256], strides = [1, 1]} : vector<8x512xf32> to vector<8x256xf32>
    %397 = arith.negf %396 : vector<8x256xf32>
    %398 = math.exp %397 : vector<8x256xf32>
    %cst_101 = arith.constant 1.000000e+00 : f32
    %399 = vector.broadcast %cst_101 : f32 to vector<8x256xf32>
    %400 = arith.addf %399, %398 : vector<8x256xf32>
    %401 = arith.divf %399, %400 : vector<8x256xf32>
    %402 = vector.extract_strided_slice %395 {offsets = [0, 256], sizes = [8, 128], strides = [1, 1]} : vector<8x512xf32> to vector<8x128xf32>
    %403 = math.tanh %402 : vector<8x128xf32>
    %404 = vector.extract_strided_slice %395 {offsets = [0, 384], sizes = [8, 128], strides = [1, 1]} : vector<8x512xf32> to vector<8x128xf32>
    %405 = arith.negf %404 : vector<8x128xf32>
    %406 = math.exp %405 : vector<8x128xf32>
    %cst_102 = arith.constant 1.000000e+00 : f32
    %407 = vector.broadcast %cst_102 : f32 to vector<8x128xf32>
    %408 = arith.addf %407, %406 : vector<8x128xf32>
    %409 = arith.divf %407, %408 : vector<8x128xf32>
    %410 = vector.extract_strided_slice %401 {offsets = [0, 128], sizes = [8, 128], strides = [1, 1]} : vector<8x256xf32> to vector<8x128xf32>
    %411 = arith.mulf %410, %390 : vector<8x128xf32>
    %412 = vector.extract_strided_slice %401 {offsets = [0, 0], sizes = [8, 128], strides = [1, 1]} : vector<8x256xf32> to vector<8x128xf32>
    %413 = arith.mulf %412, %403 : vector<8x128xf32>
    %414 = arith.addf %411, %413 : vector<8x128xf32>
    %415 = math.tanh %414 : vector<8x128xf32>
    %416 = arith.mulf %409, %415 : vector<8x128xf32>
    %c0_103 = arith.constant 0 : index
    %c0_104 = arith.constant 0 : index
    %417 = vector.load %arg6[%c0_103, %c0_104] : memref<128x128xf32, #tpu.memory_space<vmem>>, vector<128x128xf32>
    %cst_105 = arith.constant dense<0.000000e+00> : vector<8x128xf32>
    %418 = tpu.matmul %416, %417, %cst_105 {dimension_numbers = #tpu.dot_dimension_numbers<[1], [0], [0], [1], [0, 0, 1, 1], [], []>} : vector<8x128xf32>, vector<128x128xf32>, vector<8x128xf32> -> vector<8x128xf32>
    %c0_106 = arith.constant 0 : index
    %c0_107 = arith.constant 0 : index
    %419 = vector.load %arg7[%c0_106, %c0_107] : memref<1x128xf32, #tpu.memory_space<vmem>>, vector<1x128xf32>
    %420 = vector.broadcast %419 : vector<1x128xf32> to vector<8x128xf32>
    %421 = arith.addf %418, %420 : vector<8x128xf32>
    %422 = arith.negf %421 : vector<8x128xf32>
    %423 = math.exp %422 : vector<8x128xf32>
    %cst_108 = arith.constant 1.000000e+00 : f32
    %424 = vector.broadcast %cst_108 : f32 to vector<8x128xf32>
    %425 = arith.addf %424, %423 : vector<8x128xf32>
    %426 = arith.divf %424, %425 : vector<8x128xf32>
    %c0_109 = arith.constant 0 : index
    %c0_110 = arith.constant 0 : index
    %427 = vector.load %arg8[%c0_109, %c0_110] : memref<8x128xf32, #tpu.memory_space<vmem>>, vector<8x128xf32>
    tpu.vector_store %arg8[%c0_109, %c0_110], %426 {strides = array<i32>} : memref<8x128xf32, #tpu.memory_space<vmem>>, vector<8x128xf32>,
    return
  }
  func.func @transform_0(%arg0: i32) -> (i32, i32) {
    %c0_i32 = arith.constant 0 : i32
    %c0_i32_0 = arith.constant 0 : i32
    %c0_i32_1 = arith.constant 0 : i32
    return %c0_i32, %c0_i32_0 : i32, i32
  }
  func.func @transform_1(%arg0: i32) -> (i32, i32) {
    %c0_i32 = arith.constant 0 : i32
    %c0_i32_0 = arith.constant 0 : i32
    %c0_i32_1 = arith.constant 0 : i32
    return %c0_i32, %c0_i32_0 : i32, i32
  }
  func.func @transform_2(%arg0: i32) -> (i32, i32, i32) {
    %c0_i32 = arith.constant 0 : i32
    %c0_i32_0 = arith.constant 0 : i32
    %c0_i32_1 = arith.constant 0 : i32
    %c0_i32_2 = arith.constant 0 : i32
    return %c0_i32, %c0_i32_0, %c0_i32_1 : i32, i32, i32
  }
  func.func @transform_3(%arg0: i32) -> (i32, i32, i32) {
    %c0_i32 = arith.constant 0 : i32
    %c0_i32_0 = arith.constant 0 : i32
    %c0_i32_1 = arith.constant 0 : i32
    %c0_i32_2 = arith.constant 0 : i32
    return %c0_i32, %c0_i32_0, %c0_i32_1 : i32, i32, i32
  }
  func.func @transform_4(%arg0: i32) -> (i32, i32, i32) {
    %c0_i32 = arith.constant 0 : i32
    %c0_i32_0 = arith.constant 0 : i32
    %c0_i32_1 = arith.constant 0 : i32
    %c0_i32_2 = arith.constant 0 : i32
    return %c0_i32, %c0_i32_0, %c0_i32_1 : i32, i32, i32
  }
  func.func @transform_5(%arg0: i32) -> (i32, i32) {
    %c0_i32 = arith.constant 0 : i32
    %c0_i32_0 = arith.constant 0 : i32
    %c0_i32_1 = arith.constant 0 : i32
    return %c0_i32, %c0_i32_0 : i32, i32
  }
  func.func @transform_6(%arg0: i32) -> (i32, i32) {
    %c0_i32 = arith.constant 0 : i32
    %c0_i32_0 = arith.constant 0 : i32
    %c0_i32_1 = arith.constant 0 : i32
    return %c0_i32, %c0_i32_0 : i32, i32
  }
  func.func @transform_7(%arg0: i32) -> (i32, i32) {
    %c0_i32 = arith.constant 0 : i32
    %c0_i32_0 = arith.constant 0 : i32
    %c0_i32_1 = arith.constant 0 : i32
    return %c0_i32, %c0_i32_0 : i32, i32
  }
}

</mosaic_0001>

<bundles_post_ra>
// kernel: tpu_custom_call.1
= control target key start
LH: loop header
LB: loop body
LE: loop exit
PB: predicated region body
PF: predicated region fallthrough
CT: control target
= control target key end

     0   :  { %12 = vsyncpa [#allocation4], 0  ;;  %s6987_s0 = inlined_call_operand.vmem [shape: s32[64,1], index: 0, kind: input, shape index: {}]   ;;  %s6988_s1 = inlined_call_operand.hbm [shape: f32[128,128], index: 1, kind: input, shape index: {}]   ;;  %s6989_s2 = inlined_call_operand.hbm [shape: f32[2,128,512], index: 2, kind: input, shape index: {}]   ;;  %s6990_s3 = inlined_call_operand.hbm [shape: f32[2,128,512], index: 3, kind: input, shape index: {}]   ;;  %s6991_s4 = inlined_call_operand.vmem [shape: f32[2,1,512], index: 4, kind: input, shape index: {}]   ;;  %s6992_s5 = inlined_call_operand.hbm [shape: f32[128,128], index: 5, kind: input, shape index: {}]   ;;  %s6993_s6 = inlined_call_operand.vmem [shape: f32[1,128], index: 6, kind: input, shape index: {}]   ;;  %s6994_s7 = inlined_call_operand.hbm [shape: f32[8,128], index: 7, kind: output, shape index: {}]  }
   0x1   :  { %13 = vsyncpa [#allocation7], 0 }
   0x2   :  { %14 = vsyncpa [#allocation10], 0 }
   0x3   :  { %15 = vsyncpa [#allocation5], 0  ;;  %s5898_s24 = smov [#allocation6]   ;;  %s5780_s28 = scalar_lea.hbm %s6989_s2, 16384 }
   0x4   :  { %s35_s25 = sshll.u32 %s5898_s24, 4  ;;  %p5781_p0 = scmp.ne.s32.totalorder %s6989_s2, %s5780_s28  ;;  %s36_s25 = int_to_ptr.vmem [resolvable:$true] %s35_s25 }
   0x5   :  { %p5784_p1 = scmp.lt.u32.totalorder %s5780_s28, %s6989_s2 }
   0x7   :  { %p5786_p2 = pnand %p5784_p1, %p5781_p0 }
   0x9   :  { %5789 = shalt.err (!%p5786_p2)
}
   0xa   :  { %s5790_s10 = scalar_lea.vmem %s36_s25, 16384  ;;  %p5795_p4 = scmp.lt.s32.totalorder %s36_s25, %s36_s25 }
   0xb   :  { %p5791_p3 = scmp.ne.s32.totalorder %s36_s25, %s5790_s10  ;;  %p5796_p5 = scmp.lt.s32.totalorder %s5790_s10, %s5790_s10 }
   0xd   :  { %p5797_p6 = por %p5796_p5, %p5795_p4 }
   0xf   :  { %p5798_p7 = pnand %p5797_p6, %p5791_p3 }
  0x11   :  { %5801 = shalt.err (!%p5798_p7)
}
  0x12   :  { %s5899_s11 = smov 512   ;;  %s5900_s12 = smov 32  }
  0x13   :  { %41 = dma.hbm_to_vmem [thread:$0]  %s6989_s2, 16384, %s36_s25, [#allocation7], %s5899_s11, %s5899_s11, %s5900_s12  }
  0x14   :  { %s5901_s15 = smov [#allocation3]   ;;  %s5802_s19 = scalar_lea.hbm %s6988_s1, 2048 }
  0x15   :  { %s23_s16 = sshll.u32 %s5901_s15, 4  ;;  %p5803_p8 = scmp.ne.s32.totalorder %s6988_s1, %s5802_s19  ;;  %s24_s16 = int_to_ptr.vmem [resolvable:$true] %s23_s16 }
  0x16   :  { %p5806_p9 = scmp.lt.u32.totalorder %s5802_s19, %s6988_s1 }
  0x18   :  { %p5808_p10 = pnand %p5806_p9, %p5803_p8 }
  0x1a   :  { %5811 = shalt.err (!%p5808_p10)
}
  0x1b   :  { %s5812_s24 = scalar_lea.vmem %s24_s16, 2048  ;;  %p5817_p12 = scmp.lt.s32.totalorder %s24_s16, %s24_s16 }
  0x1c   :  { %p5813_p11 = scmp.ne.s32.totalorder %s24_s16, %s5812_s24  ;;  %p5818_p13 = scmp.lt.s32.totalorder %s5812_s24, %s5812_s24 }
  0x1e   :  { %p5819_p0 = por %p5818_p13, %p5817_p12 }
  0x20   :  { %p5820_p1 = pnand %p5819_p0, %p5813_p11 }
  0x22   :  { %5823 = shalt.err (!%p5820_p1)
}
  0x23   :  { %s5902_s2 = smov 128   ;;  %s5903_s25 = smov 8  }
  0x24   :  { %29 = dma.hbm_to_vmem [thread:$0]  %s6988_s1, 2048, %s24_s16, [#allocation4], %s5902_s2, %s5902_s2, %s5903_s25  }
  0x25   :  { %s5904_s28 = smov [#allocation8]   ;;  %s5905_s30 = smov [#allocation9]  }
  0x26   :  { %s47_s29 = sshll.u32 %s5904_s28, 4  ;;  %s61_s8 = sshll.u32 %s5905_s30, 4  ;;  %s48_s29 = int_to_ptr.vmem [resolvable:$true] %s47_s29  ;;  %s5982_s8 = int_to_ptr.vmem [resolvable:$true] %s61_s8 }
  0x27   :  { %s5824_s13 = scalar_lea.hbm %s6990_s3, 16384 }
  0x28   :  { %p5825_p2 = scmp.ne.s32.totalorder %s6990_s3, %s5824_s13  ;;  %p5828_p3 = scmp.lt.u32.totalorder %s5824_s13, %s6990_s3 }
  0x2a   :  { %p5830_p4 = pnand %p5828_p3, %p5825_p2 }
  0x2c   :  { %5833 = shalt.err (!%p5830_p4)
}
  0x2d   :  { %s5834_s1 = scalar_lea.vmem %s48_s29, 16384  ;;  %p5839_p6 = scmp.lt.s32.totalorder %s48_s29, %s48_s29 }
  0x2e   :  { %p5835_p5 = scmp.ne.s32.totalorder %s48_s29, %s5834_s1  ;;  %p5840_p7 = scmp.lt.s32.totalorder %s5834_s1, %s5834_s1 }
  0x30   :  { %p5841_p8 = por %p5840_p7, %p5839_p6 }
  0x32   :  { %p5842_p9 = pnand %p5841_p8, %p5835_p5 }
  0x34   :  { %5845 = shalt.err (!%p5842_p9)
}
  0x35   :  { %53 = dma.hbm_to_vmem [thread:$0]  %s6990_s3, 16384, %s48_s29, [#allocation7], %s5899_s11, %s5899_s11, %s5900_s12  }
  0x36   :  { %s5846_s22 = scalar_lea.hbm %s6992_s5, 2048 }
  0x37   :  { %p5847_p10 = scmp.ne.s32.totalorder %s6992_s5, %s5846_s22  ;;  %p5850_p11 = scmp.lt.u32.totalorder %s5846_s22, %s6992_s5 }
  0x39   :  { %p5852_p12 = pnand %p5850_p11, %p5847_p10 }
  0x3b   :  { %5855 = shalt.err (!%p5852_p12)
}
  0x3c   :  { %s5856_s28 = scalar_lea.vmem %s5982_s8, 2048  ;;  %p5861_p0 = scmp.lt.s32.totalorder %s5982_s8, %s5982_s8 }
  0x3d   :  { %p5857_p13 = scmp.ne.s32.totalorder %s5982_s8, %s5856_s28  ;;  %p5862_p1 = scmp.lt.s32.totalorder %s5856_s28, %s5856_s28 }
  0x3f   :  { %p5863_p2 = por %p5862_p1, %p5861_p0 }
  0x41   :  { %p5864_p3 = pnand %p5863_p2, %p5857_p13 }
  0x43   :  { %5867 = shalt.err (!%p5864_p3)
}
  0x44   :  { %67 = dma.hbm_to_vmem [thread:$0]  %s6992_s5, 2048, %s5982_s8, [#allocation10], %s5902_s2, %s5902_s2, %s5903_s25  }
  0x45   :  { %5890 = dma.done.wait [#allocation4], 2048  }
  0x46   :  { %5891 = vsyncadd [#allocation4], 4294965248 }
  0x47   :  { %5892 = dma.done.wait [#allocation7], 32768  }
  0x48   :  { %5893 = vsyncadd [#allocation7], 4294934528 }
  0x49   :  { %5894 = dma.done.wait [#allocation10], 2048  }
  0x4a   :  { %5895 = vsyncadd [#allocation10], 4294965248  ;;  %v5906_v0 = vmov 0   ;;  %v84_v1 = vld [vmem:[%s6987_s0 + $0x10] sm:$0xff]  ;;  %v82_v2 = vld [vmem:[%s6987_s0] sm:$0xff]  ;;  %vm5910_vm8 = vmmov 0  }
  0x4b   :  { %5519 = vset.pattern.permute.xlu1 %v5906_v0  ;;  %5518 = vset.pattern.permute.xlu0 %v5906_v0  ;;  %v85_v3 = vld [vmem:[%s6987_s0 + $0x18] sm:$0xff]  ;;  %v83_v4 = vld [vmem:[%s6987_s0 + $0x8] sm:$0xff]  ;;  %v140_v5 = vld [vmem:[#allocation3] sm:$0xff]  ;;  %s5911_s23 = smov [#allocation11]  }
  0x4c   :  { %99 = vperm.xlu1 %5519, %v84_v1   ;;  %93 = vperm.xlu0 %5518, %v82_v2   ;;  %v141_v6 = vld [vmem:[#allocation3 + $0x8] sm:$0xff]  ;;  %v142_v7 = vld [vmem:[#allocation3 + $0x10] sm:$0xff]  ;;  %v143_v8 = vld [vmem:[#allocation3 + $0x18] sm:$0xff]  ;;  %s3970_s24 = sshll.u32 %s5911_s23, 4  ;;  %s3971_s24 = int_to_ptr.vmem [resolvable:$true] %s3970_s24 }
  0x4d   :  { %v4168_v9 = vpack.c.bf16 %v141_v6, %v140_v5  ;;  %v4172_v10 = vpack.c.bf16 %v143_v8, %v142_v7  ;;  %v144_v11 = vld [vmem:[#allocation3 + $0x20] sm:$0xff]  ;;  %v145_v12 = vld [vmem:[#allocation3 + $0x28] sm:$0xff]  ;;  %v146_v16 = vld [vmem:[#allocation3 + $0x30] sm:$0xff]  ;;  %s5868_s26 = scalar_lea.vmem %s3971_s24, 128  ;;  %p5873_p5 = scmp.lt.s32.totalorder %s3971_s24, %s3971_s24 }
  0x4e   :  { %v87_v13 = vld [vmem:[%s6987_s0 + $0x28] sm:$0xff]  ;;  %v86_v14 = vld [vmem:[%s6987_s0 + $0x20] sm:$0xff]  ;;  %v4176_v15 = vpack.c.bf16 %v145_v12, %v144_v11  ;;  %v147_v17 = vld [vmem:[#allocation3 + $0x38] sm:$0xff]  ;;  %p5869_p4 = scmp.ne.s32.totalorder %s3971_s24, %s5868_s26  ;;  %p5874_p6 = scmp.lt.s32.totalorder %s5868_s26, %s5868_s26 }
  0x4f   :  { %4169 = vmatprep.subr.bf16.mxu0 %v4168_v9  ;;  %v89_v18 = vld [vmem:[%s6987_s0 + $0x38] sm:$0xff]  ;;  %v88_v19 = vld [vmem:[%s6987_s0 + $0x30] sm:$0xff]  ;;  %v4180_v20 = vpack.c.bf16 %v147_v17, %v146_v16  ;;  %v148_v21 = vld [vmem:[#allocation3 + $0x40] sm:$0xff] }
  0x50   :  { %102 = vperm.xlu1 %5519, %v85_v3   ;;  %96 = vperm.xlu0 %5518, %v83_v4   ;;  %v149_v22 = vld [vmem:[#allocation3 + $0x48] sm:$0xff]  ;;  %v150_v24 = vld [vmem:[#allocation3 + $0x50] sm:$0xff]  ;;  %v151_v25 = vld [vmem:[#allocation3 + $0x58] sm:$0xff]  ;;  %p5875_p7 = por %p5874_p6, %p5873_p5 }
  0x51   :  { %4171 = vmatpush3.bf16.msra.mxu0 %v4168_v9  ;;  %v4184_v23 = vpack.c.bf16 %v149_v22, %v148_v21  ;;  %v326_v26 = vld [vmem:[#allocation6 + $0x8] sm:$0xff]  ;;  %v325_v28 = vld [vmem:[#allocation6] sm:$0xff]  ;;  %v4188_v31 = vpack.c.bf16 %v151_v25, %v150_v24  ;;  %v154_v47 = vld [vmem:[#allocation3 + $0x70] sm:$0xff] }
  0x52   :  { %4173 = vmatprep.subr.bf16.mxu0 %v4172_v10  ;;  %v330_v27 = vld [vmem:[#allocation6 + $0x28] sm:$0xff]  ;;  %v329_v30 = vld [vmem:[#allocation6 + $0x20] sm:$0xff]  ;;  %v155_v48 = vld [vmem:[#allocation3 + $0x78] sm:$0xff]  ;;  %p5876_p8 = pnand %p5875_p7, %p5869_p4 }
  0x53   :  { %v4200_v29 = vpack.c.bf16 %v330_v27, %v326_v26  ;;  %v152_v32 = vld [vmem:[#allocation3 + $0x60] sm:$0xff]  ;;  %v153_v33 = vld [vmem:[#allocation3 + $0x68] sm:$0xff]  ;;  %v4202_v34 = vpack.c.bf16 %v329_v30, %v325_v28  ;;  %v4196_v55 = vpack.c.bf16 %v155_v48, %v154_v47  ;;  %v328_v57 = vld [vmem:[#allocation6 + $0x18] sm:$0xff]  ;;  %v5907_v28 = vmov 1.0  }
  0x54   :  { %108 = vperm.xlu1 %5519, %v87_v13   ;;  %105 = vperm.xlu0 %5518, %v86_v14   ;;  %v334_v35 = vld [vmem:[#allocation6 + $0x48] sm:$0xff]  ;;  %v333_v37 = vld [vmem:[#allocation6 + $0x40] sm:$0xff]  ;;  %v4192_v43 = vpack.c.bf16 %v153_v33, %v152_v32  ;;  %v332_v58 = vld [vmem:[#allocation6 + $0x38] sm:$0xff] }
  0x55   :  { %4175 = vmatpush3.bf16.msra.mxu0 %v4172_v10  ;;  %4201 = vmatprep.subr.bf16.mxu1 %v4200_v29  ;;  %v338_v36 = vld [vmem:[#allocation6 + $0x68] sm:$0xff]  ;;  %v337_v38 = vld [vmem:[#allocation6 + $0x60] sm:$0xff]  ;;  %v4232_v0 = vpack.c.bf16 %v332_v58, %v328_v57  ;;  %v327_v24 = vld [vmem:[#allocation6 + $0x10] sm:$0xff] }
  0x56   :  { %4177 = vmatprep.subr.bf16.mxu0 %v4176_v15  ;;  %4203 = vmatpush1.bf16.msra.mxu1 %v4202_v34  ;;  %v4204_v39 = vpack.c.bf16 %v338_v36, %v334_v35  ;;  %v4206_v40 = vpack.c.bf16 %v337_v38, %v333_v37  ;;  %v342_v41 = vld [vmem:[#allocation6 + $0x88] sm:$0xff]  ;;  %v341_v45 = vld [vmem:[#allocation6 + $0x80] sm:$0xff]  ;;  %v331_v25 = vld [vmem:[#allocation6 + $0x30] sm:$0xff] }
  0x57   :  { %v346_v42 = vld [vmem:[#allocation6 + $0xa8] sm:$0xff]  ;;  %v345_v46 = vld [vmem:[#allocation6 + $0xa0] sm:$0xff]  ;;  %v336_v26 = vld [vmem:[#allocation6 + $0x58] sm:$0xff]  ;;  %v4234_v29 = vpack.c.bf16 %v331_v25, %v327_v24 }
  0x58   :  { %114 = vperm.xlu1 %5519, %v89_v18   ;;  %111 = vperm.xlu0 %5518, %v88_v19   ;;  %v4208_v44 = vpack.c.bf16 %v346_v42, %v342_v41  ;;  %v4210_v49 = vpack.c.bf16 %v345_v46, %v341_v45  ;;  %v350_v50 = vld [vmem:[#allocation6 + $0xc8] sm:$0xff]  ;;  %v349_v53 = vld [vmem:[#allocation6 + $0xc0] sm:$0xff]  ;;  %v340_v27 = vld [vmem:[#allocation6 + $0x78] sm:$0xff] }
  0x59   :  { %4179 = vmatpush3.bf16.msra.mxu0 %v4176_v15  ;;  %4205 = vmatprep.subr.bf16.mxu1 %v4204_v39  ;;  %v354_v51 = vld [vmem:[#allocation6 + $0xe8] sm:$0xff]  ;;  %v353_v54 = vld [vmem:[#allocation6 + $0xe0] sm:$0xff]  ;;  %v4236_v32 = vpack.c.bf16 %v340_v27, %v336_v26  ;;  %v335_v33 = vld [vmem:[#allocation6 + $0x50] sm:$0xff] }
  0x5a   :  { %4181 = vmatprep.subr.bf16.mxu0 %v4180_v20  ;;  %4207 = vmatpush1.bf16.msra.mxu1 %v4206_v40  ;;  %v4212_v52 = vpack.c.bf16 %v354_v51, %v350_v50  ;;  %v358_v56 = vld [vmem:[#allocation6 + $0x108] sm:$0xff]  ;;  %v4214_v60 = vpack.c.bf16 %v353_v54, %v349_v53  ;;  %v357_v62 = vld [vmem:[#allocation6 + $0x100] sm:$0xff]  ;;  %v339_v34 = vld [vmem:[#allocation6 + $0x70] sm:$0xff] }
  0x5b   :  { %4209 = vmatprep.subr.bf16.mxu1 %v4208_v44  ;;  %v362_v59 = vld [vmem:[#allocation6 + $0x128] sm:$0xff]  ;;  %v361_v63 = vld [vmem:[#allocation6 + $0x120] sm:$0xff]  ;;  %v344_v35 = vld [vmem:[#allocation6 + $0x98] sm:$0xff]  ;;  %v4238_v37 = vpack.c.bf16 %v339_v34, %v335_v33 }
  0x5c   :  { %v4216_v61 = vpack.c.bf16 %v362_v59, %v358_v56  ;;  %v366_v1 = vld [vmem:[#allocation6 + $0x148] sm:$0xff]  ;;  %v4218_v3 = vpack.c.bf16 %v361_v63, %v357_v62  ;;  %v365_v5 = vld [vmem:[#allocation6 + $0x140] sm:$0xff]  ;;  %v348_v36 = vld [vmem:[#allocation6 + $0xb8] sm:$0xff] }
  0x5d   :  { %4183 = vmatpush3.bf16.msra.mxu0 %v4180_v20  ;;  %v370_v2 = vld [vmem:[#allocation6 + $0x168] sm:$0xff]  ;;  %v369_v6 = vld [vmem:[#allocation6 + $0x160] sm:$0xff]  ;;  %v90_v20 = vlaneseq  ;;  %v4240_v40 = vpack.c.bf16 %v348_v36, %v344_v35  ;;  %v343_v41 = vld [vmem:[#allocation6 + $0x90] sm:$0xff] }
  0x5e   :  { %4185 = vmatprep.subr.bf16.mxu0 %v4184_v23  ;;  %4211 = vmatpush1.bf16.msra.mxu1 %v4210_v49  ;;  %v4220_v4 = vpack.c.bf16 %v370_v2, %v366_v1  ;;  %v374_v7 = vld [vmem:[#allocation6 + $0x188] sm:$0xff]  ;;  %v4222_v9 = vpack.c.bf16 %v369_v6, %v365_v5  ;;  %v373_v11 = vld [vmem:[#allocation6 + $0x180] sm:$0xff]  ;;  %v347_v42 = vld [vmem:[#allocation6 + $0xb0] sm:$0xff] }
  0x5f   :  { %4213 = vmatprep.subr.bf16.mxu1 %v4212_v52  ;;  %v378_v8 = vld [vmem:[#allocation6 + $0x1a8] sm:$0xff]  ;;  %v377_v12 = vld [vmem:[#allocation6 + $0x1a0] sm:$0xff]  ;;  %v91_v21 = vand.u32 127, %v90_v20  ;;  %v356_v44 = vld [vmem:[#allocation6 + $0xf8] sm:$0xff]  ;;  %v4242_v45 = vpack.c.bf16 %v347_v42, %v343_v41 }
  0x60   :  { %v4224_v10 = vpack.c.bf16 %v378_v8, %v374_v7  ;;  %v382_v13 = vld [vmem:[#allocation6 + $0x1c8] sm:$0xff]  ;;  %v4226_v15 = vpack.c.bf16 %v377_v12, %v373_v11  ;;  %v381_v17 = vld [vmem:[#allocation6 + $0x1c0] sm:$0xff]  ;;  %v351_v48 = vld [vmem:[#allocation6 + $0xd0] sm:$0xff] }
  0x61   :  { %4187 = vmatpush3.bf16.msra.mxu0 %v4184_v23  ;;  %v386_v14 = vld [vmem:[#allocation6 + $0x1e8] sm:$0xff]  ;;  %v385_v18 = vld [vmem:[#allocation6 + $0x1e0] sm:$0xff]  ;;  %v355_v49 = vld [vmem:[#allocation6 + $0xf0] sm:$0xff] }
  0x62   :  { %4189 = vmatprep.subr.bf16.mxu0 %v4188_v31  ;;  %4215 = vmatpush1.bf16.msra.mxu1 %v4214_v60  ;;  %v4228_v16 = vpack.c.bf16 %v386_v14, %v382_v13  ;;  %v4230_v19 = vpack.c.bf16 %v385_v18, %v381_v17  ;;  %v360_v50 = vld [vmem:[#allocation6 + $0x118] sm:$0xff]  ;;  %v4246_v53 = vpack.c.bf16 %v355_v49, %v351_v48  ;;  %v363_v56 = vld [vmem:[#allocation6 + $0x130] sm:$0xff]  ;;  %v262_v12 = vld [vmem:[#allocation8 + $0x8] sm:$0xff]  ;;  %v5908_v17 = vmov 0.0  }
  0x63   :  { %4217 = vmatprep.subr.bf16.mxu1 %v4216_v61  ;;  %v364_v51 = vld [vmem:[#allocation6 + $0x138] sm:$0xff]  ;;  %v367_v61 = vld [vmem:[#allocation6 + $0x150] sm:$0xff]  ;;  %v266_v13 = vld [vmem:[#allocation8 + $0x28] sm:$0xff]  ;;  %475 = vmatprep.mubr.f32.mxu1 %v5908_v17 }
  0x64   :  { %v4248_v54 = vpack.c.bf16 %v364_v51, %v360_v50  ;;  %v368_v57 = vld [vmem:[#allocation6 + $0x158] sm:$0xff]  ;;  %v371_v62 = vld [vmem:[#allocation6 + $0x170] sm:$0xff]  ;;  %v270_v24 = vld [vmem:[#allocation8 + $0x48] sm:$0xff] }
  0x65   :  { %4191 = vmatpush3.bf16.msra.mxu0 %v4188_v31  ;;  %v372_v58 = vld [vmem:[#allocation6 + $0x178] sm:$0xff]  ;;  %v4254_v1 = vpack.c.bf16 %v371_v62, %v367_v61  ;;  %v274_v25 = vld [vmem:[#allocation8 + $0x68] sm:$0xff]  ;;  %v271_v33 = vld [vmem:[#allocation8 + $0x50] sm:$0xff] }
  0x66   :  { %4193 = vmatprep.subr.bf16.mxu0 %v4192_v43  ;;  %4219 = vmatpush1.bf16.msra.mxu1 %v4218_v3  ;;  %v4252_v60 = vpack.c.bf16 %v372_v58, %v368_v57  ;;  %v376_v63 = vld [vmem:[#allocation6 + $0x198] sm:$0xff]  ;;  %v375_v3 = vld [vmem:[#allocation6 + $0x190] sm:$0xff]  ;;  %v6056_v36 = vpack.c.bf16 %v274_v25, %v270_v24  ;;  %v285_v58 = vld [vmem:[#allocation8 + $0xc0] sm:$0xff] }
  0x67   :  { %4221 = vmatprep.subr.bf16.mxu1 %v4220_v4  ;;  %v379_v4 = vld [vmem:[#allocation6 + $0x1b0] sm:$0xff]  ;;  %v384_v5 = vld [vmem:[#allocation6 + $0x1d8] sm:$0xff] }
  0x68   :  { %v388_v6 = vld [vmem:[#allocation6 + $0x1f8] sm:$0xff]  ;;  %v4258_v7 = vpack.c.bf16 %v379_v4, %v375_v3  ;;  %v275_v34 = vld [vmem:[#allocation8 + $0x70] sm:$0xff]  ;;  %v298_v3 = vld [vmem:[#allocation8 + $0x128] sm:$0xff] }
  0x69   :  { %4195 = vmatpush3.bf16.msra.mxu0 %v4192_v43  ;;  %v352_v43 = vld [vmem:[#allocation6 + $0xd8] sm:$0xff]  ;;  %v4260_v8 = vpack.c.bf16 %v388_v6, %v384_v5  ;;  %v283_v48 = vld [vmem:[#allocation8 + $0xb0] sm:$0xff] }
  0x6a   :  { %4197 = vmatprep.subr.bf16.mxu0 %v4196_v55  ;;  %4223 = vmatpush1.bf16.msra.mxu1 %v4222_v9  ;;  %v4244_v47 = vpack.c.bf16 %v356_v44, %v352_v43  ;;  %v383_v9 = vld [vmem:[#allocation6 + $0x1d0] sm:$0xff]  ;;  %v264_v14 = vld [vmem:[#allocation8 + $0x18] sm:$0xff]  ;;  %v6064_v43 = vpack.c.bf16 %v275_v34, %v271_v33  ;;  %v277_v44 = vld [vmem:[#allocation8 + $0x80] sm:$0xff] }
  0x6b   :  { %4225 = vmatprep.subr.bf16.mxu1 %v4224_v10  ;;  %v387_v10 = vld [vmem:[#allocation6 + $0x1f0] sm:$0xff]  ;;  %v272_v26 = vld [vmem:[#allocation8 + $0x58] sm:$0xff]  ;;  %v310_v34 = vld [vmem:[#allocation8 + $0x188] sm:$0xff] }
  0x6c   :  { %v4262_v11 = vpack.c.bf16 %v387_v10, %v383_v9  ;;  %v276_v27 = vld [vmem:[#allocation8 + $0x78] sm:$0xff]  ;;  %v287_v61 = vld [vmem:[#allocation8 + $0xd0] sm:$0xff]  ;;  %v297_v10 = vld [vmem:[#allocation8 + $0x120] sm:$0xff] }
  0x6d   :  { %4199 = vmatpush3.bf16.msra.mxu0 %v4196_v55  ;;  %v359_v55 = vld [vmem:[#allocation6 + $0x110] sm:$0xff]  ;;  %v284_v41 = vld [vmem:[#allocation8 + $0xb8] sm:$0xff] }
  0x6e   :  { %4233 = vmatprep.subr.bf16.mxu0 %v4232_v0  ;;  %4227 = vmatpush1.bf16.msra.mxu1 %v4226_v15  ;;  %v4250_v59 = vpack.c.bf16 %v363_v56, %v359_v55  ;;  %v380_v0 = vld [vmem:[#allocation6 + $0x1b8] sm:$0xff]  ;;  %v6044_v15 = vpack.c.bf16 %v266_v13, %v262_v12  ;;  %v291_v62 = vld [vmem:[#allocation8 + $0xf0] sm:$0xff] }
  0x6f   :  { %4229 = vmatprep.subr.bf16.mxu1 %v4228_v16  ;;  %v4256_v2 = vpack.c.bf16 %v380_v0, %v376_v63  ;;  %v268_v16 = vld [vmem:[#allocation8 + $0x38] sm:$0xff]  ;;  %v299_v12 = vld [vmem:[#allocation8 + $0x130] sm:$0xff] }
  0x70   :  { %v6048_v18 = vpack.c.bf16 %v268_v16, %v264_v14  ;;  %v292_v55 = vld [vmem:[#allocation8 + $0xf8] sm:$0xff] }
  0x71   :  { %v296_v4 = vld [vmem:[#allocation8 + $0x118] sm:$0xff] }
  0x72   :  { %4231 = vmatpush1.bf16.msra.mxu1 %v4230_v19  ;;  %v261_v19 = vld [vmem:[#allocation8] sm:$0xff]  ;;  %v300_v5 = vld [vmem:[#allocation8 + $0x138] sm:$0xff] }
  0x73   :  { %4265 = vmatprep.subr.bf16.mxu1 %v6044_v15  ;;  %v6106_v16 = vpack.c.bf16 %v300_v5, %v296_v4 }
  0xcb   :  { %v100_v22 = vpop.permute.xlu1 %99  ;;  %v94_v23 = vpop.permute.xlu0 %93 }
  0xcc   :  { %vm116_vm0 = vcmp.eq.s32.totalorder %v94_v23, %v91_v21  ;;  %vm118_vm1 = vcmp.eq.s32.totalorder %v100_v22, %v91_v21  ;;  %v263_v22 = vld [vmem:[#allocation8 + $0x10] sm:$0xff] }
  0xcd   :  { %4121 = vmatprep.mubr.msk.f32.mxu0 %vm116_vm0, %v5907_v28  ;;  %v267_v23 = vld [vmem:[#allocation8 + $0x30] sm:$0xff] }
  0xcf   :  { %v103_v30 = vpop.permute.xlu1 %102  ;;  %v97_v31 = vpop.permute.xlu0 %96 }
  0xd0   :  { %vm117_vm2 = vcmp.eq.s32.totalorder %v97_v31, %v91_v21  ;;  %vm119_vm3 = vcmp.eq.s32.totalorder %v103_v30, %v91_v21  ;;  %v269_v30 = vld [vmem:[#allocation8 + $0x40] sm:$0xff] }
  0xd1   :  { %4122 = vmatmul.mubr.msk.f32.vlgmr.msra.gmra.mrb[0].mxu0 %vm117_vm2, %v5907_v28 }
  0xd2   :  { %4124 = vmatprep.mubr.msk.f32.mxu0 %vm118_vm1, %v5907_v28  ;;  %4235 = vmatpush1.bf16.msra.mxu0 %v4234_v29  ;;  %v6054_v29 = vpack.c.bf16 %v267_v23, %v263_v22  ;;  %v304_v22 = vld [vmem:[#allocation8 + $0x158] sm:$0xff] }
  0xd3   :  { %v109_v38 = vpop.permute.xlu1 %108  ;;  %v106_v39 = vpop.permute.xlu0 %105  ;;  %4237 = vmatprep.subr.bf16.mxu0 %v4236_v32  ;;  %v273_v32 = vld [vmem:[#allocation8 + $0x60] sm:$0xff]  ;;  %v308_v23 = vld [vmem:[#allocation8 + $0x178] sm:$0xff] }
  0xd4   :  { %vm120_vm4 = vcmp.eq.s32.totalorder %v106_v39, %v91_v21  ;;  %vm121_vm5 = vcmp.eq.s32.totalorder %v109_v38, %v91_v21  ;;  %v278_v38 = vld [vmem:[#allocation8 + $0x88] sm:$0xff]  ;;  %v6062_v42 = vpack.c.bf16 %v273_v32, %v269_v30  ;;  %v303_v30 = vld [vmem:[#allocation8 + $0x150] sm:$0xff]  ;;  %v6120_v33 = vpack.c.bf16 %v308_v23, %v304_v22 }
  0xd5   :  { %4125 = vmatmul.mubr.msk.f32.gmra.mrb[2].mxu0 %vm119_vm3, %v5907_v28  ;;  %v282_v39 = vld [vmem:[#allocation8 + $0xa8] sm:$0xff] }
  0xd6   :  { %4127 = vmatprep.mubr.msk.f32.mxu0 %vm120_vm4, %v5907_v28  ;;  %4239 = vmatpush1.bf16.msra.mxu0 %v4238_v37  ;;  %v6058_v37 = vpack.c.bf16 %v276_v27, %v272_v26  ;;  %v6070_v50 = vpack.c.bf16 %v282_v39, %v278_v38  ;;  %v301_v26 = vld [vmem:[#allocation8 + $0x140] sm:$0xff]  ;;  %v312_v38 = vld [vmem:[#allocation8 + $0x198] sm:$0xff] }
  0xd7   :  { %v112_v46 = vpop.permute.xlu0 %111  ;;  %4241 = vmatprep.subr.bf16.mxu0 %v4240_v40  ;;  %v115_v52 = vpop.permute.xlu1 %114  ;;  %v280_v40 = vld [vmem:[#allocation8 + $0x98] sm:$0xff]  ;;  %v305_v27 = vld [vmem:[#allocation8 + $0x160] sm:$0xff] }
  0xd8   :  { %vm122_vm6 = vcmp.eq.s32.totalorder %v112_v46, %v91_v21  ;;  %vm123_vm7 = vcmp.eq.s32.totalorder %v115_v52, %v91_v21  ;;  %v265_v21 = vld [vmem:[#allocation8 + $0x20] sm:$0xff]  ;;  %v6072_v51 = vpack.c.bf16 %v284_v41, %v280_v40  ;;  %v286_v52 = vld [vmem:[#allocation8 + $0xc8] sm:$0xff]  ;;  %v316_v39 = vld [vmem:[#allocation8 + $0x1b8] sm:$0xff]  ;;  %v6124_v40 = vpack.c.bf16 %v305_v27, %v301_v26 }
  0xd9   :  { %4128 = vmatmul.mubr.msk.f32.gmra.mrb[4].mxu0 %vm121_vm5, %v5907_v28  ;;  %v281_v46 = vld [vmem:[#allocation8 + $0xa0] sm:$0xff] }
  0xda   :  { %4130 = vmatprep.mubr.msk.f32.mxu0 %vm122_vm6, %v5907_v28  ;;  %4243 = vmatpush1.bf16.msra.mxu0 %v4242_v45  ;;  %v6076_v56 = vpack.c.bf16 %v281_v46, %v277_v44  ;;  %v309_v44 = vld [vmem:[#allocation8 + $0x180] sm:$0xff]  ;;  %v311_v46 = vld [vmem:[#allocation8 + $0x190] sm:$0xff] }
  0xdb   :  { %4245 = vmatprep.subr.bf16.mxu0 %v4244_v47  ;;  %v279_v47 = vld [vmem:[#allocation8 + $0x90] sm:$0xff] }
  0xdc   :  { %v6078_v57 = vpack.c.bf16 %v283_v48, %v279_v47  ;;  %v315_v47 = vld [vmem:[#allocation8 + $0x1b0] sm:$0xff] }
  0xdd   :  { %4131 = vmatmul.mubr.msk.f32.gmra.mrb[6].mxu0 %vm123_vm7, %v5907_v28  ;;  %v6052_v28 = vpack.c.bf16 %v265_v21, %v261_v19  ;;  %v302_v19 = vld [vmem:[#allocation8 + $0x148] sm:$0xff] }
  0xde   :  { %4247 = vmatpush1.bf16.msra.mxu0 %v4246_v53  ;;  %588 = vmatprep.mubr.f32.mxu0 %v5908_v17  ;;  %v290_v53 = vld [vmem:[#allocation8 + $0xe8] sm:$0xff] }
  0xdf   :  { %4249 = vmatprep.subr.bf16.mxu0 %v4248_v54  ;;  %v288_v54 = vld [vmem:[#allocation8 + $0xd8] sm:$0xff]  ;;  %v6086_v0 = vpack.c.bf16 %v290_v53, %v286_v52  ;;  %v306_v21 = vld [vmem:[#allocation8 + $0x168] sm:$0xff] }
  0xe0   :  { %v6118_v32 = vpack.c.bf16 %v306_v21, %v302_v19  ;;  %v318_v52 = vld [vmem:[#allocation8 + $0x1c8] sm:$0xff] }
  0xe1   :  { %v322_v53 = vld [vmem:[#allocation8 + $0x1e8] sm:$0xff] }
  0xe2   :  { %4251 = vmatpush1.bf16.msra.mxu0 %v4250_v59 }
  0xe3   :  { %4253 = vmatprep.subr.bf16.mxu0 %v4252_v60  ;;  %v289_v60 = vld [vmem:[#allocation8 + $0xe0] sm:$0xff] }
  0xe4   :  { %v6092_v6 = vpack.c.bf16 %v289_v60, %v285_v58  ;;  %v6142_v60 = vpack.c.bf16 %v315_v47, %v311_v46 }
  0xe6   :  { %4255 = vmatpush1.bf16.msra.mxu0 %v4254_v1  ;;  %v6088_v1 = vpack.c.bf16 %v292_v55, %v288_v54  ;;  %v320_v54 = vld [vmem:[#allocation8 + $0x1d8] sm:$0xff] }
  0xe7   :  { %4257 = vmatprep.subr.bf16.mxu0 %v4256_v2  ;;  %v294_v2 = vld [vmem:[#allocation8 + $0x108] sm:$0xff]  ;;  %v324_v55 = vld [vmem:[#allocation8 + $0x1f8] sm:$0xff] }
  0xe8   :  { %v6104_v14 = vpack.c.bf16 %v298_v3, %v294_v2  ;;  %v323_v2 = vld [vmem:[#allocation8 + $0x1f0] sm:$0xff]  ;;  %v6150_v3 = vpack.c.bf16 %v324_v55, %v320_v54 }
  0xea   :  { %4259 = vmatpush1.bf16.msra.mxu0 %v4258_v7  ;;  %v6094_v7 = vpack.c.bf16 %v291_v62, %v287_v61  ;;  %v317_v61 = vld [vmem:[#allocation8 + $0x1c0] sm:$0xff] }
  0xeb   :  { %4261 = vmatprep.subr.bf16.mxu0 %v4260_v8  ;;  %v293_v8 = vld [vmem:[#allocation8 + $0x100] sm:$0xff] }
  0xec   :  { %v6110_v24 = vpack.c.bf16 %v297_v10, %v293_v8  ;;  %v321_v62 = vld [vmem:[#allocation8 + $0x1e0] sm:$0xff]  ;;  %v6209_v8 = vshrl.u32 %v90_v20, 7 }
  0xed   :  { %v6156_v4 = vpack.c.bf16 %v321_v62, %v317_v61  ;;  %v389_v10 = vld [vmem:[%s6991_s4] sm:$0xf] }
  0xee   :  { %4263 = vmatpush1.bf16.msra.mxu0 %v4262_v11  ;;  %v295_v11 = vld [vmem:[#allocation8 + $0x110] sm:$0xff]  ;;  %v405_v20 = vsub.s32 3, %v6209_v8 }
  0xef   :  { %4297 = vmatprep.subr.bf16.mxu0 %v6048_v18  ;;  %v6112_v25 = vpack.c.bf16 %v299_v12, %v295_v11  ;;  %v397_v11 = vsub.s32 1, %v6209_v8 }
 0x1a4   :  { %v4123_v31 = vpop.f32.mrb[0].mxu0 }
 0x1a5   :  { %v222_v35 = vpop.f32.mrb[1].mxu0 }
 0x1a6   :  { %476 = vmatmul.mubr.f32.vlgmr.msra.gmra.mrb[0].mxu1 %v222_v35  ;;  %589 = vmatmul.mubr.f32.vlgmr.msra.gmra.mrb[8].mxu0 %v222_v35  ;;  %v314_v35 = vld [vmem:[#allocation8 + $0x1a8] sm:$0xff] }
 0x1a7   :  { %4267 = vmatpush1.bf16.msra.mxu1 %v6052_v28  ;;  %4299 = vmatpush1.bf16.msra.mxu0 %v6054_v29  ;;  %v6132_v48 = vpack.c.bf16 %v314_v35, %v310_v34  ;;  %v6229_v34 = vrot.slane %v389_v10, %v405_v20  ;;  %v401_v35 = vsub.s32 2, %v6209_v8 }
 0x1a8   :  { %v4126_v45 = vpop.f32.mrb[2].mxu0  ;;  %481 = vmatprep.mubr.f32.mxu1 %v5908_v17  ;;  %594 = vmatprep.mubr.f32.mxu0 %v5908_v17 }
 0x1a9   :  { %v232_v49 = vpop.f32.mrb[3].mxu0  ;;  %4269 = vmatprep.subr.bf16.mxu1 %v6056_v36  ;;  %4301 = vmatprep.subr.bf16.mxu0 %v6058_v37 }
 0x1aa   :  { %482 = vmatmul.mubr.f32.gmra.mrb[2].mxu1 %v4123_v31  ;;  %595 = vmatmul.mubr.f32.gmra.mrb[10].mxu0 %v4123_v31  ;;  %v307_v31 = vld [vmem:[#allocation8 + $0x170] sm:$0xff] }
 0x1ab   :  { %4271 = vmatpush1.bf16.msra.mxu1 %v6062_v42  ;;  %4303 = vmatpush1.bf16.msra.mxu0 %v6064_v43  ;;  %v6126_v41 = vpack.c.bf16 %v307_v31, %v303_v30 }
 0x1ac   :  { %v6080_v59 = vpop.f32.mrb[4].mxu0  ;;  %487 = vmatprep.mubr.f32.mxu1 %v5908_v17  ;;  %600 = vmatprep.mubr.f32.mxu0 %v5908_v17 }
 0x1ad   :  { %v242_v63 = vpop.f32.mrb[5].mxu0  ;;  %4273 = vmatprep.subr.bf16.mxu1 %v6070_v50  ;;  %4305 = vmatprep.subr.bf16.mxu0 %v6072_v51 }
 0x1ae   :  { %488 = vmatmul.mubr.f32.gmra.mrb[4].mxu1 %v232_v49  ;;  %601 = vmatmul.mubr.f32.gmra.mrb[12].mxu0 %v232_v49  ;;  %v6134_v49 = vpack.c.bf16 %v316_v39, %v312_v38  ;;  %v6235_v39 = vrot.slane %v389_v10, %v401_v35 }
 0x1af   :  { %4275 = vmatpush1.bf16.msra.mxu1 %v6076_v56  ;;  %4307 = vmatpush1.bf16.msra.mxu0 %v6078_v57 }
 0x1b0   :  { %v6096_v9 = vpop.f32.mrb[6].mxu0  ;;  %493 = vmatprep.mubr.f32.mxu1 %v5908_v17  ;;  %606 = vmatprep.mubr.f32.mxu0 %v5908_v17 }
 0x1b1   :  { %v6100_v13 = vpop.f32.mrb[7].mxu0  ;;  %4277 = vmatprep.subr.bf16.mxu1 %v6086_v0  ;;  %4309 = vmatprep.subr.bf16.mxu0 %v6088_v1 }
 0x1b2   :  { %494 = vmatmul.mubr.f32.gmra.mrb[6].mxu1 %v4126_v45  ;;  %607 = vmatmul.mubr.f32.gmra.mrb[14].mxu0 %v4126_v45  ;;  %v313_v45 = vld [vmem:[#allocation8 + $0x1a0] sm:$0xff] }
 0x1b3   :  { %4279 = vmatpush1.bf16.msra.mxu1 %v6092_v6  ;;  %4311 = vmatpush1.bf16.msra.mxu0 %v6094_v7  ;;  %v6140_v58 = vpack.c.bf16 %v313_v45, %v309_v44 }
 0x1b4   :  { %499 = vmatprep.mubr.f32.mxu1 %v5908_v17  ;;  %612 = vmatprep.mubr.f32.mxu0 %v5908_v17 }
 0x1b5   :  { %4281 = vmatprep.subr.bf16.mxu1 %v6104_v14  ;;  %4313 = vmatprep.subr.bf16.mxu0 %v6106_v16 }
 0x1b6   :  { %500 = vmatmul.mubr.f32.gmra.mrb[8].mxu1 %v242_v63  ;;  %613 = vmatmul.mubr.f32.gmra.mrb[16].mxu0 %v242_v63  ;;  %v319_v63 = vld [vmem:[#allocation8 + $0x1d0] sm:$0xff] }
 0x1b7   :  { %4283 = vmatpush1.bf16.msra.mxu1 %v6110_v24  ;;  %4315 = vmatpush1.bf16.msra.mxu0 %v6112_v25  ;;  %v6158_v5 = vpack.c.bf16 %v323_v2, %v319_v63 }
 0x1b8   :  { %505 = vmatprep.mubr.f32.mxu1 %v5908_v17  ;;  %618 = vmatprep.mubr.f32.mxu0 %v5908_v17 }
 0x1b9   :  { %4285 = vmatprep.subr.bf16.mxu1 %v6118_v32  ;;  %4317 = vmatprep.subr.bf16.mxu0 %v6120_v33 }
 0x1ba   :  { %506 = vmatmul.mubr.f32.gmra.mrb[10].mxu1 %v6080_v59  ;;  %619 = vmatmul.mubr.f32.gmra.mrb[18].mxu0 %v6080_v59  ;;  %v6148_v59 = vpack.c.bf16 %v322_v53, %v318_v52 }
 0x1bb   :  { %4287 = vmatpush1.bf16.msra.mxu1 %v6124_v40  ;;  %4319 = vmatpush1.bf16.msra.mxu0 %v6126_v41 }
 0x1bc   :  { %511 = vmatprep.mubr.f32.mxu1 %v5908_v17  ;;  %624 = vmatprep.mubr.f32.mxu0 %v5908_v17 }
 0x1bd   :  { %4289 = vmatprep.subr.bf16.mxu1 %v6132_v48  ;;  %4321 = vmatprep.subr.bf16.mxu0 %v6134_v49 }
 0x1be   :  { %512 = vmatmul.mubr.f32.gmra.mrb[12].mxu1 %v6100_v13  ;;  %625 = vmatmul.mubr.f32.gmra.mrb[20].mxu0 %v6100_v13  ;;  %v6222_v13 = vrot.slane %v389_v10, %v397_v11 }
 0x1bf   :  { %4291 = vmatpush1.bf16.msra.mxu1 %v6140_v58  ;;  %4323 = vmatpush1.bf16.msra.mxu0 %v6142_v60 }
 0x1c0   :  { %517 = vmatprep.mubr.f32.mxu1 %v5908_v17  ;;  %630 = vmatprep.mubr.f32.mxu0 %v5908_v17 }
 0x1c1   :  { %4293 = vmatprep.subr.bf16.mxu1 %v6148_v59  ;;  %4325 = vmatprep.subr.bf16.mxu0 %v6150_v3 }
 0x1c2   :  { %518 = vmatmul.mubr.f32.gmra.mrb[14].mxu1 %v6096_v9  ;;  %631 = vmatmul.mubr.f32.gmra.mrb[22].mxu0 %v6096_v9  ;;  %v393_v9 = vsub.s32 0, %v6209_v8 }
 0x1c3   :  { %4295 = vmatpush1.bf16.msra.mxu1 %v6156_v4  ;;  %4327 = vmatpush1.bf16.msra.mxu0 %v6158_v5 }
 0x1c4   :  { %737 = vmatprep.mubr.f32.mxu1 %v5908_v17  ;;  %808 = vmatprep.mubr.f32.mxu0 %v5908_v17  ;;  %v6218_v12 = vrot.slane %v389_v10, %v393_v9 }
 0x1c5   :  { %4329 = vmatprep.subr.bf16.mxu1 %v6044_v15  ;;  %4361 = vmatprep.subr.bf16.mxu0 %v6048_v18 }
 0x1c6   :  { %738 = vmatmul.mubr.f32.vlgmr.msra.gmra.mrb[0].mxu1 %v5908_v17  ;;  %809 = vmatmul.mubr.f32.vlgmr.msra.gmra.mrb[8].mxu0 %v5908_v17 }
 0x1c7   :  { %4331 = vmatpush1.bf16.msra.mxu1 %v6052_v28  ;;  %4363 = vmatpush1.bf16.msra.mxu0 %v6054_v29 }
 0x1c8   :  { %4333 = vmatprep.subr.bf16.mxu1 %v6056_v36  ;;  %4365 = vmatprep.subr.bf16.mxu0 %v6058_v37 }
 0x1c9   :  { %911 = vmatprep.mubr.f32.mxu1 %v5908_v17  ;;  %982 = vmatprep.mubr.f32.mxu0 %v5908_v17 }
 0x1cb   :  { %4335 = vmatpush1.bf16.msra.mxu1 %v6062_v42  ;;  %4367 = vmatpush1.bf16.msra.mxu0 %v6064_v43 }
 0x1cc   :  { %4337 = vmatprep.subr.bf16.mxu1 %v6070_v50  ;;  %4369 = vmatprep.subr.bf16.mxu0 %v6072_v51 }
 0x1cf   :  { %4339 = vmatpush1.bf16.msra.mxu1 %v6076_v56  ;;  %4371 = vmatpush1.bf16.msra.mxu0 %v6078_v57 }
 0x1d0   :  { %4341 = vmatprep.subr.bf16.mxu1 %v6086_v0  ;;  %4373 = vmatprep.subr.bf16.mxu0 %v6088_v1 }
 0x1d3   :  { %4343 = vmatpush1.bf16.msra.mxu1 %v6092_v6  ;;  %4375 = vmatpush1.bf16.msra.mxu0 %v6094_v7 }
 0x1d4   :  { %4345 = vmatprep.subr.bf16.mxu1 %v6104_v14  ;;  %4377 = vmatprep.subr.bf16.mxu0 %v6106_v16 }
 0x1d7   :  { %4347 = vmatpush1.bf16.msra.mxu1 %v6110_v24  ;;  %4379 = vmatpush1.bf16.msra.mxu0 %v6112_v25 }
 0x1d8   :  { %4349 = vmatprep.subr.bf16.mxu1 %v6118_v32  ;;  %4381 = vmatprep.subr.bf16.mxu0 %v6120_v33 }
 0x1db   :  { %4351 = vmatpush1.bf16.msra.mxu1 %v6124_v40  ;;  %4383 = vmatpush1.bf16.msra.mxu0 %v6126_v41 }
 0x1dc   :  { %4353 = vmatprep.subr.bf16.mxu1 %v6132_v48  ;;  %4385 = vmatprep.subr.bf16.mxu0 %v6134_v49 }
 0x1df   :  { %4355 = vmatpush1.bf16.msra.mxu1 %v6140_v58  ;;  %4387 = vmatpush1.bf16.msra.mxu0 %v6142_v60 }
 0x1e0   :  { %4357 = vmatprep.subr.bf16.mxu1 %v6148_v59  ;;  %4389 = vmatprep.subr.bf16.mxu0 %v6150_v3 }
 0x1e3   :  { %4359 = vmatpush1.bf16.msra.mxu1 %v6156_v4  ;;  %4391 = vmatpush1.bf16.msra.mxu0 %v6158_v5 }
 0x1e4   :  { %4393 = vmatprep.subr.bf16.mxu1 %v6044_v15  ;;  %4425 = vmatprep.subr.bf16.mxu0 %v6048_v18 }
 0x299   :  { %v739_v19 = vpop.f32.mrb[0].mxu1  ;;  %v810_v21 = vpop.f32.mrb[8].mxu0 }
 0x29a   :  { %v5376_v22 = vadd.f32 %v739_v19, %v6218_v12  ;;  %v741_v23 = vpop.f32.mrb[1].mxu1  ;;  %v812_v26 = vpop.f32.mrb[9].mxu0  ;;  %v5392_v45 = vadd.f32 %v810_v21, %v6235_v39 }
 0x29b   :  { %v5377_v27 = vadd.f32 %v741_v23, %v6222_v13  ;;  %v5393_v38 = vadd.f32 %v812_v26, %v6229_v34 }
 0x29c   :  { %v3997_v30 = vmul.f32 -1.442695, %v5376_v22 }
 0x29d   :  { %v3998_v31 = vmul.f32 -1.442695, %v5377_v27  ;;  %v3999_v44 = vmul.f32 -1.442695, %v5393_v38 }
 0x29e   :  { %5520 = vpow2.f32 %v3997_v30 }
 0x29f   :  { %5522 = vpow2.f32 %v3998_v31 }
 0x2a0   :  { %5524 = vpow2.f32 %v3999_v44 }
 0x2a1   :  { %5526 = vtanh.f32 %v5392_v45 }
 0x2a8   :  { %v5521_v46 = vpop.eup %5520 }
 0x2a9   :  { %v5523_v47 = vpop.eup %5522  ;;  %v825_v52 = vadd.f32 1.0, %v5521_v46 }
 0x2aa   :  { %v826_v53 = vadd.f32 1.0, %v5523_v47  ;;  %v5525_v54 = vpop.eup %5524 }
 0x2ab   :  { %5528 = vrcp.f32 %v825_v52  ;;  %v5527_v55 = vpop.eup %5526  ;;  %v835_v2 = vadd.f32 1.0, %v5525_v54 }
 0x2ac   :  { %5530 = vrcp.f32 %v826_v53 }
 0x2ad   :  { %5532 = vrcp.f32 %v835_v2 }
 0x2b5   :  { %v5529_v61 = vpop.eup %5528 }
 0x2b6   :  { %v5531_v62 = vpop.eup %5530  ;;  %v839_v63 = vmul.f32 %v5529_v61, %v5527_v55 }
 0x2b7   :  { %v838_v19 = vmul.f32 0.0, %v5531_v62  ;;  %v5533_v21 = vpop.eup %5532 }
 0x2b9   :  { %v6238_v10 = vadd.f32 %v839_v63, %v838_v19 }
 0x2bb   :  { %5534 = vtanh.f32 %v6238_v10 }
 0x2c5   :  { %v5535_v22 = vpop.eup %5534 }
 0x2c6   :  { %v6241_v23 = vmul.f32 %v5535_v22, %v5533_v21 }
 0x2c8   :  { %912 = vmatmul.mubr.f32.vlgmr.msra.gmra.mrb[2].mxu1 %v6241_v23  ;;  %983 = vmatmul.mubr.f32.vlgmr.msra.gmra.mrb[10].mxu0 %v6241_v23 }
 0x2c9   :  { %4395 = vmatpush1.bf16.msra.mxu1 %v6052_v28  ;;  %4427 = vmatpush1.bf16.msra.mxu0 %v6054_v29 }
 0x2ca   :  { %4397 = vmatprep.subr.bf16.mxu1 %v6056_v36  ;;  %4429 = vmatprep.subr.bf16.mxu0 %v6058_v37 }
 0x2cb   :  { %1085 = vmatprep.mubr.f32.mxu1 %v5908_v17  ;;  %1156 = vmatprep.mubr.f32.mxu0 %v5908_v17 }
 0x2cd   :  { %4399 = vmatpush1.bf16.msra.mxu1 %v6062_v42  ;;  %4431 = vmatpush1.bf16.msra.mxu0 %v6064_v43 }
 0x2ce   :  { %4401 = vmatprep.subr.bf16.mxu1 %v6070_v50  ;;  %4433 = vmatprep.subr.bf16.mxu0 %v6072_v51 }
 0x2d1   :  { %4403 = vmatpush1.bf16.msra.mxu1 %v6076_v56  ;;  %4435 = vmatpush1.bf16.msra.mxu0 %v6078_v57 }
 0x2d2   :  { %4405 = vmatprep.subr.bf16.mxu1 %v6086_v0  ;;  %4437 = vmatprep.subr.bf16.mxu0 %v6088_v1 }
 0x2d5   :  { %4407 = vmatpush1.bf16.msra.mxu1 %v6092_v6  ;;  %4439 = vmatpush1.bf16.msra.mxu0 %v6094_v7 }
 0x2d6   :  { %4409 = vmatprep.subr.bf16.mxu1 %v6104_v14  ;;  %4441 = vmatprep.subr.bf16.mxu0 %v6106_v16 }
 0x2d9   :  { %4411 = vmatpush1.bf16.msra.mxu1 %v6110_v24  ;;  %4443 = vmatpush1.bf16.msra.mxu0 %v6112_v25 }
 0x2da   :  { %4413 = vmatprep.subr.bf16.mxu1 %v6118_v32  ;;  %4445 = vmatprep.subr.bf16.mxu0 %v6120_v33 }
 0x2dd   :  { %4415 = vmatpush1.bf16.msra.mxu1 %v6124_v40  ;;  %4447 = vmatpush1.bf16.msra.mxu0 %v6126_v41 }
 0x2de   :  { %4417 = vmatprep.subr.bf16.mxu1 %v6132_v48  ;;  %4449 = vmatprep.subr.bf16.mxu0 %v6134_v49 }
 0x2e1   :  { %4419 = vmatpush1.bf16.msra.mxu1 %v6140_v58  ;;  %4451 = vmatpush1.bf16.msra.mxu0 %v6142_v60 }
 0x2e2   :  { %4421 = vmatprep.subr.bf16.mxu1 %v6148_v59  ;;  %4453 = vmatprep.subr.bf16.mxu0 %v6150_v3 }
 0x2e5   :  { %4423 = vmatpush1.bf16.msra.mxu1 %v6156_v4  ;;  %4455 = vmatpush1.bf16.msra.mxu0 %v6158_v5 }
 0x2e6   :  { %4457 = vmatprep.subr.bf16.mxu1 %v6044_v15  ;;  %4489 = vmatprep.subr.bf16.mxu0 %v6048_v18 }
 0x39b   :  { %v913_v26 = vpop.f32.mrb[2].mxu1  ;;  %v984_v27 = vpop.f32.mrb[10].mxu0 }
 0x39c   :  { %v5378_v30 = vadd.f32 %v913_v26, %v6218_v12  ;;  %v915_v31 = vpop.f32.mrb[3].mxu1  ;;  %v986_v38 = vpop.f32.mrb[11].mxu0  ;;  %v5394_v53 = vadd.f32 %v984_v27, %v6235_v39 }
 0x39d   :  { %v5379_v44 = vadd.f32 %v915_v31, %v6222_v13  ;;  %v5395_v47 = vadd.f32 %v986_v38, %v6229_v34 }
 0x39e   :  { %v4000_v45 = vmul.f32 -1.442695, %v5378_v30 }
 0x39f   :  { %v4001_v46 = vmul.f32 -1.442695, %v5379_v44  ;;  %v4002_v52 = vmul.f32 -1.442695, %v5395_v47 }
 0x3a0   :  { %5536 = vpow2.f32 %v4000_v45 }
 0x3a1   :  { %5538 = vpow2.f32 %v4001_v46 }
 0x3a2   :  { %5540 = vpow2.f32 %v4002_v52 }
 0x3a3   :  { %5542 = vtanh.f32 %v5394_v53 }
 0x3aa   :  { %v5537_v54 = vpop.eup %5536 }
 0x3ab   :  { %v5539_v55 = vpop.eup %5538  ;;  %v999_v61 = vadd.f32 1.0, %v5537_v54 }
 0x3ac   :  { %v1000_v62 = vadd.f32 1.0, %v5539_v55  ;;  %v5541_v63 = vpop.eup %5540 }
 0x3ad   :  { %5544 = vrcp.f32 %v999_v61  ;;  %v5543_v2 = vpop.eup %5542  ;;  %v1009_v26 = vadd.f32 1.0, %v5541_v63 }
 0x3ae   :  { %5546 = vrcp.f32 %v1000_v62 }
 0x3af   :  { %5548 = vrcp.f32 %v1009_v26 }
 0x3b7   :  { %v5545_v19 = vpop.eup %5544 }
 0x3b8   :  { %v5547_v21 = vpop.eup %5546  ;;  %v1013_v22 = vmul.f32 %v5545_v19, %v5543_v2 }
 0x3b9   :  { %v1012_v30 = vmul.f32 %v5547_v21, %v6238_v10  ;;  %v5549_v27 = vpop.eup %5548 }
 0x3bb   :  { %v6284_v31 = vadd.f32 %v1013_v22, %v1012_v30 }
 0x3bd   :  { %5550 = vtanh.f32 %v6284_v31 }
 0x3c7   :  { %v5551_v38 = vpop.eup %5550 }
 0x3c8   :  { %v6287_v44 = vmul.f32 %v5551_v38, %v5549_v27 }
 0x3ca   :  { %1086 = vmatmul.mubr.f32.vlgmr.msra.gmra.mrb[4].mxu1 %v6287_v44  ;;  %1157 = vmatmul.mubr.f32.vlgmr.msra.gmra.mrb[12].mxu0 %v6287_v44 }
 0x3cb   :  { %4459 = vmatpush1.bf16.msra.mxu1 %v6052_v28  ;;  %4491 = vmatpush1.bf16.msra.mxu0 %v6054_v29 }
 0x3cc   :  { %4461 = vmatprep.subr.bf16.mxu1 %v6056_v36  ;;  %4493 = vmatprep.subr.bf16.mxu0 %v6058_v37 }
 0x3cd   :  { %1259 = vmatprep.mubr.f32.mxu1 %v5908_v17  ;;  %1330 = vmatprep.mubr.f32.mxu0 %v5908_v17 }
 0x3cf   :  { %4463 = vmatpush1.bf16.msra.mxu1 %v6062_v42  ;;  %4495 = vmatpush1.bf16.msra.mxu0 %v6064_v43 }
 0x3d0   :  { %4465 = vmatprep.subr.bf16.mxu1 %v6070_v50  ;;  %4497 = vmatprep.subr.bf16.mxu0 %v6072_v51 }
 0x3d3   :  { %4467 = vmatpush1.bf16.msra.mxu1 %v6076_v56  ;;  %4499 = vmatpush1.bf16.msra.mxu0 %v6078_v57 }
 0x3d4   :  { %4469 = vmatprep.subr.bf16.mxu1 %v6086_v0  ;;  %4501 = vmatprep.subr.bf16.mxu0 %v6088_v1 }
 0x3d7   :  { %4471 = vmatpush1.bf16.msra.mxu1 %v6092_v6  ;;  %4503 = vmatpush1.bf16.msra.mxu0 %v6094_v7 }
 0x3d8   :  { %4473 = vmatprep.subr.bf16.mxu1 %v6104_v14  ;;  %4505 = vmatprep.subr.bf16.mxu0 %v6106_v16 }
 0x3db   :  { %4475 = vmatpush1.bf16.msra.mxu1 %v6110_v24  ;;  %4507 = vmatpush1.bf16.msra.mxu0 %v6112_v25 }
 0x3dc   :  { %4477 = vmatprep.subr.bf16.mxu1 %v6118_v32  ;;  %4509 = vmatprep.subr.bf16.mxu0 %v6120_v33 }
 0x3df   :  { %4479 = vmatpush1.bf16.msra.mxu1 %v6124_v40  ;;  %4511 = vmatpush1.bf16.msra.mxu0 %v6126_v41 }
 0x3e0   :  { %4481 = vmatprep.subr.bf16.mxu1 %v6132_v48  ;;  %4513 = vmatprep.subr.bf16.mxu0 %v6134_v49 }
 0x3e3   :  { %4483 = vmatpush1.bf16.msra.mxu1 %v6140_v58  ;;  %4515 = vmatpush1.bf16.msra.mxu0 %v6142_v60 }
 0x3e4   :  { %4485 = vmatprep.subr.bf16.mxu1 %v6148_v59  ;;  %4517 = vmatprep.subr.bf16.mxu0 %v6150_v3 }
 0x3e7   :  { %4487 = vmatpush1.bf16.msra.mxu1 %v6156_v4  ;;  %4519 = vmatpush1.bf16.msra.mxu0 %v6158_v5 }
 0x3e8   :  { %4521 = vmatprep.subr.bf16.mxu1 %v6044_v15  ;;  %4553 = vmatprep.subr.bf16.mxu0 %v6048_v18 }
 0x49d   :  { %v1087_v10 = vpop.f32.mrb[4].mxu1  ;;  %v1158_v45 = vpop.f32.mrb[12].mxu0 }
 0x49e   :  { %v5380_v46 = vadd.f32 %v1087_v10, %v6218_v12  ;;  %v1089_v47 = vpop.f32.mrb[5].mxu1  ;;  %v1160_v52 = vpop.f32.mrb[13].mxu0  ;;  %v5396_v63 = vadd.f32 %v1158_v45, %v6235_v39 }
 0x49f   :  { %v5381_v53 = vadd.f32 %v1089_v47, %v6222_v13  ;;  %v5397_v61 = vadd.f32 %v1160_v52, %v6229_v34 }
 0x4a0   :  { %v4003_v54 = vmul.f32 -1.442695, %v5380_v46 }
 0x4a1   :  { %v4004_v55 = vmul.f32 -1.442695, %v5381_v53  ;;  %v4005_v62 = vmul.f32 -1.442695, %v5397_v61 }
 0x4a2   :  { %5552 = vpow2.f32 %v4003_v54 }
 0x4a3   :  { %5554 = vpow2.f32 %v4004_v55 }
 0x4a4   :  { %5556 = vpow2.f32 %v4005_v62 }
 0x4a5   :  { %5558 = vtanh.f32 %v5396_v63 }
 0x4ac   :  { %v5553_v2 = vpop.eup %5552 }
 0x4ad   :  { %v5555_v19 = vpop.eup %5554  ;;  %v1173_v21 = vadd.f32 1.0, %v5553_v2 }
 0x4ae   :  { %v1174_v22 = vadd.f32 1.0, %v5555_v19  ;;  %v5557_v26 = vpop.eup %5556 }
 0x4af   :  { %5560 = vrcp.f32 %v1173_v21  ;;  %v5559_v30 = vpop.eup %5558  ;;  %v1183_v46 = vadd.f32 1.0, %v5557_v26 }
 0x4b0   :  { %5562 = vrcp.f32 %v1174_v22 }
 0x4b1   :  { %5564 = vrcp.f32 %v1183_v46 }
 0x4b9   :  { %v5561_v27 = vpop.eup %5560 }
 0x4ba   :  { %v5563_v38 = vpop.eup %5562  ;;  %v1187_v10 = vmul.f32 %v5561_v27, %v5559_v30 }
 0x4bb   :  { %v1186_v47 = vmul.f32 %v5563_v38, %v6284_v31  ;;  %v5565_v45 = vpop.eup %5564 }
 0x4bd   :  { %v6330_v52 = vadd.f32 %v1187_v10, %v1186_v47 }
 0x4bf   :  { %5566 = vtanh.f32 %v6330_v52 }
 0x4c9   :  { %v5567_v53 = vpop.eup %5566 }
 0x4ca   :  { %v6333_v54 = vmul.f32 %v5567_v53, %v5565_v45 }
 0x4cc   :  { %1260 = vmatmul.mubr.f32.vlgmr.msra.gmra.mrb[6].mxu1 %v6333_v54  ;;  %1331 = vmatmul.mubr.f32.vlgmr.msra.gmra.mrb[14].mxu0 %v6333_v54 }
 0x4cd   :  { %4523 = vmatpush1.bf16.msra.mxu1 %v6052_v28  ;;  %4555 = vmatpush1.bf16.msra.mxu0 %v6054_v29 }
 0x4ce   :  { %4525 = vmatprep.subr.bf16.mxu1 %v6056_v36  ;;  %4557 = vmatprep.subr.bf16.mxu0 %v6058_v37 }
 0x4cf   :  { %1433 = vmatprep.mubr.f32.mxu1 %v5908_v17  ;;  %1504 = vmatprep.mubr.f32.mxu0 %v5908_v17 }
 0x4d1   :  { %4527 = vmatpush1.bf16.msra.mxu1 %v6062_v42  ;;  %4559 = vmatpush1.bf16.msra.mxu0 %v6064_v43 }
 0x4d2   :  { %4529 = vmatprep.subr.bf16.mxu1 %v6070_v50  ;;  %4561 = vmatprep.subr.bf16.mxu0 %v6072_v51 }
 0x4d5   :  { %4531 = vmatpush1.bf16.msra.mxu1 %v6076_v56  ;;  %4563 = vmatpush1.bf16.msra.mxu0 %v6078_v57 }
 0x4d6   :  { %4533 = vmatprep.subr.bf16.mxu1 %v6086_v0  ;;  %4565 = vmatprep.subr.bf16.mxu0 %v6088_v1 }
 0x4d9   :  { %4535 = vmatpush1.bf16.msra.mxu1 %v6092_v6  ;;  %4567 = vmatpush1.bf16.msra.mxu0 %v6094_v7 }
 0x4da   :  { %4537 = vmatprep.subr.bf16.mxu1 %v6104_v14  ;;  %4569 = vmatprep.subr.bf16.mxu0 %v6106_v16 }
 0x4dd   :  { %4539 = vmatpush1.bf16.msra.mxu1 %v6110_v24  ;;  %4571 = vmatpush1.bf16.msra.mxu0 %v6112_v25 }
 0x4de   :  { %4541 = vmatprep.subr.bf16.mxu1 %v6118_v32  ;;  %4573 = vmatprep.subr.bf16.mxu0 %v6120_v33 }
 0x4e1   :  { %4543 = vmatpush1.bf16.msra.mxu1 %v6124_v40  ;;  %4575 = vmatpush1.bf16.msra.mxu0 %v6126_v41 }
 0x4e2   :  { %4545 = vmatprep.subr.bf16.mxu1 %v6132_v48  ;;  %4577 = vmatprep.subr.bf16.mxu0 %v6134_v49 }
 0x4e5   :  { %4547 = vmatpush1.bf16.msra.mxu1 %v6140_v58  ;;  %4579 = vmatpush1.bf16.msra.mxu0 %v6142_v60 }
 0x4e6   :  { %4549 = vmatprep.subr.bf16.mxu1 %v6148_v59  ;;  %4581 = vmatprep.subr.bf16.mxu0 %v6150_v3 }
 0x4e9   :  { %4551 = vmatpush1.bf16.msra.mxu1 %v6156_v4  ;;  %4583 = vmatpush1.bf16.msra.mxu0 %v6158_v5 }
 0x4ea   :  { %4585 = vmatprep.subr.bf16.mxu1 %v6044_v15  ;;  %4617 = vmatprep.subr.bf16.mxu0 %v6048_v18 }
 0x59f   :  { %v1261_v31 = vpop.f32.mrb[6].mxu1  ;;  %v1332_v55 = vpop.f32.mrb[14].mxu0 }
 0x5a0   :  { %v5382_v61 = vadd.f32 %v1261_v31, %v6218_v12  ;;  %v1263_v62 = vpop.f32.mrb[7].mxu1  ;;  %v1334_v63 = vpop.f32.mrb[15].mxu0  ;;  %v5398_v30 = vadd.f32 %v1332_v55, %v6235_v39 }
 0x5a1   :  { %v5383_v2 = vadd.f32 %v1263_v62, %v6222_v13  ;;  %v5399_v22 = vadd.f32 %v1334_v63, %v6229_v34 }
 0x5a2   :  { %v4006_v19 = vmul.f32 -1.442695, %v5382_v61 }
 0x5a3   :  { %v4007_v21 = vmul.f32 -1.442695, %v5383_v2  ;;  %v4008_v26 = vmul.f32 -1.442695, %v5399_v22 }
 0x5a4   :  { %5568 = vpow2.f32 %v4006_v19 }
 0x5a5   :  { %5570 = vpow2.f32 %v4007_v21 }
 0x5a6   :  { %5572 = vpow2.f32 %v4008_v26 }
 0x5a7   :  { %5574 = vtanh.f32 %v5398_v30 }
 0x5ae   :  { %v5569_v27 = vpop.eup %5568 }
 0x5af   :  { %v5571_v38 = vpop.eup %5570  ;;  %v1347_v10 = vadd.f32 1.0, %v5569_v27 }
 0x5b0   :  { %v1348_v46 = vadd.f32 1.0, %v5571_v38  ;;  %v5573_v47 = vpop.eup %5572 }
 0x5b1   :  { %5576 = vrcp.f32 %v1347_v10  ;;  %v5575_v45 = vpop.eup %5574  ;;  %v1357_v62 = vadd.f32 1.0, %v5573_v47 }
 0x5b2   :  { %5578 = vrcp.f32 %v1348_v46 }
 0x5b3   :  { %5580 = vrcp.f32 %v1357_v62 }
 0x5bb   :  { %v5577_v53 = vpop.eup %5576 }
 0x5bc   :  { %v5579_v31 = vpop.eup %5578  ;;  %v1361_v61 = vmul.f32 %v5577_v53, %v5575_v45 }
 0x5bd   :  { %v1360_v2 = vmul.f32 %v5579_v31, %v6330_v52  ;;  %v5581_v55 = vpop.eup %5580 }
 0x5bf   :  { %v6376_v63 = vadd.f32 %v1361_v61, %v1360_v2 }
 0x5c1   :  { %5582 = vtanh.f32 %v6376_v63 }
 0x5cb   :  { %v5583_v19 = vpop.eup %5582 }
 0x5cc   :  { %v6379_v21 = vmul.f32 %v5583_v19, %v5581_v55 }
 0x5ce   :  { %1434 = vmatmul.mubr.f32.vlgmr.msra.gmra.mrb[8].mxu1 %v6379_v21  ;;  %1505 = vmatmul.mubr.f32.vlgmr.msra.gmra.mrb[16].mxu0 %v6379_v21 }
 0x5cf   :  { %4587 = vmatpush1.bf16.msra.mxu1 %v6052_v28  ;;  %4619 = vmatpush1.bf16.msra.mxu0 %v6054_v29 }
 0x5d0   :  { %4589 = vmatprep.subr.bf16.mxu1 %v6056_v36  ;;  %4621 = vmatprep.subr.bf16.mxu0 %v6058_v37 }
 0x5d1   :  { %1607 = vmatprep.mubr.f32.mxu1 %v5908_v17  ;;  %1678 = vmatprep.mubr.f32.mxu0 %v5908_v17 }
 0x5d3   :  { %4591 = vmatpush1.bf16.msra.mxu1 %v6062_v42  ;;  %4623 = vmatpush1.bf16.msra.mxu0 %v6064_v43 }
 0x5d4   :  { %4593 = vmatprep.subr.bf16.mxu1 %v6070_v50  ;;  %4625 = vmatprep.subr.bf16.mxu0 %v6072_v51 }
 0x5d7   :  { %4595 = vmatpush1.bf16.msra.mxu1 %v6076_v56  ;;  %4627 = vmatpush1.bf16.msra.mxu0 %v6078_v57 }
 0x5d8   :  { %4597 = vmatprep.subr.bf16.mxu1 %v6086_v0  ;;  %4629 = vmatprep.subr.bf16.mxu0 %v6088_v1 }
 0x5db   :  { %4599 = vmatpush1.bf16.msra.mxu1 %v6092_v6  ;;  %4631 = vmatpush1.bf16.msra.mxu0 %v6094_v7 }
 0x5dc   :  { %4601 = vmatprep.subr.bf16.mxu1 %v6104_v14  ;;  %4633 = vmatprep.subr.bf16.mxu0 %v6106_v16 }
 0x5df   :  { %4603 = vmatpush1.bf16.msra.mxu1 %v6110_v24  ;;  %4635 = vmatpush1.bf16.msra.mxu0 %v6112_v25 }
 0x5e0   :  { %4605 = vmatprep.subr.bf16.mxu1 %v6118_v32  ;;  %4637 = vmatprep.subr.bf16.mxu0 %v6120_v33 }
 0x5e3   :  { %4607 = vmatpush1.bf16.msra.mxu1 %v6124_v40  ;;  %4639 = vmatpush1.bf16.msra.mxu0 %v6126_v41 }
 0x5e4   :  { %4609 = vmatprep.subr.bf16.mxu1 %v6132_v48  ;;  %4641 = vmatprep.subr.bf16.mxu0 %v6134_v49 }
 0x5e7   :  { %4611 = vmatpush1.bf16.msra.mxu1 %v6140_v58  ;;  %4643 = vmatpush1.bf16.msra.mxu0 %v6142_v60 }
 0x5e8   :  { %4613 = vmatprep.subr.bf16.mxu1 %v6148_v59  ;;  %4645 = vmatprep.subr.bf16.mxu0 %v6150_v3 }
 0x5eb   :  { %4615 = vmatpush1.bf16.msra.mxu1 %v6156_v4  ;;  %4647 = vmatpush1.bf16.msra.mxu0 %v6158_v5 }
 0x5ec   :  { %4649 = vmatprep.subr.bf16.mxu1 %v6044_v15  ;;  %4681 = vmatprep.subr.bf16.mxu0 %v6048_v18 }
 0x6a1   :  { %v1435_v52 = vpop.f32.mrb[8].mxu1  ;;  %v1506_v22 = vpop.f32.mrb[16].mxu0 }
 0x6a2   :  { %v5384_v26 = vadd.f32 %v1435_v52, %v6218_v12  ;;  %v1437_v30 = vpop.f32.mrb[9].mxu1  ;;  %v1508_v27 = vpop.f32.mrb[17].mxu0  ;;  %v5400_v53 = vadd.f32 %v1506_v22, %v6235_v39 }
 0x6a3   :  { %v5385_v38 = vadd.f32 %v1437_v30, %v6222_v13  ;;  %v5401_v47 = vadd.f32 %v1508_v27, %v6229_v34 }
 0x6a4   :  { %v4009_v10 = vmul.f32 -1.442695, %v5384_v26 }
 0x6a5   :  { %v4010_v46 = vmul.f32 -1.442695, %v5385_v38  ;;  %v4011_v45 = vmul.f32 -1.442695, %v5401_v47 }
 0x6a6   :  { %5584 = vpow2.f32 %v4009_v10 }
 0x6a7   :  { %5586 = vpow2.f32 %v4010_v46 }
 0x6a8   :  { %5588 = vpow2.f32 %v4011_v45 }
 0x6a9   :  { %5590 = vtanh.f32 %v5400_v53 }
 0x6b0   :  { %v5585_v31 = vpop.eup %5584 }
 0x6b1   :  { %v5587_v61 = vpop.eup %5586  ;;  %v1521_v62 = vadd.f32 1.0, %v5585_v31 }
 0x6b2   :  { %v1522_v2 = vadd.f32 1.0, %v5587_v61  ;;  %v5589_v55 = vpop.eup %5588 }
 0x6b3   :  { %5592 = vrcp.f32 %v1521_v62  ;;  %v5591_v19 = vpop.eup %5590  ;;  %v1531_v38 = vadd.f32 1.0, %v5589_v55 }
 0x6b4   :  { %5594 = vrcp.f32 %v1522_v2 }
 0x6b5   :  { %5596 = vrcp.f32 %v1531_v38 }
 0x6bd   :  { %v5593_v52 = vpop.eup %5592 }
 0x6be   :  { %v5595_v26 = vpop.eup %5594  ;;  %v1535_v30 = vmul.f32 %v5593_v52, %v5591_v19 }
 0x6bf   :  { %v1534_v10 = vmul.f32 %v5595_v26, %v6376_v63  ;;  %v5597_v22 = vpop.eup %5596 }
 0x6c1   :  { %v6422_v27 = vadd.f32 %v1535_v30, %v1534_v10 }
 0x6c3   :  { %5598 = vtanh.f32 %v6422_v27 }
 0x6cd   :  { %v5599_v46 = vpop.eup %5598 }
 0x6ce   :  { %v6425_v47 = vmul.f32 %v5599_v46, %v5597_v22 }
 0x6d0   :  { %1608 = vmatmul.mubr.f32.vlgmr.msra.gmra.mrb[10].mxu1 %v6425_v47  ;;  %1679 = vmatmul.mubr.f32.vlgmr.msra.gmra.mrb[18].mxu0 %v6425_v47 }
 0x6d1   :  { %4651 = vmatpush1.bf16.msra.mxu1 %v6052_v28  ;;  %4683 = vmatpush1.bf16.msra.mxu0 %v6054_v29 }
 0x6d2   :  { %4653 = vmatprep.subr.bf16.mxu1 %v6056_v36  ;;  %4685 = vmatprep.subr.bf16.mxu0 %v6058_v37 }
 0x6d3   :  { %1781 = vmatprep.mubr.f32.mxu1 %v5908_v17  ;;  %1852 = vmatprep.mubr.f32.mxu0 %v5908_v17 }
 0x6d5   :  { %4655 = vmatpush1.bf16.msra.mxu1 %v6062_v42  ;;  %4687 = vmatpush1.bf16.msra.mxu0 %v6064_v43 }
 0x6d6   :  { %4657 = vmatprep.subr.bf16.mxu1 %v6070_v50  ;;  %4689 = vmatprep.subr.bf16.mxu0 %v6072_v51 }
 0x6d9   :  { %4659 = vmatpush1.bf16.msra.mxu1 %v6076_v56  ;;  %4691 = vmatpush1.bf16.msra.mxu0 %v6078_v57 }
 0x6da   :  { %4661 = vmatprep.subr.bf16.mxu1 %v6086_v0  ;;  %4693 = vmatprep.subr.bf16.mxu0 %v6088_v1 }
 0x6dd   :  { %4663 = vmatpush1.bf16.msra.mxu1 %v6092_v6  ;;  %4695 = vmatpush1.bf16.msra.mxu0 %v6094_v7 }
 0x6de   :  { %4665 = vmatprep.subr.bf16.mxu1 %v6104_v14  ;;  %4697 = vmatprep.subr.bf16.mxu0 %v6106_v16 }
 0x6e1   :  { %4667 = vmatpush1.bf16.msra.mxu1 %v6110_v24  ;;  %4699 = vmatpush1.bf16.msra.mxu0 %v6112_v25 }
 0x6e2   :  { %4669 = vmatprep.subr.bf16.mxu1 %v6118_v32  ;;  %4701 = vmatprep.subr.bf16.mxu0 %v6120_v33 }
 0x6e5   :  { %4671 = vmatpush1.bf16.msra.mxu1 %v6124_v40  ;;  %4703 = vmatpush1.bf16.msra.mxu0 %v6126_v41 }
 0x6e6   :  { %4673 = vmatprep.subr.bf16.mxu1 %v6132_v48  ;;  %4705 = vmatprep.subr.bf16.mxu0 %v6134_v49 }
 0x6e9   :  { %4675 = vmatpush1.bf16.msra.mxu1 %v6140_v58  ;;  %4707 = vmatpush1.bf16.msra.mxu0 %v6142_v60 }
 0x6ea   :  { %4677 = vmatprep.subr.bf16.mxu1 %v6148_v59  ;;  %4709 = vmatprep.subr.bf16.mxu0 %v6150_v3 }
 0x6ed   :  { %4679 = vmatpush1.bf16.msra.mxu1 %v6156_v4  ;;  %4711 = vmatpush1.bf16.msra.mxu0 %v6158_v5 }
 0x6ee   :  { %4713 = vmatprep.subr.bf16.mxu1 %v6044_v15  ;;  %4745 = vmatprep.subr.bf16.mxu0 %v6048_v18 }
 0x7a3   :  { %v1609_v63 = vpop.f32.mrb[10].mxu1  ;;  %v1680_v45 = vpop.f32.mrb[18].mxu0 }
 0x7a4   :  { %v5386_v53 = vadd.f32 %v1609_v63, %v6218_v12  ;;  %v1611_v31 = vpop.f32.mrb[11].mxu1  ;;  %v1682_v61 = vpop.f32.mrb[19].mxu0  ;;  %v5402_v26 = vadd.f32 %v1680_v45, %v6235_v39 }
 0x7a5   :  { %v5387_v62 = vadd.f32 %v1611_v31, %v6222_v13  ;;  %v5403_v19 = vadd.f32 %v1682_v61, %v6229_v34 }
 0x7a6   :  { %v4012_v2 = vmul.f32 -1.442695, %v5386_v53 }
 0x7a7   :  { %v4013_v55 = vmul.f32 -1.442695, %v5387_v62  ;;  %v4014_v52 = vmul.f32 -1.442695, %v5403_v19  ;;  %v2129_v19 = vld [vmem:[#allocation6 + $0x210] sm:$0xff] }
 0x7a8   :  { %5600 = vpow2.f32 %v4012_v2 }
 0x7a9   :  { %5602 = vpow2.f32 %v4013_v55 }
 0x7aa   :  { %5604 = vpow2.f32 %v4014_v52  ;;  %v2133_v52 = vld [vmem:[#allocation6 + $0x230] sm:$0xff] }
 0x7ab   :  { %5606 = vtanh.f32 %v5402_v26  ;;  %v2136_v26 = vld [vmem:[#allocation6 + $0x248] sm:$0xff] }
 0x7b2   :  { %v5601_v15 = vpop.eup %5600 }
 0x7b3   :  { %v5603_v30 = vpop.eup %5602  ;;  %v1695_v18 = vadd.f32 1.0, %v5601_v15  ;;  %v2140_v15 = vld [vmem:[#allocation6 + $0x268] sm:$0xff] }
 0x7b4   :  { %v1696_v38 = vadd.f32 1.0, %v5603_v30  ;;  %v5605_v10 = vpop.eup %5604  ;;  %v2138_v30 = vld [vmem:[#allocation6 + $0x258] sm:$0xff] }
 0x7b5   :  { %5608 = vrcp.f32 %v1695_v18  ;;  %v5607_v22 = vpop.eup %5606  ;;  %v1705_v31 = vadd.f32 1.0, %v5605_v10  ;;  %v2142_v18 = vld [vmem:[#allocation6 + $0x278] sm:$0xff] }
 0x7b6   :  { %5610 = vrcp.f32 %v1696_v38 }
 0x7b7   :  { %5612 = vrcp.f32 %v1705_v31 }
 0x7bf   :  { %v5609_v46 = vpop.eup %5608 }
 0x7c0   :  { %v5611_v63 = vpop.eup %5610  ;;  %v1709_v53 = vmul.f32 %v5609_v46, %v5607_v22  ;;  %v4810_v46 = vpack.c.bf16 %v2133_v52, %v2129_v19  ;;  %v2159_v19 = vld [vmem:[#allocation6 + $0x300] sm:$0xff] }
 0x7c1   :  { %v1708_v62 = vmul.f32 %v5611_v63, %v6422_v27  ;;  %v5613_v45 = vpop.eup %5612  ;;  %v2131_v27 = vld [vmem:[#allocation6 + $0x220] sm:$0xff] }
 0x7c2   :  { %v2135_v63 = vld [vmem:[#allocation6 + $0x240] sm:$0xff] }
 0x7c3   :  { %v6468_v61 = vadd.f32 %v1709_v53, %v1708_v62  ;;  %v2139_v53 = vld [vmem:[#allocation6 + $0x260] sm:$0xff]  ;;  %v4780_v62 = vpack.c.bf16 %v2140_v15, %v2136_v26 }
 0x7c4   :  { %v2163_v52 = vld [vmem:[#allocation6 + $0x320] sm:$0xff] }
 0x7c5   :  { %5614 = vtanh.f32 %v6468_v61 }
 0x7cf   :  { %v5615_v2 = vpop.eup %5614 }
 0x7d0   :  { %v6471_v55 = vmul.f32 %v5615_v2, %v5613_v45  ;;  %v2137_v45 = vld [vmem:[#allocation6 + $0x250] sm:$0xff] }
 0x7d1   :  { %v2141_v2 = vld [vmem:[#allocation6 + $0x270] sm:$0xff] }
 0x7d2   :  { %1782 = vmatmul.mubr.f32.vlgmr.msra.gmra.mrb[12].mxu1 %v6471_v55  ;;  %1853 = vmatmul.mubr.f32.vlgmr.msra.gmra.mrb[20].mxu0 %v6471_v55 }
 0x7d3   :  { %4715 = vmatpush1.bf16.msra.mxu1 %v6052_v28  ;;  %4747 = vmatpush1.bf16.msra.mxu0 %v6054_v29  ;;  %v2128_v28 = vld [vmem:[#allocation6 + $0x208] sm:$0xff] }
 0x7d4   :  { %4717 = vmatprep.subr.bf16.mxu1 %v6056_v36  ;;  %4749 = vmatprep.subr.bf16.mxu0 %v6058_v37  ;;  %v2132_v29 = vld [vmem:[#allocation6 + $0x228] sm:$0xff]  ;;  %v2130_v36 = vld [vmem:[#allocation6 + $0x218] sm:$0xff] }
 0x7d5   :  { %1955 = vmatprep.mubr.f32.mxu1 %v5908_v17  ;;  %2026 = vmatprep.mubr.f32.mxu0 %v5908_v17  ;;  %v4776_v37 = vpack.c.bf16 %v2132_v29, %v2128_v28  ;;  %v2144_v28 = vld [vmem:[#allocation6 + $0x288] sm:$0xff] }
 0x7d6   :  { %v2148_v29 = vld [vmem:[#allocation6 + $0x2a8] sm:$0xff] }
 0x7d7   :  { %4719 = vmatpush1.bf16.msra.mxu1 %v6062_v42  ;;  %4751 = vmatpush1.bf16.msra.mxu0 %v6064_v43  ;;  %v2134_v42 = vld [vmem:[#allocation6 + $0x238] sm:$0xff] }
 0x7d8   :  { %4721 = vmatprep.subr.bf16.mxu1 %v6070_v50  ;;  %4753 = vmatprep.subr.bf16.mxu0 %v6072_v51  ;;  %v4808_v43 = vpack.c.bf16 %v2134_v42, %v2130_v36  ;;  %v2146_v36 = vld [vmem:[#allocation6 + $0x298] sm:$0xff]  ;;  %v4782_v42 = vpack.c.bf16 %v2139_v53, %v2135_v63  ;;  %v4794_v63 = vpack.c.bf16 %v2163_v52, %v2159_v19  ;;  %v2064_v52 = vld [vmem:[#allocation8 + $0x210] sm:$0xff] }
 0x7db   :  { %4723 = vmatpush1.bf16.msra.mxu1 %v6076_v56  ;;  %4755 = vmatpush1.bf16.msra.mxu0 %v6078_v57 }
 0x7dc   :  { %4725 = vmatprep.subr.bf16.mxu1 %v6086_v0  ;;  %4757 = vmatprep.subr.bf16.mxu0 %v6088_v1 }
 0x7df   :  { %4727 = vmatpush1.bf16.msra.mxu1 %v6092_v6  ;;  %4759 = vmatpush1.bf16.msra.mxu0 %v6094_v7 }
 0x7e0   :  { %4729 = vmatprep.subr.bf16.mxu1 %v6104_v14  ;;  %4761 = vmatprep.subr.bf16.mxu0 %v6106_v16 }
 0x7e3   :  { %4731 = vmatpush1.bf16.msra.mxu1 %v6110_v24  ;;  %4763 = vmatpush1.bf16.msra.mxu0 %v6112_v25 }
 0x7e4   :  { %4733 = vmatprep.subr.bf16.mxu1 %v6118_v32  ;;  %4765 = vmatprep.subr.bf16.mxu0 %v6120_v33 }
 0x7e7   :  { %4735 = vmatpush1.bf16.msra.mxu1 %v6124_v40  ;;  %4767 = vmatpush1.bf16.msra.mxu0 %v6126_v41 }
 0x7e8   :  { %4737 = vmatprep.subr.bf16.mxu1 %v6132_v48  ;;  %4769 = vmatprep.subr.bf16.mxu0 %v6134_v49 }
 0x7eb   :  { %4739 = vmatpush1.bf16.msra.mxu1 %v6140_v58  ;;  %4771 = vmatpush1.bf16.msra.mxu0 %v6142_v60 }
 0x7ec   :  { %4741 = vmatprep.subr.bf16.mxu1 %v6148_v59  ;;  %4773 = vmatprep.subr.bf16.mxu0 %v6150_v3 }
 0x7ef   :  { %4743 = vmatpush1.bf16.msra.mxu1 %v6156_v4  ;;  %4775 = vmatpush1.bf16.msra.mxu0 %v6158_v5  ;;  %v2127_v5 = vld [vmem:[#allocation6 + $0x200] sm:$0xff] }
 0x7f0   :  { %4777 = vmatprep.subr.bf16.mxu1 %v4776_v37  ;;  %4809 = vmatprep.subr.bf16.mxu0 %v4808_v43  ;;  %v4778_v22 = vpack.c.bf16 %v2131_v27, %v2127_v5  ;;  %v2150_v37 = vld [vmem:[#allocation6 + $0x2b8] sm:$0xff]  ;;  %v4814_v43 = vpack.c.bf16 %v2141_v2, %v2137_v45 }
 0x8a5   :  { %v1783_v50 = vpop.f32.mrb[12].mxu1  ;;  %v1854_v51 = vpop.f32.mrb[20].mxu0 }
 0x8a6   :  { %v5388_v56 = vadd.f32 %v1783_v50, %v6218_v12  ;;  %v1785_v57 = vpop.f32.mrb[13].mxu1  ;;  %v1856_v0 = vpop.f32.mrb[21].mxu0  ;;  %v5404_v24 = vadd.f32 %v1854_v51, %v6235_v39  ;;  %v2143_v50 = vld [vmem:[#allocation6 + $0x280] sm:$0xff] }
 0x8a7   :  { %v5389_v1 = vadd.f32 %v1785_v57, %v6222_v13  ;;  %v5405_v14 = vadd.f32 %v1856_v0, %v6229_v34  ;;  %v2147_v51 = vld [vmem:[#allocation6 + $0x2a0] sm:$0xff]  ;;  %v4816_v57 = vpack.c.bf16 %v2150_v37, %v2146_v36  ;;  %v2145_v0 = vld [vmem:[#allocation6 + $0x290] sm:$0xff]  ;;  %v2176_v36 = vld [vmem:[#allocation6 + $0x388] sm:$0xff] }
 0x8a8   :  { %v4015_v6 = vmul.f32 -1.442695, %v5388_v56  ;;  %v4784_v56 = vpack.c.bf16 %v2148_v29, %v2144_v28  ;;  %v2169_v28 = vld [vmem:[#allocation6 + $0x350] sm:$0xff]  ;;  %v2180_v37 = vld [vmem:[#allocation6 + $0x3a8] sm:$0xff] }
 0x8a9   :  { %v4016_v7 = vmul.f32 -1.442695, %v5389_v1  ;;  %v4017_v16 = vmul.f32 -1.442695, %v5405_v14  ;;  %v2149_v1 = vld [vmem:[#allocation6 + $0x2b0] sm:$0xff]  ;;  %v2154_v14 = vld [vmem:[#allocation6 + $0x2d8] sm:$0xff] }
 0x8aa   :  { %5616 = vpow2.f32 %v4015_v6  ;;  %v2152_v6 = vld [vmem:[#allocation6 + $0x2c8] sm:$0xff]  ;;  %v2173_v29 = vld [vmem:[#allocation6 + $0x370] sm:$0xff] }
 0x8ab   :  { %5618 = vpow2.f32 %v4016_v7  ;;  %v2156_v7 = vld [vmem:[#allocation6 + $0x2e8] sm:$0xff] }
 0x8ac   :  { %5620 = vpow2.f32 %v4017_v16  ;;  %v2158_v16 = vld [vmem:[#allocation6 + $0x2f8] sm:$0xff] }
 0x8ad   :  { %5622 = vtanh.f32 %v5404_v24  ;;  %v4786_v24 = vpack.c.bf16 %v2147_v51, %v2143_v50  ;;  %v4830_v51 = vpack.c.bf16 %v2173_v29, %v2169_v28  ;;  %v2083_v28 = vld [vmem:[#allocation8 + $0x2a8] sm:$0xff]  ;;  %v2081_v29 = vld [vmem:[#allocation8 + $0x298] sm:$0xff] }
 0x8b4   :  { %v5617_v25 = vpop.eup %5616 }
 0x8b5   :  { %v5619_v32 = vpop.eup %5618  ;;  %v1869_v33 = vadd.f32 1.0, %v5617_v25  ;;  %v4818_v25 = vpack.c.bf16 %v2149_v1, %v2145_v0  ;;  %v4800_v0 = vpack.c.bf16 %v2180_v37, %v2176_v36  ;;  %v2078_v37 = vld [vmem:[#allocation8 + $0x280] sm:$0xff] }
 0x8b6   :  { %v1870_v40 = vadd.f32 1.0, %v5619_v32  ;;  %v5621_v41 = vpop.eup %5620  ;;  %v2151_v32 = vld [vmem:[#allocation6 + $0x2c0] sm:$0xff] }
 0x8b7   :  { %5624 = vrcp.f32 %v1869_v33  ;;  %v5623_v48 = vpop.eup %5622  ;;  %v1879_v59 = vadd.f32 1.0, %v5621_v41  ;;  %v2155_v33 = vld [vmem:[#allocation6 + $0x2e0] sm:$0xff]  ;;  %v4820_v41 = vpack.c.bf16 %v2158_v16, %v2154_v14  ;;  %v2184_v14 = vld [vmem:[#allocation6 + $0x3c8] sm:$0xff] }
 0x8b8   :  { %5626 = vrcp.f32 %v1870_v40  ;;  %v4788_v40 = vpack.c.bf16 %v2156_v7, %v2152_v6  ;;  %v4790_v5 = vpack.c.bf16 %v2155_v33, %v2151_v32  ;;  %v2177_v6 = vld [vmem:[#allocation6 + $0x390] sm:$0xff]  ;;  %v2188_v16 = vld [vmem:[#allocation6 + $0x3e8] sm:$0xff] }
 0x8b9   :  { %5628 = vrcp.f32 %v1879_v59  ;;  %v2162_v59 = vld [vmem:[#allocation6 + $0x318] sm:$0xff]  ;;  %v2181_v7 = vld [vmem:[#allocation6 + $0x3b0] sm:$0xff] }
 0x8ba   :  { %v4834_v33 = vpack.c.bf16 %v2181_v7, %v2177_v6  ;;  %v2091_v6 = vld [vmem:[#allocation8 + $0x2e8] sm:$0xff]  ;;  %v2089_v7 = vld [vmem:[#allocation8 + $0x2d8] sm:$0xff] }
 0x8c1   :  { %v5625_v49 = vpop.eup %5624 }
 0x8c2   :  { %v5627_v58 = vpop.eup %5626  ;;  %v1883_v60 = vmul.f32 %v5625_v49, %v5623_v48  ;;  %v2153_v48 = vld [vmem:[#allocation6 + $0x2d0] sm:$0xff] }
 0x8c3   :  { %v1882_v3 = vmul.f32 %v5627_v58, %v6468_v61  ;;  %v5629_v38 = vpop.eup %5628  ;;  %v4812_v61 = vpack.c.bf16 %v2142_v18, %v2138_v30  ;;  %v2157_v49 = vld [vmem:[#allocation6 + $0x2f0] sm:$0xff]  ;;  %v2160_v58 = vld [vmem:[#allocation6 + $0x308] sm:$0xff] }
 0x8c4   :  { %v4822_v27 = vpack.c.bf16 %v2157_v49, %v2153_v48  ;;  %v2161_v30 = vld [vmem:[#allocation6 + $0x310] sm:$0xff]  ;;  %v2187_v49 = vld [vmem:[#allocation6 + $0x3e0] sm:$0xff] }
 0x8c5   :  { %v6512_v4 = vadd.f32 %v1883_v60, %v1882_v3  ;;  %v2164_v60 = vld [vmem:[#allocation6 + $0x328] sm:$0xff]  ;;  %v2166_v3 = vld [vmem:[#allocation6 + $0x338] sm:$0xff]  ;;  %v2165_v18 = vld [vmem:[#allocation6 + $0x330] sm:$0xff] }
 0x8c6   :  { %v4792_v26 = vpack.c.bf16 %v2164_v60, %v2160_v58  ;;  %v4824_v15 = vpack.c.bf16 %v2166_v3, %v2162_v59  ;;  %v4826_v53 = vpack.c.bf16 %v2165_v18, %v2161_v30  ;;  %v2185_v58 = vld [vmem:[#allocation6 + $0x3d0] sm:$0xff]  ;;  %v2075_v30 = vld [vmem:[#allocation8 + $0x268] sm:$0xff]  ;;  %v2073_v18 = vld [vmem:[#allocation8 + $0x258] sm:$0xff] }
 0x8c7   :  { %5630 = vtanh.f32 %v6512_v4  ;;  %v2189_v60 = vld [vmem:[#allocation6 + $0x3f0] sm:$0xff] }
 0x8c8   :  { %v4838_v3 = vpack.c.bf16 %v2189_v60, %v2185_v58  ;;  %v2099_v58 = vld [vmem:[#allocation8 + $0x328] sm:$0xff]  ;;  %v2094_v60 = vld [vmem:[#allocation8 + $0x300] sm:$0xff] }
 0x8d1   :  { %v5631_v10 = vpop.eup %5630 }
 0x8d2   :  { %v6515_v31 = vmul.f32 %v5631_v10, %v5629_v38  ;;  %v2168_v38 = vld [vmem:[#allocation6 + $0x348] sm:$0xff] }
 0x8d3   :  { %v2172_v10 = vld [vmem:[#allocation6 + $0x368] sm:$0xff] }
 0x8d4   :  { %1956 = vmatmul.mubr.f32.vlgmr.msra.gmra.mrb[14].mxu1 %v6515_v31  ;;  %2027 = vmatmul.mubr.f32.vlgmr.msra.gmra.mrb[22].mxu0 %v6515_v31  ;;  %v4796_v45 = vpack.c.bf16 %v2172_v10, %v2168_v38  ;;  %v2070_v10 = vld [vmem:[#allocation8 + $0x240] sm:$0xff] }
 0x8d5   :  { %4779 = vmatpush1.bf16.msra.mxu1 %v4778_v22  ;;  %4811 = vmatpush1.bf16.msra.mxu0 %v4810_v46  ;;  %v2170_v22 = vld [vmem:[#allocation6 + $0x358] sm:$0xff] }
 0x8d6   :  { %4781 = vmatprep.subr.bf16.mxu1 %v4780_v62  ;;  %4813 = vmatprep.subr.bf16.mxu0 %v4812_v61  ;;  %v2174_v46 = vld [vmem:[#allocation6 + $0x378] sm:$0xff]  ;;  %v2167_v62 = vld [vmem:[#allocation6 + $0x340] sm:$0xff] }
 0x8d7   :  { %2278 = vmatprep.mubr.f32.mxu1 %v5908_v17  ;;  %2391 = vmatprep.mubr.f32.mxu0 %v5908_v17  ;;  %v2171_v61 = vld [vmem:[#allocation6 + $0x360] sm:$0xff]  ;;  %v4828_v2 = vpack.c.bf16 %v2174_v46, %v2170_v22  ;;  %v2077_v46 = vld [vmem:[#allocation8 + $0x278] sm:$0xff] }
 0x8d8   :  { %v4798_v50 = vpack.c.bf16 %v2171_v61, %v2167_v62  ;;  %v2074_v22 = vld [vmem:[#allocation8 + $0x260] sm:$0xff]  ;;  %v2072_v62 = vld [vmem:[#allocation8 + $0x250] sm:$0xff] }
 0x8d9   :  { %4783 = vmatpush1.bf16.msra.mxu1 %v4782_v42  ;;  %4815 = vmatpush1.bf16.msra.mxu0 %v4814_v43  ;;  %v2178_v42 = vld [vmem:[#allocation6 + $0x398] sm:$0xff]  ;;  %v2076_v61 = vld [vmem:[#allocation8 + $0x270] sm:$0xff] }
 0x8da   :  { %4785 = vmatprep.subr.bf16.mxu1 %v4784_v56  ;;  %4817 = vmatprep.subr.bf16.mxu0 %v4816_v57  ;;  %v2182_v43 = vld [vmem:[#allocation6 + $0x3b8] sm:$0xff]  ;;  %v2175_v56 = vld [vmem:[#allocation6 + $0x380] sm:$0xff] }
 0x8db   :  { %v2179_v57 = vld [vmem:[#allocation6 + $0x3a0] sm:$0xff]  ;;  %v4832_v1 = vpack.c.bf16 %v2182_v43, %v2178_v42  ;;  %v2085_v43 = vld [vmem:[#allocation8 + $0x2b8] sm:$0xff] }
 0x8dc   :  { %v4802_v32 = vpack.c.bf16 %v2179_v57, %v2175_v56  ;;  %v2082_v42 = vld [vmem:[#allocation8 + $0x2a0] sm:$0xff]  ;;  %v2080_v56 = vld [vmem:[#allocation8 + $0x290] sm:$0xff] }
 0x8dd   :  { %4787 = vmatpush1.bf16.msra.mxu1 %v4786_v24  ;;  %4819 = vmatpush1.bf16.msra.mxu0 %v4818_v25  ;;  %v2186_v24 = vld [vmem:[#allocation6 + $0x3d8] sm:$0xff]  ;;  %v2084_v57 = vld [vmem:[#allocation8 + $0x2b0] sm:$0xff] }
 0x8de   :  { %4789 = vmatprep.subr.bf16.mxu1 %v4788_v40  ;;  %4821 = vmatprep.subr.bf16.mxu0 %v4820_v41  ;;  %v2190_v25 = vld [vmem:[#allocation6 + $0x3f8] sm:$0xff]  ;;  %v2183_v40 = vld [vmem:[#allocation6 + $0x3c0] sm:$0xff]  ;;  %v4804_v41 = vpack.c.bf16 %v2188_v16, %v2184_v14 }
 0x8df   :  { %v4836_v48 = vpack.c.bf16 %v2190_v25, %v2186_v24  ;;  %v4806_v59 = vpack.c.bf16 %v2187_v49, %v2183_v40  ;;  %v2086_v16 = vld [vmem:[#allocation8 + $0x2c0] sm:$0xff]  ;;  %v2093_v25 = vld [vmem:[#allocation8 + $0x2f8] sm:$0xff]  ;;  %v2088_v40 = vld [vmem:[#allocation8 + $0x2d0] sm:$0xff] }
 0x8e0   :  { %v2090_v24 = vld [vmem:[#allocation8 + $0x2e0] sm:$0xff] }
 0x8e1   :  { %4791 = vmatpush1.bf16.msra.mxu1 %v4790_v5  ;;  %4823 = vmatpush1.bf16.msra.mxu0 %v4822_v27  ;;  %v2066_v5 = vld [vmem:[#allocation8 + $0x220] sm:$0xff] }
 0x8e2   :  { %4793 = vmatprep.subr.bf16.mxu1 %v4792_v26  ;;  %4825 = vmatprep.subr.bf16.mxu0 %v4824_v15  ;;  %v2068_v26 = vld [vmem:[#allocation8 + $0x230] sm:$0xff]  ;;  %v2071_v15 = vld [vmem:[#allocation8 + $0x248] sm:$0xff] }
 0x8e3   :  { %v6561_v38 = vpack.c.bf16 %v2075_v30, %v2071_v15 }
 0x8e5   :  { %4795 = vmatpush1.bf16.msra.mxu1 %v4794_v63  ;;  %4827 = vmatpush1.bf16.msra.mxu0 %v4826_v53  ;;  %v6563_v63 = vpack.c.bf16 %v2074_v22, %v2070_v10  ;;  %v6565_v53 = vpack.c.bf16 %v2077_v46, %v2073_v18  ;;  %v2102_v18 = vld [vmem:[#allocation8 + $0x340] sm:$0xff]  ;;  %v2105_v22 = vld [vmem:[#allocation8 + $0x358] sm:$0xff] }
 0x8e6   :  { %4797 = vmatprep.subr.bf16.mxu1 %v4796_v45  ;;  %4829 = vmatprep.subr.bf16.mxu0 %v4828_v2  ;;  %v6568_v45 = vpack.c.bf16 %v2076_v61, %v2072_v62  ;;  %v2079_v2 = vld [vmem:[#allocation8 + $0x288] sm:$0xff]  ;;  %v2106_v10 = vld [vmem:[#allocation8 + $0x360] sm:$0xff]  ;;  %v2109_v46 = vld [vmem:[#allocation8 + $0x378] sm:$0xff] }
 0x8e7   :  { %v6573_v36 = vpack.c.bf16 %v2083_v28, %v2079_v2  ;;  %v2104_v62 = vld [vmem:[#allocation8 + $0x350] sm:$0xff]  ;;  %v6610_v2 = vpack.c.bf16 %v2106_v10, %v2102_v18  ;;  %v6612_v28 = vpack.c.bf16 %v2109_v46, %v2105_v22 }
 0x8e8   :  { %v2108_v61 = vld [vmem:[#allocation8 + $0x370] sm:$0xff] }
 0x8e9   :  { %4799 = vmatpush1.bf16.msra.mxu1 %v4798_v50  ;;  %4831 = vmatpush1.bf16.msra.mxu0 %v4830_v51  ;;  %v6575_v50 = vpack.c.bf16 %v2082_v42, %v2078_v37  ;;  %v6577_v51 = vpack.c.bf16 %v2085_v43, %v2081_v29  ;;  %v2111_v29 = vld [vmem:[#allocation8 + $0x388] sm:$0xff]  ;;  %v2110_v42 = vld [vmem:[#allocation8 + $0x380] sm:$0xff]  ;;  %v6616_v43 = vpack.c.bf16 %v2108_v61, %v2104_v62 }
 0x8ea   :  { %4801 = vmatprep.subr.bf16.mxu1 %v4800_v0  ;;  %4833 = vmatprep.subr.bf16.mxu0 %v4832_v1  ;;  %v6580_v0 = vpack.c.bf16 %v2084_v57, %v2080_v56  ;;  %v2087_v1 = vld [vmem:[#allocation8 + $0x2c8] sm:$0xff]  ;;  %v2114_v57 = vld [vmem:[#allocation8 + $0x3a0] sm:$0xff] }
 0x8eb   :  { %v6585_v14 = vpack.c.bf16 %v2091_v6, %v2087_v1  ;;  %v2115_v37 = vld [vmem:[#allocation8 + $0x3a8] sm:$0xff]  ;;  %v2113_v1 = vld [vmem:[#allocation8 + $0x398] sm:$0xff] }
 0x8ec   :  { %v6618_v56 = vpack.c.bf16 %v2115_v37, %v2111_v29  ;;  %v2117_v6 = vld [vmem:[#allocation8 + $0x3b8] sm:$0xff] }
 0x8ed   :  { %4803 = vmatpush1.bf16.msra.mxu1 %v4802_v32  ;;  %4835 = vmatpush1.bf16.msra.mxu0 %v4834_v33  ;;  %v6587_v32 = vpack.c.bf16 %v2090_v24, %v2086_v16  ;;  %v6589_v33 = vpack.c.bf16 %v2093_v25, %v2089_v7  ;;  %v6621_v7 = vpack.c.bf16 %v2117_v6, %v2113_v1  ;;  %v2112_v16 = vld [vmem:[#allocation8 + $0x390] sm:$0xff]  ;;  %v2119_v25 = vld [vmem:[#allocation8 + $0x3c8] sm:$0xff] }
 0x8ee   :  { %4805 = vmatprep.subr.bf16.mxu1 %v4804_v41  ;;  %4837 = vmatprep.subr.bf16.mxu0 %v4836_v48  ;;  %v2092_v41 = vld [vmem:[#allocation8 + $0x2f0] sm:$0xff]  ;;  %v2095_v48 = vld [vmem:[#allocation8 + $0x308] sm:$0xff] }
 0x8ef   :  { %v6592_v49 = vpack.c.bf16 %v2092_v41, %v2088_v40  ;;  %v2116_v24 = vld [vmem:[#allocation8 + $0x3b0] sm:$0xff]  ;;  %v2123_v40 = vld [vmem:[#allocation8 + $0x3e8] sm:$0xff]  ;;  %v6624_v41 = vpack.c.bf16 %v2114_v57, %v2110_v42 }
 0x8f1   :  { %4807 = vmatpush1.bf16.msra.mxu1 %v4806_v59  ;;  %4839 = vmatpush1.bf16.msra.mxu0 %v4838_v3  ;;  %v2098_v59 = vld [vmem:[#allocation8 + $0x320] sm:$0xff]  ;;  %v6596_v3 = vpack.c.bf16 %v2099_v58, %v2095_v48  ;;  %v6628_v48 = vpack.c.bf16 %v2116_v24, %v2112_v16  ;;  %v6630_v58 = vpack.c.bf16 %v2123_v40, %v2119_v25 }
 0x8f4   :  { %2279 = vmatmul.mubr.f32.vlgmr.msra.gmra.mrb[16].mxu1 %v6241_v23  ;;  %2392 = vmatmul.mubr.f32.vlgmr.msra.gmra.mrb[24].mxu0 %v6241_v23  ;;  %v2063_v23 = vld [vmem:[#allocation8 + $0x208] sm:$0xff] }
 0x8f5   :  { %2284 = vmatprep.mubr.f32.mxu1 %v5908_v17  ;;  %2397 = vmatprep.mubr.f32.mxu0 %v5908_v17 }
 0x8f8   :  { %2285 = vmatmul.mubr.f32.gmra.mrb[18].mxu1 %v6287_v44  ;;  %2398 = vmatmul.mubr.f32.gmra.mrb[26].mxu0 %v6287_v44  ;;  %v2067_v44 = vld [vmem:[#allocation8 + $0x228] sm:$0xff] }
 0x8f9   :  { %2290 = vmatprep.mubr.f32.mxu1 %v5908_v17  ;;  %2403 = vmatprep.mubr.f32.mxu0 %v5908_v17 }
 0x8fc   :  { %2291 = vmatmul.mubr.f32.gmra.mrb[20].mxu1 %v6333_v54  ;;  %2404 = vmatmul.mubr.f32.gmra.mrb[28].mxu0 %v6333_v54  ;;  %v2065_v54 = vld [vmem:[#allocation8 + $0x218] sm:$0xff] }
 0x8fd   :  { %2296 = vmatprep.mubr.f32.mxu1 %v5908_v17  ;;  %2409 = vmatprep.mubr.f32.mxu0 %v5908_v17 }
 0x900   :  { %2297 = vmatmul.mubr.f32.gmra.mrb[22].mxu1 %v6379_v21  ;;  %2410 = vmatmul.mubr.f32.gmra.mrb[30].mxu0 %v6379_v21  ;;  %v6549_v21 = vpack.c.bf16 %v2067_v44, %v2063_v23  ;;  %v6598_v23 = vpack.c.bf16 %v2098_v59, %v2094_v60  ;;  %v2097_v44 = vld [vmem:[#allocation8 + $0x318] sm:$0xff] }
 0x901   :  { %2302 = vmatprep.mubr.f32.mxu1 %v5908_v17  ;;  %2415 = vmatprep.mubr.f32.mxu0 %v5908_v17  ;;  %v2121_v60 = vld [vmem:[#allocation8 + $0x3d8] sm:$0xff] }
 0x902   :  { %4841 = vmatprep.subr.bf16.mxu1 %v6549_v21  ;;  %v2125_v59 = vld [vmem:[#allocation8 + $0x3f8] sm:$0xff] }
 0x904   :  { %2303 = vmatmul.mubr.f32.gmra.mrb[24].mxu1 %v6425_v47  ;;  %2416 = vmatmul.mubr.f32.gmra.mrb[32].mxu0 %v6425_v47  ;;  %v2062_v47 = vld [vmem:[#allocation8 + $0x200] sm:$0xff] }
 0x905   :  { %2308 = vmatprep.mubr.f32.mxu1 %v5908_v17  ;;  %2421 = vmatprep.mubr.f32.mxu0 %v5908_v17  ;;  %v6551_v27 = vpack.c.bf16 %v2066_v5, %v2062_v47  ;;  %v2096_v47 = vld [vmem:[#allocation8 + $0x310] sm:$0xff] }
 0x907   :  { %4843 = vmatpush1.bf16.msra.mxu1 %v6551_v27 }
 0x908   :  { %2309 = vmatmul.mubr.f32.gmra.mrb[26].mxu1 %v6471_v55  ;;  %2422 = vmatmul.mubr.f32.gmra.mrb[34].mxu0 %v6471_v55  ;;  %v2069_v55 = vld [vmem:[#allocation8 + $0x238] sm:$0xff] }
 0x909   :  { %2314 = vmatprep.mubr.f32.mxu1 %v5908_v17  ;;  %2427 = vmatprep.mubr.f32.mxu0 %v5908_v17  ;;  %v6553_v19 = vpack.c.bf16 %v2069_v55, %v2065_v54  ;;  %v2101_v54 = vld [vmem:[#allocation8 + $0x338] sm:$0xff]  ;;  %v2100_v55 = vld [vmem:[#allocation8 + $0x330] sm:$0xff] }
 0x90a   :  { %4845 = vmatprep.subr.bf16.mxu1 %v6561_v38  ;;  %v6601_v5 = vpack.c.bf16 %v2101_v54, %v2097_v44  ;;  %v6604_v15 = vpack.c.bf16 %v2100_v55, %v2096_v47  ;;  %v2118_v44 = vld [vmem:[#allocation8 + $0x3c0] sm:$0xff]  ;;  %v6636_v47 = vpack.c.bf16 %v2125_v59, %v2121_v60  ;;  %v2120_v55 = vld [vmem:[#allocation8 + $0x3d0] sm:$0xff] }
 0x90b   :  { %4873 = vmatprep.subr.bf16.mxu0 %v6553_v19  ;;  %4847 = vmatpush1.bf16.msra.mxu1 %v6563_v63  ;;  %v2122_v54 = vld [vmem:[#allocation8 + $0x3e0] sm:$0xff] }
 0x90c   :  { %2315 = vmatmul.mubr.f32.gmra.mrb[28].mxu1 %v6515_v31  ;;  %2428 = vmatmul.mubr.f32.gmra.mrb[36].mxu0 %v6515_v31  ;;  %v6556_v31 = vpack.c.bf16 %v2068_v26, %v2064_v52  ;;  %v2103_v52 = vld [vmem:[#allocation8 + $0x348] sm:$0xff] }
 0x90d   :  { %2320 = vmatprep.mubr.f32.mxu1 %v5908_v17  ;;  %2433 = vmatprep.mubr.f32.mxu0 %v5908_v17  ;;  %v2107_v26 = vld [vmem:[#allocation8 + $0x368] sm:$0xff] }
 0x90e   :  { %4875 = vmatpush1.bf16.msra.mxu0 %v6556_v31  ;;  %4849 = vmatprep.subr.bf16.mxu1 %v6573_v36  ;;  %v6606_v30 = vpack.c.bf16 %v2107_v26, %v2103_v52  ;;  %v6638_v52 = vpack.c.bf16 %v2122_v54, %v2118_v44  ;;  %v2124_v26 = vld [vmem:[#allocation8 + $0x3f0] sm:$0xff] }
 0x90f   :  { %4877 = vmatprep.subr.bf16.mxu0 %v6565_v53  ;;  %4851 = vmatpush1.bf16.msra.mxu1 %v6575_v50  ;;  %v6641_v18 = vpack.c.bf16 %v2124_v26, %v2120_v55 }
 0x910   :  { %4853 = vmatprep.subr.bf16.mxu1 %v6585_v14 }
 0x912   :  { %4879 = vmatpush1.bf16.msra.mxu0 %v6568_v45 }
 0x913   :  { %4881 = vmatprep.subr.bf16.mxu0 %v6577_v51  ;;  %4855 = vmatpush1.bf16.msra.mxu1 %v6587_v32 }
 0x914   :  { %4857 = vmatprep.subr.bf16.mxu1 %v6596_v3 }
 0x916   :  { %4883 = vmatpush1.bf16.msra.mxu0 %v6580_v0 }
 0x917   :  { %4885 = vmatprep.subr.bf16.mxu0 %v6589_v33  ;;  %4859 = vmatpush1.bf16.msra.mxu1 %v6598_v23 }
 0x918   :  { %4861 = vmatprep.subr.bf16.mxu1 %v6606_v30 }
 0x91a   :  { %4887 = vmatpush1.bf16.msra.mxu0 %v6592_v49 }
 0x91b   :  { %4889 = vmatprep.subr.bf16.mxu0 %v6601_v5  ;;  %4863 = vmatpush1.bf16.msra.mxu1 %v6610_v2 }
 0x91c   :  { %4865 = vmatprep.subr.bf16.mxu1 %v6618_v56 }
 0x91e   :  { %4891 = vmatpush1.bf16.msra.mxu0 %v6604_v15 }
 0x91f   :  { %4893 = vmatprep.subr.bf16.mxu0 %v6612_v28  ;;  %4867 = vmatpush1.bf16.msra.mxu1 %v6624_v41 }
 0x920   :  { %4869 = vmatprep.subr.bf16.mxu1 %v6630_v58 }
 0x922   :  { %4895 = vmatpush1.bf16.msra.mxu0 %v6616_v43 }
 0x923   :  { %4897 = vmatprep.subr.bf16.mxu0 %v6621_v7  ;;  %4871 = vmatpush1.bf16.msra.mxu1 %v6638_v52 }
 0x924   :  { %4905 = vmatprep.subr.bf16.mxu1 %v6549_v21 }
 0x926   :  { %4899 = vmatpush1.bf16.msra.mxu0 %v6628_v48 }
 0x927   :  { %4901 = vmatprep.subr.bf16.mxu0 %v6636_v47 }
 0x92a   :  { %4903 = vmatpush1.bf16.msra.mxu0 %v6641_v18 }
 0x92b   :  { %4937 = vmatprep.subr.bf16.mxu0 %v6553_v19 }
 0x9a7   :  { %v1957_v10 = vpop.f32.mrb[14].mxu1  ;;  %v2028_v22 = vpop.f32.mrb[22].mxu0 }
 0x9a8   :  { %v5390_v46 = vadd.f32 %v1957_v10, %v6218_v12  ;;  %v1959_v62 = vpop.f32.mrb[15].mxu1  ;;  %v2030_v61 = vpop.f32.mrb[23].mxu0  ;;  %v5406_v6 = vadd.f32 %v2028_v22, %v6235_v39 }
 0x9a9   :  { %v5391_v29 = vadd.f32 %v1959_v62, %v6222_v13  ;;  %v5407_v57 = vadd.f32 %v2030_v61, %v6229_v34 }
 0x9aa   :  { %v4018_v37 = vmul.f32 -1.442695, %v5390_v46 }
 0x9ab   :  { %v4019_v42 = vmul.f32 -1.442695, %v5391_v29  ;;  %v4020_v1 = vmul.f32 -1.442695, %v5407_v57 }
 0x9ac   :  { %5632 = vpow2.f32 %v4018_v37 }
 0x9ad   :  { %5634 = vpow2.f32 %v4019_v42 }
 0x9ae   :  { %5636 = vpow2.f32 %v4020_v1 }
 0x9af   :  { %5638 = vtanh.f32 %v5406_v6 }
 0x9b6   :  { %v5633_v16 = vpop.eup %5632 }
 0x9b7   :  { %v5635_v24 = vpop.eup %5634  ;;  %v2043_v25 = vadd.f32 1.0, %v5633_v16 }
 0x9b8   :  { %v2044_v40 = vadd.f32 1.0, %v5635_v24  ;;  %v5637_v12 = vpop.eup %5636 }
 0x9b9   :  { %5640 = vrcp.f32 %v2043_v25  ;;  %v5639_v60 = vpop.eup %5638  ;;  %v2053_v54 = vadd.f32 1.0, %v5637_v12 }
 0x9ba   :  { %5642 = vrcp.f32 %v2044_v40 }
 0x9bb   :  { %5644 = vrcp.f32 %v2053_v54 }
 0x9c3   :  { %v5641_v13 = vpop.eup %5640 }
 0x9c4   :  { %v5643_v59 = vpop.eup %5642  ;;  %v2057_v44 = vmul.f32 %v5641_v13, %v5639_v60 }
 0x9c5   :  { %v2056_v55 = vmul.f32 %v5643_v59, %v6512_v4  ;;  %v5645_v39 = vpop.eup %5644  ;;  %v4021_v4 = vld [vmem:[%s6991_s4 + $0x4] sm:$0xf] }
 0x9c6   :  { %v6695_v22 = vrot.slane %v4021_v4, %v393_v9  ;;  %v6699_v46 = vrot.slane %v4021_v4, %v397_v11  ;;  %v6705_v16 = vrot.slane %v4021_v4, %v405_v20  ;;  %v6710_v11 = vrot.slane %v4021_v4, %v401_v35 }
 0x9c7   :  { %v2058_v34 = vadd.f32 %v2057_v44, %v2056_v55 }
 0x9c9   :  { %5646 = vtanh.f32 %v2058_v34 }
 0x9d3   :  { %v5647_v26 = vpop.eup %5646 }
 0x9d4   :  { %v2060_v10 = vmul.f32 %v5647_v26, %v5645_v39 }
 0x9d6   :  { %2321 = vmatmul.mubr.f32.gmra.mrb[30].mxu1 %v2060_v10  ;;  %2434 = vmatmul.mubr.f32.gmra.mrb[38].mxu0 %v2060_v10 }
 0x9d7   :  { %2540 = vmatprep.mubr.f32.mxu1 %v5908_v17  ;;  %2611 = vmatprep.mubr.f32.mxu0 %v5908_v17 }
 0x9da   :  { %2541 = vmatmul.mubr.f32.vlgmr.msra.gmra.mrb[16].mxu1 %v5908_v17  ;;  %2612 = vmatmul.mubr.f32.vlgmr.msra.gmra.mrb[24].mxu0 %v5908_v17 }
 0x9db   :  { %4907 = vmatpush1.bf16.msra.mxu1 %v6551_v27  ;;  %4939 = vmatpush1.bf16.msra.mxu0 %v6556_v31 }
 0x9dc   :  { %4909 = vmatprep.subr.bf16.mxu1 %v6561_v38  ;;  %4941 = vmatprep.subr.bf16.mxu0 %v6565_v53 }
 0x9dd   :  { %2714 = vmatprep.mubr.f32.mxu1 %v5908_v17  ;;  %2785 = vmatprep.mubr.f32.mxu0 %v5908_v17 }
 0x9df   :  { %4911 = vmatpush1.bf16.msra.mxu1 %v6563_v63  ;;  %4943 = vmatpush1.bf16.msra.mxu0 %v6568_v45 }
 0x9e0   :  { %4913 = vmatprep.subr.bf16.mxu1 %v6573_v36  ;;  %4945 = vmatprep.subr.bf16.mxu0 %v6577_v51 }
 0x9e3   :  { %4915 = vmatpush1.bf16.msra.mxu1 %v6575_v50  ;;  %4947 = vmatpush1.bf16.msra.mxu0 %v6580_v0 }
 0x9e4   :  { %4917 = vmatprep.subr.bf16.mxu1 %v6585_v14  ;;  %4949 = vmatprep.subr.bf16.mxu0 %v6589_v33 }
 0x9e7   :  { %4919 = vmatpush1.bf16.msra.mxu1 %v6587_v32  ;;  %4951 = vmatpush1.bf16.msra.mxu0 %v6592_v49 }
 0x9e8   :  { %4921 = vmatprep.subr.bf16.mxu1 %v6596_v3  ;;  %4953 = vmatprep.subr.bf16.mxu0 %v6601_v5 }
 0x9eb   :  { %4923 = vmatpush1.bf16.msra.mxu1 %v6598_v23  ;;  %4955 = vmatpush1.bf16.msra.mxu0 %v6604_v15 }
 0x9ec   :  { %4925 = vmatprep.subr.bf16.mxu1 %v6606_v30  ;;  %4957 = vmatprep.subr.bf16.mxu0 %v6612_v28 }
 0x9ef   :  { %4927 = vmatpush1.bf16.msra.mxu1 %v6610_v2  ;;  %4959 = vmatpush1.bf16.msra.mxu0 %v6616_v43 }
 0x9f0   :  { %4929 = vmatprep.subr.bf16.mxu1 %v6618_v56  ;;  %4961 = vmatprep.subr.bf16.mxu0 %v6621_v7 }
 0x9f3   :  { %4931 = vmatpush1.bf16.msra.mxu1 %v6624_v41  ;;  %4963 = vmatpush1.bf16.msra.mxu0 %v6628_v48 }
 0x9f4   :  { %4933 = vmatprep.subr.bf16.mxu1 %v6630_v58  ;;  %4965 = vmatprep.subr.bf16.mxu0 %v6636_v47 }
 0x9f7   :  { %4935 = vmatpush1.bf16.msra.mxu1 %v6638_v52  ;;  %4967 = vmatpush1.bf16.msra.mxu0 %v6641_v18 }
 0x9f8   :  { %4969 = vmatprep.subr.bf16.mxu1 %v6549_v21  ;;  %5001 = vmatprep.subr.bf16.mxu0 %v6553_v19 }
 0xaad   :  { %v2542_v62 = vpop.f32.mrb[16].mxu1  ;;  %v2613_v61 = vpop.f32.mrb[24].mxu0 }
 0xaae   :  { %v5408_v29 = vadd.f32 %v2542_v62, %v6695_v22  ;;  %v2544_v37 = vpop.f32.mrb[17].mxu1  ;;  %v2615_v42 = vpop.f32.mrb[25].mxu0  ;;  %v5424_v25 = vadd.f32 %v2613_v61, %v6710_v11 }
 0xaaf   :  { %v5409_v57 = vadd.f32 %v2544_v37, %v6699_v46  ;;  %v5425_v9 = vadd.f32 %v2615_v42, %v6705_v16 }
 0xab0   :  { %v4022_v1 = vmul.f32 -1.442695, %v5408_v29 }
 0xab1   :  { %v4023_v6 = vmul.f32 -1.442695, %v5409_v57  ;;  %v4024_v24 = vmul.f32 -1.442695, %v5425_v9 }
 0xab2   :  { %5648 = vpow2.f32 %v4022_v1 }
 0xab3   :  { %5650 = vpow2.f32 %v4023_v6 }
 0xab4   :  { %5652 = vpow2.f32 %v4024_v24 }
 0xab5   :  { %5654 = vtanh.f32 %v5424_v25 }
 0xabc   :  { %v5649_v40 = vpop.eup %5648 }
 0xabd   :  { %v5651_v12 = vpop.eup %5650  ;;  %v2628_v60 = vadd.f32 1.0, %v5649_v40 }
 0xabe   :  { %v2629_v13 = vadd.f32 1.0, %v5651_v12  ;;  %v5653_v20 = vpop.eup %5652 }
 0xabf   :  { %5656 = vrcp.f32 %v2628_v60  ;;  %v5655_v59 = vpop.eup %5654  ;;  %v2638_v34 = vadd.f32 1.0, %v5653_v20 }
 0xac0   :  { %5658 = vrcp.f32 %v2629_v13 }
 0xac1   :  { %5660 = vrcp.f32 %v2638_v34 }
 0xac9   :  { %v5657_v44 = vpop.eup %5656 }
 0xaca   :  { %v5659_v54 = vpop.eup %5658  ;;  %v2642_v55 = vmul.f32 %v5657_v44, %v5655_v59 }
 0xacb   :  { %v2641_v8 = vmul.f32 0.0, %v5659_v54  ;;  %v5661_v39 = vpop.eup %5660 }
 0xacd   :  { %v6713_v35 = vadd.f32 %v2642_v55, %v2641_v8 }
 0xacf   :  { %5662 = vtanh.f32 %v6713_v35 }
 0xad9   :  { %v5663_v26 = vpop.eup %5662 }
 0xada   :  { %v2645_v10 = vmul.f32 %v5663_v26, %v5661_v39 }
 0xadc   :  { %2715 = vmatmul.mubr.f32.vlgmr.msra.gmra.mrb[18].mxu1 %v2645_v10  ;;  %2786 = vmatmul.mubr.f32.vlgmr.msra.gmra.mrb[26].mxu0 %v2645_v10 }
 0xadd   :  { %4971 = vmatpush1.bf16.msra.mxu1 %v6551_v27  ;;  %5003 = vmatpush1.bf16.msra.mxu0 %v6556_v31 }
 0xade   :  { %4973 = vmatprep.subr.bf16.mxu1 %v6561_v38  ;;  %5005 = vmatprep.subr.bf16.mxu0 %v6565_v53 }
 0xadf   :  { %2888 = vmatprep.mubr.f32.mxu1 %v5908_v17  ;;  %2959 = vmatprep.mubr.f32.mxu0 %v5908_v17 }
 0xae1   :  { %4975 = vmatpush1.bf16.msra.mxu1 %v6563_v63  ;;  %5007 = vmatpush1.bf16.msra.mxu0 %v6568_v45 }
 0xae2   :  { %4977 = vmatprep.subr.bf16.mxu1 %v6573_v36  ;;  %5009 = vmatprep.subr.bf16.mxu0 %v6577_v51 }
 0xae5   :  { %4979 = vmatpush1.bf16.msra.mxu1 %v6575_v50  ;;  %5011 = vmatpush1.bf16.msra.mxu0 %v6580_v0 }
 0xae6   :  { %4981 = vmatprep.subr.bf16.mxu1 %v6585_v14  ;;  %5013 = vmatprep.subr.bf16.mxu0 %v6589_v33 }
 0xae9   :  { %4983 = vmatpush1.bf16.msra.mxu1 %v6587_v32  ;;  %5015 = vmatpush1.bf16.msra.mxu0 %v6592_v49 }
 0xaea   :  { %4985 = vmatprep.subr.bf16.mxu1 %v6596_v3  ;;  %5017 = vmatprep.subr.bf16.mxu0 %v6601_v5 }
 0xaed   :  { %4987 = vmatpush1.bf16.msra.mxu1 %v6598_v23  ;;  %5019 = vmatpush1.bf16.msra.mxu0 %v6604_v15 }
 0xaee   :  { %4989 = vmatprep.subr.bf16.mxu1 %v6606_v30  ;;  %5021 = vmatprep.subr.bf16.mxu0 %v6612_v28 }
 0xaf1   :  { %4991 = vmatpush1.bf16.msra.mxu1 %v6610_v2  ;;  %5023 = vmatpush1.bf16.msra.mxu0 %v6616_v43 }
 0xaf2   :  { %4993 = vmatprep.subr.bf16.mxu1 %v6618_v56  ;;  %5025 = vmatprep.subr.bf16.mxu0 %v6621_v7 }
 0xaf5   :  { %4995 = vmatpush1.bf16.msra.mxu1 %v6624_v41  ;;  %5027 = vmatpush1.bf16.msra.mxu0 %v6628_v48 }
 0xaf6   :  { %4997 = vmatprep.subr.bf16.mxu1 %v6630_v58  ;;  %5029 = vmatprep.subr.bf16.mxu0 %v6636_v47 }
 0xaf9   :  { %4999 = vmatpush1.bf16.msra.mxu1 %v6638_v52  ;;  %5031 = vmatpush1.bf16.msra.mxu0 %v6641_v18 }
 0xafa   :  { %5033 = vmatprep.subr.bf16.mxu1 %v6549_v21  ;;  %5065 = vmatprep.subr.bf16.mxu0 %v6553_v19 }
 0xbaf   :  { %v2716_v4 = vpop.f32.mrb[18].mxu1  ;;  %v2787_v62 = vpop.f32.mrb[26].mxu0 }
 0xbb0   :  { %v5410_v61 = vadd.f32 %v2716_v4, %v6695_v22  ;;  %v2718_v29 = vpop.f32.mrb[19].mxu1  ;;  %v2789_v37 = vpop.f32.mrb[27].mxu0  ;;  %v5426_v24 = vadd.f32 %v2787_v62, %v6710_v11 }
 0xbb1   :  { %v5411_v42 = vadd.f32 %v2718_v29, %v6699_v46  ;;  %v5427_v6 = vadd.f32 %v2789_v37, %v6705_v16 }
 0xbb2   :  { %v4025_v57 = vmul.f32 -1.442695, %v5410_v61 }
 0xbb3   :  { %v4026_v1 = vmul.f32 -1.442695, %v5411_v42  ;;  %v4027_v9 = vmul.f32 -1.442695, %v5427_v6 }
 0xbb4   :  { %5664 = vpow2.f32 %v4025_v57 }
 0xbb5   :  { %5666 = vpow2.f32 %v4026_v1 }
 0xbb6   :  { %5668 = vpow2.f32 %v4027_v9 }
 0xbb7   :  { %5670 = vtanh.f32 %v5426_v24 }
 0xbbe   :  { %v5665_v25 = vpop.eup %5664 }
 0xbbf   :  { %v5667_v40 = vpop.eup %5666  ;;  %v2802_v12 = vadd.f32 1.0, %v5665_v25 }
 0xbc0   :  { %v2803_v60 = vadd.f32 1.0, %v5667_v40  ;;  %v5669_v13 = vpop.eup %5668 }
 0xbc1   :  { %5672 = vrcp.f32 %v2802_v12  ;;  %v5671_v20 = vpop.eup %5670  ;;  %v2812_v55 = vadd.f32 1.0, %v5669_v13 }
 0xbc2   :  { %5674 = vrcp.f32 %v2803_v60 }
 0xbc3   :  { %5676 = vrcp.f32 %v2812_v55 }
 0xbcb   :  { %v5673_v59 = vpop.eup %5672 }
 0xbcc   :  { %v5675_v44 = vpop.eup %5674  ;;  %v2816_v54 = vmul.f32 %v5673_v59, %v5671_v20 }
 0xbcd   :  { %v2815_v34 = vmul.f32 %v5675_v44, %v6713_v35  ;;  %v5677_v39 = vpop.eup %5676 }
 0xbcf   :  { %v6755_v8 = vadd.f32 %v2816_v54, %v2815_v34 }
 0xbd1   :  { %5678 = vtanh.f32 %v6755_v8 }
 0xbdb   :  { %v5679_v26 = vpop.eup %5678 }
 0xbdc   :  { %v2819_v10 = vmul.f32 %v5679_v26, %v5677_v39 }
 0xbde   :  { %2889 = vmatmul.mubr.f32.vlgmr.msra.gmra.mrb[20].mxu1 %v2819_v10  ;;  %2960 = vmatmul.mubr.f32.vlgmr.msra.gmra.mrb[28].mxu0 %v2819_v10 }
 0xbdf   :  { %5035 = vmatpush1.bf16.msra.mxu1 %v6551_v27  ;;  %5067 = vmatpush1.bf16.msra.mxu0 %v6556_v31 }
 0xbe0   :  { %5037 = vmatprep.subr.bf16.mxu1 %v6561_v38  ;;  %5069 = vmatprep.subr.bf16.mxu0 %v6565_v53 }
 0xbe1   :  { %3062 = vmatprep.mubr.f32.mxu1 %v5908_v17  ;;  %3133 = vmatprep.mubr.f32.mxu0 %v5908_v17 }
 0xbe3   :  { %5039 = vmatpush1.bf16.msra.mxu1 %v6563_v63  ;;  %5071 = vmatpush1.bf16.msra.mxu0 %v6568_v45 }
 0xbe4   :  { %5041 = vmatprep.subr.bf16.mxu1 %v6573_v36  ;;  %5073 = vmatprep.subr.bf16.mxu0 %v6577_v51 }
 0xbe7   :  { %5043 = vmatpush1.bf16.msra.mxu1 %v6575_v50  ;;  %5075 = vmatpush1.bf16.msra.mxu0 %v6580_v0 }
 0xbe8   :  { %5045 = vmatprep.subr.bf16.mxu1 %v6585_v14  ;;  %5077 = vmatprep.subr.bf16.mxu0 %v6589_v33 }
 0xbeb   :  { %5047 = vmatpush1.bf16.msra.mxu1 %v6587_v32  ;;  %5079 = vmatpush1.bf16.msra.mxu0 %v6592_v49 }
 0xbec   :  { %5049 = vmatprep.subr.bf16.mxu1 %v6596_v3  ;;  %5081 = vmatprep.subr.bf16.mxu0 %v6601_v5 }
 0xbef   :  { %5051 = vmatpush1.bf16.msra.mxu1 %v6598_v23  ;;  %5083 = vmatpush1.bf16.msra.mxu0 %v6604_v15 }
 0xbf0   :  { %5053 = vmatprep.subr.bf16.mxu1 %v6606_v30  ;;  %5085 = vmatprep.subr.bf16.mxu0 %v6612_v28 }
 0xbf3   :  { %5055 = vmatpush1.bf16.msra.mxu1 %v6610_v2  ;;  %5087 = vmatpush1.bf16.msra.mxu0 %v6616_v43 }
 0xbf4   :  { %5057 = vmatprep.subr.bf16.mxu1 %v6618_v56  ;;  %5089 = vmatprep.subr.bf16.mxu0 %v6621_v7 }
 0xbf7   :  { %5059 = vmatpush1.bf16.msra.mxu1 %v6624_v41  ;;  %5091 = vmatpush1.bf16.msra.mxu0 %v6628_v48 }
 0xbf8   :  { %5061 = vmatprep.subr.bf16.mxu1 %v6630_v58  ;;  %5093 = vmatprep.subr.bf16.mxu0 %v6636_v47 }
 0xbfb   :  { %5063 = vmatpush1.bf16.msra.mxu1 %v6638_v52  ;;  %5095 = vmatpush1.bf16.msra.mxu0 %v6641_v18 }
 0xbfc   :  { %5097 = vmatprep.subr.bf16.mxu1 %v6549_v21  ;;  %5129 = vmatprep.subr.bf16.mxu0 %v6553_v19 }
 0xcb1   :  { %v2890_v35 = vpop.f32.mrb[20].mxu1  ;;  %v2961_v4 = vpop.f32.mrb[28].mxu0 }
 0xcb2   :  { %v5412_v62 = vadd.f32 %v2890_v35, %v6695_v22  ;;  %v2892_v61 = vpop.f32.mrb[21].mxu1  ;;  %v2963_v29 = vpop.f32.mrb[29].mxu0  ;;  %v5428_v9 = vadd.f32 %v2961_v4, %v6710_v11 }
 0xcb3   :  { %v5413_v37 = vadd.f32 %v2892_v61, %v6699_v46  ;;  %v5429_v1 = vadd.f32 %v2963_v29, %v6705_v16 }
 0xcb4   :  { %v4028_v42 = vmul.f32 -1.442695, %v5412_v62 }
 0xcb5   :  { %v4029_v57 = vmul.f32 -1.442695, %v5413_v37  ;;  %v4030_v6 = vmul.f32 -1.442695, %v5429_v1 }
 0xcb6   :  { %5680 = vpow2.f32 %v4028_v42 }
 0xcb7   :  { %5682 = vpow2.f32 %v4029_v57 }
 0xcb8   :  { %5684 = vpow2.f32 %v4030_v6 }
 0xcb9   :  { %5686 = vtanh.f32 %v5428_v9 }
 0xcc0   :  { %v5681_v24 = vpop.eup %5680 }
 0xcc1   :  { %v5683_v25 = vpop.eup %5682  ;;  %v2976_v40 = vadd.f32 1.0, %v5681_v24 }
 0xcc2   :  { %v2977_v12 = vadd.f32 1.0, %v5683_v25  ;;  %v5685_v60 = vpop.eup %5684 }
 0xcc3   :  { %5688 = vrcp.f32 %v2976_v40  ;;  %v5687_v13 = vpop.eup %5686  ;;  %v2986_v54 = vadd.f32 1.0, %v5685_v60 }
 0xcc4   :  { %5690 = vrcp.f32 %v2977_v12 }
 0xcc5   :  { %5692 = vrcp.f32 %v2986_v54 }
 0xccd   :  { %v5689_v20 = vpop.eup %5688 }
 0xcce   :  { %v5691_v59 = vpop.eup %5690  ;;  %v2990_v44 = vmul.f32 %v5689_v20, %v5687_v13 }
 0xccf   :  { %v2989_v55 = vmul.f32 %v5691_v59, %v6755_v8  ;;  %v5693_v39 = vpop.eup %5692 }
 0xcd1   :  { %v6797_v34 = vadd.f32 %v2990_v44, %v2989_v55 }
 0xcd3   :  { %5694 = vtanh.f32 %v6797_v34 }
 0xcdd   :  { %v5695_v26 = vpop.eup %5694 }
 0xcde   :  { %v2993_v10 = vmul.f32 %v5695_v26, %v5693_v39 }
 0xce0   :  { %3063 = vmatmul.mubr.f32.vlgmr.msra.gmra.mrb[22].mxu1 %v2993_v10  ;;  %3134 = vmatmul.mubr.f32.vlgmr.msra.gmra.mrb[30].mxu0 %v2993_v10 }
 0xce1   :  { %5099 = vmatpush1.bf16.msra.mxu1 %v6551_v27  ;;  %5131 = vmatpush1.bf16.msra.mxu0 %v6556_v31 }
 0xce2   :  { %5101 = vmatprep.subr.bf16.mxu1 %v6561_v38  ;;  %5133 = vmatprep.subr.bf16.mxu0 %v6565_v53 }
 0xce3   :  { %3236 = vmatprep.mubr.f32.mxu1 %v5908_v17  ;;  %3307 = vmatprep.mubr.f32.mxu0 %v5908_v17 }
 0xce5   :  { %5103 = vmatpush1.bf16.msra.mxu1 %v6563_v63  ;;  %5135 = vmatpush1.bf16.msra.mxu0 %v6568_v45 }
 0xce6   :  { %5105 = vmatprep.subr.bf16.mxu1 %v6573_v36  ;;  %5137 = vmatprep.subr.bf16.mxu0 %v6577_v51 }
 0xce9   :  { %5107 = vmatpush1.bf16.msra.mxu1 %v6575_v50  ;;  %5139 = vmatpush1.bf16.msra.mxu0 %v6580_v0 }
 0xcea   :  { %5109 = vmatprep.subr.bf16.mxu1 %v6585_v14  ;;  %5141 = vmatprep.subr.bf16.mxu0 %v6589_v33 }
 0xced   :  { %5111 = vmatpush1.bf16.msra.mxu1 %v6587_v32  ;;  %5143 = vmatpush1.bf16.msra.mxu0 %v6592_v49 }
 0xcee   :  { %5113 = vmatprep.subr.bf16.mxu1 %v6596_v3  ;;  %5145 = vmatprep.subr.bf16.mxu0 %v6601_v5 }
 0xcf1   :  { %5115 = vmatpush1.bf16.msra.mxu1 %v6598_v23  ;;  %5147 = vmatpush1.bf16.msra.mxu0 %v6604_v15 }
 0xcf2   :  { %5117 = vmatprep.subr.bf16.mxu1 %v6606_v30  ;;  %5149 = vmatprep.subr.bf16.mxu0 %v6612_v28 }
 0xcf5   :  { %5119 = vmatpush1.bf16.msra.mxu1 %v6610_v2  ;;  %5151 = vmatpush1.bf16.msra.mxu0 %v6616_v43 }
 0xcf6   :  { %5121 = vmatprep.subr.bf16.mxu1 %v6618_v56  ;;  %5153 = vmatprep.subr.bf16.mxu0 %v6621_v7 }
 0xcf9   :  { %5123 = vmatpush1.bf16.msra.mxu1 %v6624_v41  ;;  %5155 = vmatpush1.bf16.msra.mxu0 %v6628_v48 }
 0xcfa   :  { %5125 = vmatprep.subr.bf16.mxu1 %v6630_v58  ;;  %5157 = vmatprep.subr.bf16.mxu0 %v6636_v47 }
 0xcfd   :  { %5127 = vmatpush1.bf16.msra.mxu1 %v6638_v52  ;;  %5159 = vmatpush1.bf16.msra.mxu0 %v6641_v18 }
 0xcfe   :  { %5161 = vmatprep.subr.bf16.mxu1 %v6549_v21  ;;  %5193 = vmatprep.subr.bf16.mxu0 %v6553_v19 }
 0xdb3   :  { %v3064_v8 = vpop.f32.mrb[22].mxu1  ;;  %v3135_v35 = vpop.f32.mrb[30].mxu0 }
 0xdb4   :  { %v5414_v4 = vadd.f32 %v3064_v8, %v6695_v22  ;;  %v3066_v62 = vpop.f32.mrb[23].mxu1  ;;  %v3137_v61 = vpop.f32.mrb[31].mxu0  ;;  %v5430_v6 = vadd.f32 %v3135_v35, %v6710_v11 }
 0xdb5   :  { %v5415_v29 = vadd.f32 %v3066_v62, %v6699_v46  ;;  %v5431_v57 = vadd.f32 %v3137_v61, %v6705_v16 }
 0xdb6   :  { %v4031_v37 = vmul.f32 -1.442695, %v5414_v4 }
 0xdb7   :  { %v4032_v42 = vmul.f32 -1.442695, %v5415_v29  ;;  %v4033_v1 = vmul.f32 -1.442695, %v5431_v57 }
 0xdb8   :  { %5696 = vpow2.f32 %v4031_v37 }
 0xdb9   :  { %5698 = vpow2.f32 %v4032_v42 }
 0xdba   :  { %5700 = vpow2.f32 %v4033_v1 }
 0xdbb   :  { %5702 = vtanh.f32 %v5430_v6 }
 0xdc2   :  { %v5697_v9 = vpop.eup %5696 }
 0xdc3   :  { %v5699_v24 = vpop.eup %5698  ;;  %v3150_v25 = vadd.f32 1.0, %v5697_v9 }
 0xdc4   :  { %v3151_v40 = vadd.f32 1.0, %v5699_v24  ;;  %v5701_v12 = vpop.eup %5700 }
 0xdc5   :  { %5704 = vrcp.f32 %v3150_v25  ;;  %v5703_v60 = vpop.eup %5702  ;;  %v3160_v44 = vadd.f32 1.0, %v5701_v12 }
 0xdc6   :  { %5706 = vrcp.f32 %v3151_v40 }
 0xdc7   :  { %5708 = vrcp.f32 %v3160_v44 }
 0xdcf   :  { %v5705_v13 = vpop.eup %5704 }
 0xdd0   :  { %v5707_v20 = vpop.eup %5706  ;;  %v3164_v59 = vmul.f32 %v5705_v13, %v5703_v60 }
 0xdd1   :  { %v3163_v54 = vmul.f32 %v5707_v20, %v6797_v34  ;;  %v5709_v39 = vpop.eup %5708 }
 0xdd3   :  { %v6839_v55 = vadd.f32 %v3164_v59, %v3163_v54 }
 0xdd5   :  { %5710 = vtanh.f32 %v6839_v55 }
 0xddf   :  { %v5711_v26 = vpop.eup %5710 }
 0xde0   :  { %v3167_v10 = vmul.f32 %v5711_v26, %v5709_v39 }
 0xde2   :  { %3237 = vmatmul.mubr.f32.vlgmr.msra.gmra.mrb[24].mxu1 %v3167_v10  ;;  %3308 = vmatmul.mubr.f32.vlgmr.msra.gmra.mrb[32].mxu0 %v3167_v10 }
 0xde3   :  { %5163 = vmatpush1.bf16.msra.mxu1 %v6551_v27  ;;  %5195 = vmatpush1.bf16.msra.mxu0 %v6556_v31 }
 0xde4   :  { %5165 = vmatprep.subr.bf16.mxu1 %v6561_v38  ;;  %5197 = vmatprep.subr.bf16.mxu0 %v6565_v53 }
 0xde5   :  { %3410 = vmatprep.mubr.f32.mxu1 %v5908_v17  ;;  %3481 = vmatprep.mubr.f32.mxu0 %v5908_v17 }
 0xde7   :  { %5167 = vmatpush1.bf16.msra.mxu1 %v6563_v63  ;;  %5199 = vmatpush1.bf16.msra.mxu0 %v6568_v45 }
 0xde8   :  { %5169 = vmatprep.subr.bf16.mxu1 %v6573_v36  ;;  %5201 = vmatprep.subr.bf16.mxu0 %v6577_v51 }
 0xdeb   :  { %5171 = vmatpush1.bf16.msra.mxu1 %v6575_v50  ;;  %5203 = vmatpush1.bf16.msra.mxu0 %v6580_v0 }
 0xdec   :  { %5173 = vmatprep.subr.bf16.mxu1 %v6585_v14  ;;  %5205 = vmatprep.subr.bf16.mxu0 %v6589_v33 }
 0xdef   :  { %5175 = vmatpush1.bf16.msra.mxu1 %v6587_v32  ;;  %5207 = vmatpush1.bf16.msra.mxu0 %v6592_v49 }
 0xdf0   :  { %5177 = vmatprep.subr.bf16.mxu1 %v6596_v3  ;;  %5209 = vmatprep.subr.bf16.mxu0 %v6601_v5 }
 0xdf3   :  { %5179 = vmatpush1.bf16.msra.mxu1 %v6598_v23  ;;  %5211 = vmatpush1.bf16.msra.mxu0 %v6604_v15 }
 0xdf4   :  { %5181 = vmatprep.subr.bf16.mxu1 %v6606_v30  ;;  %5213 = vmatprep.subr.bf16.mxu0 %v6612_v28 }
 0xdf7   :  { %5183 = vmatpush1.bf16.msra.mxu1 %v6610_v2  ;;  %5215 = vmatpush1.bf16.msra.mxu0 %v6616_v43 }
 0xdf8   :  { %5185 = vmatprep.subr.bf16.mxu1 %v6618_v56  ;;  %5217 = vmatprep.subr.bf16.mxu0 %v6621_v7 }
 0xdfb   :  { %5187 = vmatpush1.bf16.msra.mxu1 %v6624_v41  ;;  %5219 = vmatpush1.bf16.msra.mxu0 %v6628_v48 }
 0xdfc   :  { %5189 = vmatprep.subr.bf16.mxu1 %v6630_v58  ;;  %5221 = vmatprep.subr.bf16.mxu0 %v6636_v47 }
 0xdff   :  { %5191 = vmatpush1.bf16.msra.mxu1 %v6638_v52  ;;  %5223 = vmatpush1.bf16.msra.mxu0 %v6641_v18 }
 0xe00   :  { %5225 = vmatprep.subr.bf16.mxu1 %v6549_v21  ;;  %5257 = vmatprep.subr.bf16.mxu0 %v6553_v19 }
 0xeb5   :  { %v3238_v34 = vpop.f32.mrb[24].mxu1  ;;  %v3309_v8 = vpop.f32.mrb[32].mxu0 }
 0xeb6   :  { %v5416_v35 = vadd.f32 %v3238_v34, %v6695_v22  ;;  %v3240_v4 = vpop.f32.mrb[25].mxu1  ;;  %v3311_v62 = vpop.f32.mrb[33].mxu0  ;;  %v5432_v1 = vadd.f32 %v3309_v8, %v6710_v11 }
 0xeb7   :  { %v5417_v61 = vadd.f32 %v3240_v4, %v6699_v46  ;;  %v5433_v42 = vadd.f32 %v3311_v62, %v6705_v16 }
 0xeb8   :  { %v4034_v29 = vmul.f32 -1.442695, %v5416_v35 }
 0xeb9   :  { %v4035_v37 = vmul.f32 -1.442695, %v5417_v61  ;;  %v4036_v57 = vmul.f32 -1.442695, %v5433_v42 }
 0xeba   :  { %5712 = vpow2.f32 %v4034_v29 }
 0xebb   :  { %5714 = vpow2.f32 %v4035_v37 }
 0xebc   :  { %5716 = vpow2.f32 %v4036_v57 }
 0xebd   :  { %5718 = vtanh.f32 %v5432_v1 }
 0xec4   :  { %v5713_v6 = vpop.eup %5712 }
 0xec5   :  { %v5715_v9 = vpop.eup %5714  ;;  %v3324_v24 = vadd.f32 1.0, %v5713_v6 }
 0xec6   :  { %v3325_v25 = vadd.f32 1.0, %v5715_v9  ;;  %v5717_v40 = vpop.eup %5716 }
 0xec7   :  { %5720 = vrcp.f32 %v3324_v24  ;;  %v5719_v12 = vpop.eup %5718  ;;  %v3334_v59 = vadd.f32 1.0, %v5717_v40 }
 0xec8   :  { %5722 = vrcp.f32 %v3325_v25 }
 0xec9   :  { %5724 = vrcp.f32 %v3334_v59 }
 0xed1   :  { %v5721_v60 = vpop.eup %5720 }
 0xed2   :  { %v5723_v13 = vpop.eup %5722  ;;  %v3338_v20 = vmul.f32 %v5721_v60, %v5719_v12 }
 0xed3   :  { %v3337_v44 = vmul.f32 %v5723_v13, %v6839_v55  ;;  %v5725_v39 = vpop.eup %5724 }
 0xed5   :  { %v6881_v54 = vadd.f32 %v3338_v20, %v3337_v44 }
 0xed7   :  { %5726 = vtanh.f32 %v6881_v54 }
 0xee1   :  { %v5727_v26 = vpop.eup %5726 }
 0xee2   :  { %v3341_v10 = vmul.f32 %v5727_v26, %v5725_v39  ;;  %v3867_v26 = vld [vmem:[#allocation9 + $0x18] sm:$0xff] }
 0xee4   :  { %3411 = vmatmul.mubr.f32.vlgmr.msra.gmra.mrb[26].mxu1 %v3341_v10  ;;  %3482 = vmatmul.mubr.f32.vlgmr.msra.gmra.mrb[34].mxu0 %v3341_v10 }
 0xee5   :  { %5227 = vmatpush1.bf16.msra.mxu1 %v6551_v27  ;;  %5259 = vmatpush1.bf16.msra.mxu0 %v6556_v31 }
 0xee6   :  { %5229 = vmatprep.subr.bf16.mxu1 %v6561_v38  ;;  %5261 = vmatprep.subr.bf16.mxu0 %v6565_v53 }
 0xee7   :  { %3584 = vmatprep.mubr.f32.mxu1 %v5908_v17  ;;  %3655 = vmatprep.mubr.f32.mxu0 %v5908_v17 }
 0xee9   :  { %5231 = vmatpush1.bf16.msra.mxu1 %v6563_v63  ;;  %5263 = vmatpush1.bf16.msra.mxu0 %v6568_v45 }
 0xeea   :  { %5233 = vmatprep.subr.bf16.mxu1 %v6573_v36  ;;  %5265 = vmatprep.subr.bf16.mxu0 %v6577_v51 }
 0xeed   :  { %5235 = vmatpush1.bf16.msra.mxu1 %v6575_v50  ;;  %5267 = vmatpush1.bf16.msra.mxu0 %v6580_v0 }
 0xeee   :  { %5237 = vmatprep.subr.bf16.mxu1 %v6585_v14  ;;  %5269 = vmatprep.subr.bf16.mxu0 %v6589_v33 }
 0xef1   :  { %5239 = vmatpush1.bf16.msra.mxu1 %v6587_v32  ;;  %5271 = vmatpush1.bf16.msra.mxu0 %v6592_v49 }
 0xef2   :  { %5241 = vmatprep.subr.bf16.mxu1 %v6596_v3  ;;  %5273 = vmatprep.subr.bf16.mxu0 %v6601_v5 }
 0xef5   :  { %5243 = vmatpush1.bf16.msra.mxu1 %v6598_v23  ;;  %5275 = vmatpush1.bf16.msra.mxu0 %v6604_v15 }
 0xef6   :  { %5245 = vmatprep.subr.bf16.mxu1 %v6606_v30  ;;  %5277 = vmatprep.subr.bf16.mxu0 %v6612_v28 }
 0xef9   :  { %5247 = vmatpush1.bf16.msra.mxu1 %v6610_v2  ;;  %5279 = vmatpush1.bf16.msra.mxu0 %v6616_v43 }
 0xefa   :  { %5249 = vmatprep.subr.bf16.mxu1 %v6618_v56  ;;  %5281 = vmatprep.subr.bf16.mxu0 %v6621_v7 }
 0xefd   :  { %5251 = vmatpush1.bf16.msra.mxu1 %v6624_v41  ;;  %5283 = vmatpush1.bf16.msra.mxu0 %v6628_v48 }
 0xefe   :  { %5253 = vmatprep.subr.bf16.mxu1 %v6630_v58  ;;  %5285 = vmatprep.subr.bf16.mxu0 %v6636_v47 }
 0xf01   :  { %5255 = vmatpush1.bf16.msra.mxu1 %v6638_v52  ;;  %5287 = vmatpush1.bf16.msra.mxu0 %v6641_v18 }
 0xf02   :  { %5289 = vmatprep.subr.bf16.mxu1 %v6549_v21  ;;  %5321 = vmatprep.subr.bf16.mxu0 %v6553_v19 }
 0xfb7   :  { %v3412_v55 = vpop.f32.mrb[26].mxu1  ;;  %v3483_v34 = vpop.f32.mrb[34].mxu0 }
 0xfb8   :  { %v5418_v8 = vadd.f32 %v3412_v55, %v6695_v22  ;;  %v3414_v35 = vpop.f32.mrb[27].mxu1  ;;  %v3485_v4 = vpop.f32.mrb[35].mxu0  ;;  %v5434_v57 = vadd.f32 %v3483_v34, %v6710_v11  ;;  %v3868_v55 = vld [vmem:[#allocation9 + $0x20] sm:$0xff]  ;;  %v3869_v34 = vld [vmem:[#allocation9 + $0x28] sm:$0xff] }
 0xfb9   :  { %v5419_v62 = vadd.f32 %v3414_v35, %v6699_v46  ;;  %v5435_v37 = vadd.f32 %v3485_v4, %v6705_v16  ;;  %v3870_v35 = vld [vmem:[#allocation9 + $0x30] sm:$0xff]  ;;  %v3871_v4 = vld [vmem:[#allocation9 + $0x38] sm:$0xff] }
 0xfba   :  { %v4037_v61 = vmul.f32 -1.442695, %v5418_v8  ;;  %v5359_v8 = vpack.c.bf16 %v3869_v34, %v3868_v55 }
 0xfbb   :  { %v4038_v29 = vmul.f32 -1.442695, %v5419_v62  ;;  %v4039_v42 = vmul.f32 -1.442695, %v5435_v37  ;;  %v5362_v62 = vpack.c.bf16 %v3871_v4, %v3870_v35 }
 0xfbc   :  { %5728 = vpow2.f32 %v4037_v61  ;;  %v3872_v61 = vld [vmem:[#allocation9 + $0x40] sm:$0xff] }
 0xfbd   :  { %5730 = vpow2.f32 %v4038_v29  ;;  %v3873_v29 = vld [vmem:[#allocation9 + $0x48] sm:$0xff] }
 0xfbe   :  { %5732 = vpow2.f32 %v4039_v42  ;;  %v5365_v37 = vpack.c.bf16 %v3873_v29, %v3872_v61  ;;  %v3874_v42 = vld [vmem:[#allocation9 + $0x50] sm:$0xff] }
 0xfbf   :  { %5734 = vtanh.f32 %v5434_v57  ;;  %v3875_v57 = vld [vmem:[#allocation9 + $0x58] sm:$0xff] }
 0xfc6   :  { %v5729_v21 = vpop.eup %5728 }
 0xfc7   :  { %v5731_v1 = vpop.eup %5730  ;;  %v3498_v19 = vadd.f32 1.0, %v5729_v21  ;;  %v3876_v21 = vld [vmem:[#allocation9 + $0x60] sm:$0xff] }
 0xfc8   :  { %v3499_v6 = vadd.f32 1.0, %v5731_v1  ;;  %v5733_v9 = vpop.eup %5732  ;;  %v5368_v1 = vpack.c.bf16 %v3875_v57, %v3874_v42 }
 0xfc9   :  { %5736 = vrcp.f32 %v3498_v19  ;;  %v5735_v24 = vpop.eup %5734  ;;  %v3508_v60 = vadd.f32 1.0, %v5733_v9  ;;  %v3877_v19 = vld [vmem:[#allocation9 + $0x68] sm:$0xff]  ;;  %v3878_v9 = vld [vmem:[#allocation9 + $0x70] sm:$0xff] }
 0xfca   :  { %5738 = vrcp.f32 %v3499_v6  ;;  %v5371_v6 = vpack.c.bf16 %v3877_v19, %v3876_v21 }
 0xfcb   :  { %5740 = vrcp.f32 %v3508_v60 }
 0xfd3   :  { %v5737_v25 = vpop.eup %5736 }
 0xfd4   :  { %v5739_v40 = vpop.eup %5738  ;;  %v3512_v12 = vmul.f32 %v5737_v25, %v5735_v24  ;;  %v3879_v24 = vld [vmem:[#allocation9 + $0x78] sm:$0xff] }
 0xfd5   :  { %v3511_v13 = vmul.f32 %v5739_v40, %v6881_v54  ;;  %v5741_v59 = vpop.eup %5740  ;;  %v3866_v54 = vld [vmem:[#allocation9 + $0x10] sm:$0xff]  ;;  %v5374_v25 = vpack.c.bf16 %v3879_v24, %v3878_v9 }
 0xfd6   :  { %v5356_v10 = vpack.c.bf16 %v3867_v26, %v3866_v54 }
 0xfd7   :  { %v6923_v20 = vadd.f32 %v3512_v12, %v3511_v13 }
 0xfd9   :  { %5742 = vtanh.f32 %v6923_v20 }
 0xfe3   :  { %v5743_v44 = vpop.eup %5742 }
 0xfe4   :  { %v3515_v39 = vmul.f32 %v5743_v44, %v5741_v59 }
 0xfe6   :  { %3585 = vmatmul.mubr.f32.vlgmr.msra.gmra.mrb[28].mxu1 %v3515_v39  ;;  %3656 = vmatmul.mubr.f32.vlgmr.msra.gmra.mrb[36].mxu0 %v3515_v39 }
 0xfe7   :  { %5291 = vmatpush1.bf16.msra.mxu1 %v6551_v27  ;;  %5323 = vmatpush1.bf16.msra.mxu0 %v6556_v31 }
 0xfe8   :  { %5293 = vmatprep.subr.bf16.mxu1 %v6561_v38  ;;  %5325 = vmatprep.subr.bf16.mxu0 %v6565_v53 }
 0xfe9   :  { %3758 = vmatprep.mubr.f32.mxu1 %v5908_v17  ;;  %3829 = vmatprep.mubr.f32.mxu0 %v5908_v17 }
 0xfeb   :  { %5295 = vmatpush1.bf16.msra.mxu1 %v6563_v63  ;;  %5327 = vmatpush1.bf16.msra.mxu0 %v6568_v45 }
 0xfec   :  { %5297 = vmatprep.subr.bf16.mxu1 %v6573_v36  ;;  %5329 = vmatprep.subr.bf16.mxu0 %v6577_v51 }
 0xfef   :  { %5299 = vmatpush1.bf16.msra.mxu1 %v6575_v50  ;;  %5331 = vmatpush1.bf16.msra.mxu0 %v6580_v0 }
 0xff0   :  { %5301 = vmatprep.subr.bf16.mxu1 %v6585_v14  ;;  %5333 = vmatprep.subr.bf16.mxu0 %v6589_v33 }
 0xff3   :  { %5303 = vmatpush1.bf16.msra.mxu1 %v6587_v32  ;;  %5335 = vmatpush1.bf16.msra.mxu0 %v6592_v49 }
 0xff4   :  { %5305 = vmatprep.subr.bf16.mxu1 %v6596_v3  ;;  %5337 = vmatprep.subr.bf16.mxu0 %v6601_v5 }
 0xff7   :  { %5307 = vmatpush1.bf16.msra.mxu1 %v6598_v23  ;;  %5339 = vmatpush1.bf16.msra.mxu0 %v6604_v15 }
 0xff8   :  { %5309 = vmatprep.subr.bf16.mxu1 %v6606_v30  ;;  %5341 = vmatprep.subr.bf16.mxu0 %v6612_v28 }
 0xffb   :  { %5311 = vmatpush1.bf16.msra.mxu1 %v6610_v2  ;;  %5343 = vmatpush1.bf16.msra.mxu0 %v6616_v43 }
 0xffc   :  { %5313 = vmatprep.subr.bf16.mxu1 %v6618_v56  ;;  %5345 = vmatprep.subr.bf16.mxu0 %v6621_v7 }
 0xfff   :  { %5315 = vmatpush1.bf16.msra.mxu1 %v6624_v41  ;;  %5347 = vmatpush1.bf16.msra.mxu0 %v6628_v48 }
0x1000   :  { %5317 = vmatprep.subr.bf16.mxu1 %v6630_v58  ;;  %5349 = vmatprep.subr.bf16.mxu0 %v6636_v47  ;;  %v3864_v58 = vld [vmem:[#allocation9] sm:$0xff]  ;;  %v3865_v47 = vld [vmem:[#allocation9 + $0x8] sm:$0xff] }
0x1003   :  { %5319 = vmatpush1.bf16.msra.mxu1 %v6638_v52  ;;  %5351 = vmatpush1.bf16.msra.mxu0 %v6641_v18  ;;  %v5353_v52 = vpack.c.bf16 %v3865_v47, %v3864_v58  ;;  %v5909_v18 = vmov 0.0|0.0  }
0x1004   :  { %5352 = vmatprep.subr.bf16.mxu1 %v5909_v18 }
0x10b9   :  { %v3586_v27 = vpop.f32.mrb[28].mxu1  ;;  %v3657_v31 = vpop.f32.mrb[36].mxu0 }
0x10ba   :  { %v5420_v38 = vadd.f32 %v3586_v27, %v6695_v22  ;;  %v3588_v63 = vpop.f32.mrb[29].mxu1  ;;  %v3659_v53 = vpop.f32.mrb[37].mxu0  ;;  %v5436_v14 = vadd.f32 %v3657_v31, %v6710_v11 }
0x10bb   :  { %v5421_v45 = vadd.f32 %v3588_v63, %v6699_v46  ;;  %v5437_v51 = vadd.f32 %v3659_v53, %v6705_v16 }
0x10bc   :  { %v4040_v36 = vmul.f32 -1.442695, %v5420_v38 }
0x10bd   :  { %v4041_v50 = vmul.f32 -1.442695, %v5421_v45  ;;  %v4042_v0 = vmul.f32 -1.442695, %v5437_v51 }
0x10be   :  { %5744 = vpow2.f32 %v4040_v36 }
0x10bf   :  { %5746 = vpow2.f32 %v4041_v50 }
0x10c0   :  { %5748 = vpow2.f32 %v4042_v0 }
0x10c1   :  { %5750 = vtanh.f32 %v5436_v14 }
0x10c8   :  { %v5745_v32 = vpop.eup %5744 }
0x10c9   :  { %v5747_v33 = vpop.eup %5746  ;;  %v3672_v49 = vadd.f32 1.0, %v5745_v32 }
0x10ca   :  { %v3673_v3 = vadd.f32 1.0, %v5747_v33  ;;  %v5749_v23 = vpop.eup %5748 }
0x10cb   :  { %5752 = vrcp.f32 %v3672_v49  ;;  %v5751_v5 = vpop.eup %5750  ;;  %v3682_v28 = vadd.f32 1.0, %v5749_v23  ;;  %v4046_v49 = vld [vmem:[%s6993_s6] ss:$0 sm:$0xff] }
0x10cc   :  { %5754 = vrcp.f32 %v3673_v3 }
0x10cd   :  { %5756 = vrcp.f32 %v3682_v28 }
0x10d5   :  { %v5753_v15 = vpop.eup %5752 }
0x10d6   :  { %v5755_v30 = vpop.eup %5754  ;;  %v3686_v2 = vmul.f32 %v5753_v15, %v5751_v5 }
0x10d7   :  { %v3685_v43 = vmul.f32 %v5755_v30, %v6923_v20  ;;  %v5757_v7 = vpop.eup %5756 }
0x10d9   :  { %v6963_v56 = vadd.f32 %v3686_v2, %v3685_v43 }
0x10db   :  { %5758 = vtanh.f32 %v6963_v56 }
0x10e5   :  { %v5759_v41 = vpop.eup %5758 }
0x10e6   :  { %v3689_v48 = vmul.f32 %v5759_v41, %v5757_v7 }
0x10e8   :  { %3759 = vmatmul.mubr.f32.vlgmr.msra.gmra.mrb[30].mxu1 %v3689_v48  ;;  %3830 = vmatmul.mubr.f32.vlgmr.msra.gmra.mrb[38].mxu0 %v3689_v48 }
0x10e9   :  { %5354 = vmatpush3.bf16.msra.mxu1 %v5353_v52  ;;  %4165 = vmatprep.mubr.msk.f32.mxu1 %vm5910_vm8, %v5908_v17 }
0x10ea   :  { %5355 = vmatprep.subr.bf16.mxu1 %v5909_v18 }
0x10ed   :  { %5357 = vmatpush3.bf16.msra.mxu1 %v5356_v10 }
0x10ee   :  { %5358 = vmatprep.subr.bf16.mxu1 %v5909_v18 }
0x10f1   :  { %5360 = vmatpush3.bf16.msra.mxu1 %v5359_v8 }
0x10f2   :  { %5361 = vmatprep.subr.bf16.mxu1 %v5909_v18 }
0x10f5   :  { %5363 = vmatpush3.bf16.msra.mxu1 %v5362_v62 }
0x10f6   :  { %5364 = vmatprep.subr.bf16.mxu1 %v5909_v18 }
0x10f9   :  { %5366 = vmatpush3.bf16.msra.mxu1 %v5365_v37 }
0x10fa   :  { %5367 = vmatprep.subr.bf16.mxu1 %v5909_v18 }
0x10fd   :  { %5369 = vmatpush3.bf16.msra.mxu1 %v5368_v1 }
0x10fe   :  { %5370 = vmatprep.subr.bf16.mxu1 %v5909_v18 }
0x1101   :  { %5372 = vmatpush3.bf16.msra.mxu1 %v5371_v6 }
0x1102   :  { %5373 = vmatprep.subr.bf16.mxu1 %v5909_v18 }
0x1105   :  { %5375 = vmatpush3.bf16.msra.mxu1 %v5374_v25 }
0x11bb   :  { %v3760_v40 = vpop.f32.mrb[30].mxu1  ;;  %v3831_v12 = vpop.f32.mrb[38].mxu0 }
0x11bc   :  { %v5422_v60 = vadd.f32 %v3760_v40, %v6695_v22  ;;  %v3762_v13 = vpop.f32.mrb[31].mxu1  ;;  %v3833_v20 = vpop.f32.mrb[39].mxu0  ;;  %v5438_v31 = vadd.f32 %v3831_v12, %v6710_v11 }
0x11bd   :  { %v5423_v59 = vadd.f32 %v3762_v13, %v6699_v46  ;;  %v5439_v17 = vadd.f32 %v3833_v20, %v6705_v16 }
0x11be   :  { %v4043_v44 = vmul.f32 -1.442695, %v5422_v60 }
0x11bf   :  { %v4044_v39 = vmul.f32 -1.442695, %v5423_v59  ;;  %v4045_v27 = vmul.f32 -1.442695, %v5439_v17 }
0x11c0   :  { %5760 = vpow2.f32 %v4043_v44 }
0x11c1   :  { %5762 = vpow2.f32 %v4044_v39 }
0x11c2   :  { %5764 = vpow2.f32 %v4045_v27 }
0x11c3   :  { %5766 = vtanh.f32 %v5438_v31 }
0x11ca   :  { %v5761_v38 = vpop.eup %5760 }
0x11cb   :  { %v5763_v63 = vpop.eup %5762  ;;  %v3846_v53 = vadd.f32 1.0, %v5761_v38 }
0x11cc   :  { %v3847_v45 = vadd.f32 1.0, %v5763_v63  ;;  %v5765_v22 = vpop.eup %5764 }
0x11cd   :  { %5768 = vrcp.f32 %v3846_v53  ;;  %v5767_v36 = vpop.eup %5766  ;;  %v3856_v0 = vadd.f32 1.0, %v5765_v22 }
0x11ce   :  { %5770 = vrcp.f32 %v3847_v45 }
0x11cf   :  { %5772 = vrcp.f32 %v3856_v0 }
0x11d7   :  { %v5769_v46 = vpop.eup %5768 }
0x11d8   :  { %v5771_v50 = vpop.eup %5770  ;;  %v3860_v51 = vmul.f32 %v5769_v46, %v5767_v36 }
0x11d9   :  { %v3859_v14 = vmul.f32 %v5771_v50, %v6963_v56  ;;  %v5773_v11 = vpop.eup %5772 }
0x11db   :  { %v3861_v16 = vadd.f32 %v3860_v51, %v3859_v14 }
0x11dd   :  { %5774 = vtanh.f32 %v3861_v16 }
0x11e7   :  { %v5775_v32 = vpop.eup %5774 }
0x11e8   :  { %v3863_v33 = vmul.f32 %v5775_v32, %v5773_v11 }
0x11ea   :  { %4166 = vmatmul.mubr.f32.vlgmr.msra.gmra.mrb[32].mxu1 %v3863_v33 }
0x12bd   :  { %v3953_v3 = vpop.f32.mrb[32].mxu1 }
0x12be   :  { %v3954_v23 = vadd.f32 %v4046_v49, %v3953_v3  ;;  %v4167_v5 = vpop.f32.mrb[33].mxu1 }
0x12c0   :  { %v4047_v15 = vmul.f32 -1.442695, %v3954_v23 }
0x12c2   :  { %5776 = vpow2.f32 %v4047_v15 }
0x12cc   :  { %v5777_v30 = vpop.eup %5776 }
0x12cd   :  { %v3960_v2 = vadd.f32 1.0, %v5777_v30 }
0x12cf   :  { %5778 = vrcp.f32 %v3960_v2 }
0x12d9   :  { %v5779_v28 = vpop.eup %5778 }
0x12da   :  { %3963 = vst [vmem:[#allocation11] sm:$0xff] %v5779_v28 }
0x12db   :  { %5879 = shalt.err (!%p5876_p8)
}
0x12dc   :  { %s5880_s28 = scalar_lea.hbm %s6994_s7, 128 }
0x12dd   :  { %p5881_p9 = scmp.ne.s32.totalorder %s6994_s7, %s5880_s28  ;;  %p5884_p10 = scmp.lt.u32.totalorder %s5880_s28, %s6994_s7 }
0x12df   :  { %p5886_p11 = pnand %p5884_p10, %p5881_p9 }
0x12e1   :  { %5889 = shalt.err (!%p5886_p11)
}
0x12e2   :  { %3973 = dma.vmem_to_hbm [thread:$0]  %s3971_s24, 128, %s6994_s7, [#allocation5]  }
0x12e3   :  { %5896 = dma.done.wait [#allocation5], 128  }
0x12e4   :  { %5897 = vsyncadd [#allocation5], 4294967168 }
0x12e5   :  { %3977 = vsyncpa [#allocation4], 1 }
0x12e6   :  { %3978 = vsyncpa [#allocation7], 1 }
0x12e7   :  { %3979 = vsyncpa [#allocation10], 1 }
0x12e8   :  { %3980 = vsyncpa [#allocation5], 1 }

</bundles_post_ra>
